<compile_context>
chip_gen: v7x
topology: tpu7x:2x2x1
jax: 0.10.0
libtpu: 0.0.40
codegen_flags: <defaults>
</compile_context>

<pallas_src>
import math

import jax
import jax.numpy as jnp
from jax import lax
from jax.experimental import pallas as pl
from jax.experimental.pallas import tpu as pltpu


_VMEM_LIMIT = 48 * 1024 * 1024  # safe on v7x (64 MiB physical); ample for these tiles.


def _pick_batch_tile(n, max_tile=8):
    """Largest batch tile <= max_tile dividing n, preferring >= 2 grid steps."""
    for bt in (8, 4, 2, 1):
        if bt <= max_tile and n % bt == 0 and n // bt >= 2:
            return bt
    for bt in (8, 4, 2, 1):
        if bt <= max_tile and n % bt == 0:
            return bt
    return 1


# ----------------------------------------------------------------------------
# Fused MaxPool2d(3, stride=2) -> BN(eval) -> ReLU tail, applied to the f32
# conv output held in VMEM. Pooling is separable; both directions use the
# even/odd pair-reshape trick: 3 maxes per direction, no concatenation.
# ----------------------------------------------------------------------------
def _pool_bn_relu(conv, scale, shift, Ho, Wo, out_dtype):
    B, Hc, Wc, C = conv.shape
    xr = conv.reshape(B, Hc // 2, 2, Wc, C)
    ev, od = xr[:, :, 0], xr[:, :, 1]                     # rows 0,2,.. / 1,3,..
    hp = jnp.maximum(jnp.maximum(ev[:, :Ho], od[:, :Ho]), ev[:, 1:Ho + 1])
    wr = hp.reshape(B, Ho, Wc // 2, 2, C)
    evw, odw = wr[:, :, :, 0], wr[:, :, :, 1]             # cols 0,2,.. / 1,3,..
    pooled = jnp.maximum(jnp.maximum(evw[:, :, :Wo], odw[:, :, :Wo]),
                         evw[:, :, 1:Wo + 1])
    y = jnp.maximum(pooled * scale + shift, 0.0)
    return y.astype(out_dtype)


# ----------------------------------------------------------------------------
# Block 1: single im2col matmul (K=128) -> pool -> BN -> ReLU
# ----------------------------------------------------------------------------
def _make_conv1_kernel(B, Hc, Wc, Ho, Wo, Cout):
    def kernel(p_ref, w_ref, s_ref, t_ref, o_ref):
        p = p_ref[...]                                    # (B, Hc*Wc, K) bf16
        conv = jnp.dot(p.reshape(B * Hc * Wc, p.shape[-1]), w_ref[...],
                       preferred_element_type=jnp.float32)
        conv = conv.reshape(B, Hc, Wc, Cout)
        o_ref[...] = _pool_bn_relu(conv, s_ref[...], t_ref[...], Ho, Wo, o_ref.dtype)
    return kernel


def conv1_pool_bn_relu(patches, taps, scale, shift, *, Hc=32, Wc=32, Ho=15, Wo=15):
    N, P, K = patches.shape
    Cout = taps.shape[-1]
    B = _pick_batch_tile(N)
    return pl.pallas_call(
        _make_conv1_kernel(B, Hc, Wc, Ho, Wo, Cout),
        out_shape=jax.ShapeDtypeStruct((N, Ho, Wo, Cout), jnp.bfloat16),
        grid=(N // B,),
        in_specs=[
            pl.BlockSpec((B, P, K), lambda n: (n, 0, 0)),
            pl.BlockSpec((K, Cout), lambda n: (0, 0)),
            pl.BlockSpec((1, 1, Cout), lambda n: (0, 0, 0)),
            pl.BlockSpec((1, 1, Cout), lambda n: (0, 0, 0)),
        ],
        out_specs=pl.BlockSpec((B, Ho, Wo, Cout), lambda n: (n, 0, 0, 0)),
        compiler_params=pltpu.CompilerParams(
            dimension_semantics=("parallel",),
            vmem_limit_bytes=_VMEM_LIMIT),
    )(patches, taps, scale, shift)


# ----------------------------------------------------------------------------
# Block 2: 5 matmuls with K=320 (width pre-packed in the wrapper; kh slices are
# outer-dim, layout-preserving) -> pool -> BN -> ReLU
# ----------------------------------------------------------------------------
def _make_conv2_kernel(B, Hc, Wc, Ho, Wo, Cout):
    def kernel(x_ref, w_ref, s_ref, t_ref, o_ref):
        x = x_ref[...]                                    # (B, Hc+4, Wc, 5*Cin) bf16
        K = x.shape[-1]
        acc = jnp.zeros((B * Hc * Wc, Cout), jnp.float32)
        for dh in range(5):
            patch = x[:, dh:dh + Hc]                      # outer-dim slice (free)
            acc = acc + jnp.dot(patch.reshape(B * Hc * Wc, K), w_ref[dh],
                                preferred_element_type=jnp.float32)
        conv = acc.reshape(B, Hc, Wc, Cout)
        o_ref[...] = _pool_bn_relu(conv, s_ref[...], t_ref[...], Ho, Wo, o_ref.dtype)
    return kernel


def conv2_pool_bn_relu(xw, taps, scale, shift, *, Hc=16, Wc=16, Ho=7, Wo=7):
    N, Hp, Wc_in, K = xw.shape
    Cout = taps.shape[-1]
    B = _pick_batch_tile(N)
    return pl.pallas_call(
        _make_conv2_kernel(B, Hc, Wc, Ho, Wo, Cout),
        out_shape=jax.ShapeDtypeStruct((N, Ho, Wo, Cout), jnp.bfloat16),
        grid=(N // B,),
        in_specs=[
            pl.BlockSpec((B, Hp, Wc_in, K), lambda n: (n, 0, 0, 0)),
            pl.BlockSpec(taps.shape, lambda n: (0, 0, 0)),
            pl.BlockSpec((1, 1, Cout), lambda n: (0, 0, 0)),
            pl.BlockSpec((1, 1, Cout), lambda n: (0, 0, 0)),
        ],
        out_specs=pl.BlockSpec((B, Ho, Wo, Cout), lambda n: (n, 0, 0, 0)),
        compiler_params=pltpu.CompilerParams(
            dimension_semantics=("parallel",),
            vmem_limit_bytes=_VMEM_LIMIT),
    )(xw, taps, scale, shift)


# ----------------------------------------------------------------------------
# Classifier: Linear -> BN -> ReLU -> [Dropout=id] -> Linear -> BN -> ReLU ->
#             [Dropout=id] -> Linear(+bias). Gridded over batch rows; weights
#             stay resident (constant index_map).
# ----------------------------------------------------------------------------
def _classifier_kernel(x_ref, w1_ref, s1_ref, t1_ref, w2_ref, s2_ref, t2_ref,
                       w3_ref, b3_ref, o_ref):
    h = jnp.dot(x_ref[...], w1_ref[...], preferred_element_type=jnp.float32)
    h = jnp.maximum(h * s1_ref[...] + t1_ref[...], 0.0)
    h = jnp.dot(h.astype(jnp.bfloat16), w2_ref[...], preferred_element_type=jnp.float32)
    h = jnp.maximum(h * s2_ref[...] + t2_ref[...], 0.0)
    out = jnp.dot(h.astype(jnp.bfloat16), w3_ref[...], preferred_element_type=jnp.float32)
    o_ref[...] = out + b3_ref[...]


def classifier(x, w1, s1, t1, w2, s2, t2, w3, b3):
    N, D = x.shape
    C = w3.shape[-1]
    B = min(N, 512)
    if N % B:
        B = N                                   # fall back to full batch in one block
    def resident(a):
        nd = a.ndim
        return pl.BlockSpec(a.shape, lambda i, _nd=nd: (0,) * _nd)
    return pl.pallas_call(
        _classifier_kernel,
        out_shape=jax.ShapeDtypeStruct((N, C), jnp.float32),
        grid=(N // B,),
        in_specs=[pl.BlockSpec((B, D), lambda i: (i, 0))]
                 + [resident(a) for a in (w1, s1, t1, w2, s2, t2, w3, b3)],
        out_specs=pl.BlockSpec((B, C), lambda i: (i, 0)),
        compiler_params=pltpu.CompilerParams(
            dimension_semantics=("parallel",),
            vmem_limit_bytes=_VMEM_LIMIT),
    )(x, w1, s1, t1, w2, s2, t2, w3, b3)


# ----------------------------------------------------------------------------
# Wrapper-side im2col glue (plain XLA, tiny tensors)
# ----------------------------------------------------------------------------
def _im2col_conv1(x_nhwc, k_pad=128):
    """(N,32,32,3) f32 -> (N, 1024, 128) bf16 patches; K order = (kh, kw, cin)."""
    N = x_nhwc.shape[0]
    xp = jnp.pad(x_nhwc, ((0, 0), (2, 2), (2, 2), (0, 0)))          # (N,36,36,3)
    cols = [xp[:, dh:dh + 32, dw:dw + 32, :] for dh in range(5) for dw in range(5)]
    patches = jnp.concatenate(cols, axis=-1)                        # (N,32,32,75)
    patches = jnp.pad(patches, ((0, 0), (0, 0), (0, 0), (0, k_pad - patches.shape[-1])))
    return patches.reshape(N, 32 * 32, k_pad).astype(jnp.bfloat16)


def _width_im2col_conv2(f1):
    """(N,15,15,64) -> (N,20,16,320) bf16; channel order = (kw, cin).
    Spatial pad = 2 (conv padding) + 1 extra zero row/col so the in-kernel conv
    extent is 16x16 (8-aligned); the extra output row/col is never read by pool."""
    xp = jnp.pad(f1, ((0, 0), (2, 3), (2, 3), (0, 0)))              # (N,20,20,64)
    xw = jnp.concatenate([xp[:, :, dw:dw + 16, :] for dw in range(5)], axis=-1)
    return xw.astype(jnp.bfloat16)                                  # (N,20,16,320)


# ----------------------------------------------------------------------------
# Parameters (deterministic) + forward
# ----------------------------------------------------------------------------
def fold_bn(gamma, beta, mean, var, eps=1e-5):
    scale = gamma / jnp.sqrt(var + eps)
    shift = beta - mean * scale
    return scale, shift


def init_params(key, num_classes=10):
    ks = jax.random.split(key, 16)

    def nrm(k, shape, scale):
        return jax.random.normal(k, shape, jnp.float32) * scale

    # torch-layout weights
    conv1_w = nrm(ks[0], (64, 3, 5, 5), 1.0 / math.sqrt(3 * 25))        # OIHW
    conv2_w = nrm(ks[1], (64, 64, 5, 5), 1.0 / math.sqrt(64 * 25))
    fc1_w = nrm(ks[2], (384, 64 * 7 * 7), 1.0 / math.sqrt(64 * 7 * 7))  # (out,in)
    fc2_w = nrm(ks[3], (192, 384), 1.0 / math.sqrt(384))
    fc3_w = nrm(ks[4], (num_classes, 192), 1.0 / math.sqrt(192))
    fc3_b = nrm(ks[5], (num_classes,), 1.0 / math.sqrt(192))

    def bn(kg, kb, n):
        gamma = 1.0 + 0.1 * jax.random.normal(kg, (n,), jnp.float32)
        beta = 0.1 * jax.random.normal(kb, (n,), jnp.float32)
        return fold_bn(gamma, beta, jnp.zeros((n,)), jnp.ones((n,)))

    s1, t1 = bn(ks[6], ks[7], 64)
    s2, t2 = bn(ks[8], ks[9], 64)
    sf1, tf1 = bn(ks[10], ks[11], 384)
    sf2, tf2 = bn(ks[12], ks[13], 192)

    # kernel-layout packing (bf16 matmul operands, f32 scale/shift)
    conv1_taps = jnp.transpose(conv1_w, (2, 3, 1, 0)).reshape(75, 64)   # (kh,kw,cin)->K
    conv1_taps = jnp.pad(conv1_taps, ((0, 128 - 75), (0, 0))).astype(jnp.bfloat16)
    conv2_taps = jnp.transpose(conv2_w, (2, 3, 1, 0)).reshape(5, 5 * 64, 64)  # per-kh (kw,cin)->K
    conv2_taps = conv2_taps.astype(jnp.bfloat16)
    # fc1 rows permuted so the NHWC flatten (s*64 + c) matches torch's NCHW view (c*49 + s)
    fc1_w_packed = jnp.transpose(fc1_w.reshape(384, 64, 7 * 7), (2, 1, 0))
    fc1_w_packed = fc1_w_packed.reshape(7 * 7 * 64, 384).astype(jnp.bfloat16)

    p = dict(
        conv1_taps=conv1_taps, conv2_taps=conv2_taps,
        bn1_scale=s1.reshape(1, 1, 64), bn1_shift=t1.reshape(1, 1, 64),
        bn2_scale=s2.reshape(1, 1, 64), bn2_shift=t2.reshape(1, 1, 64),
        fc1_w=fc1_w_packed,
        fc2_w=fc2_w.T.astype(jnp.bfloat16),
        fc3_w=fc3_w.T.astype(jnp.bfloat16),
        bnf1_scale=sf1.reshape(1, 384), bnf1_shift=tf1.reshape(1, 384),
        bnf2_scale=sf2.reshape(1, 192), bnf2_shift=tf2.reshape(1, 192),
        fc3_b=fc3_b.reshape(1, num_classes),
    )
    ref = dict(conv1_w=conv1_w, conv2_w=conv2_w, fc1_w=fc1_w, fc2_w=fc2_w,
               fc3_w=fc3_w, fc3_b=fc3_b, s1=s1, t1=t1, s2=s2, t2=t2,
               sf1=sf1, tf1=tf1, sf2=sf2, tf2=tf2)
    return p, ref


def alexnet_forward(x_nchw, p):
    N = x_nchw.shape[0]
    x = jnp.transpose(x_nchw, (0, 2, 3, 1)).astype(jnp.float32)      # NCHW -> NHWC
    # Block 1: conv(3->64,k5,p2) -> pool(3,2) -> BN -> ReLU ; 32x32 -> 15x15
    f1 = conv1_pool_bn_relu(_im2col_conv1(x), p['conv1_taps'],
                            p['bn1_scale'], p['bn1_shift'])           # (N,15,15,64) bf16
    # Block 2: conv(64->64,k5,p2) -> pool(3,2) -> BN -> ReLU ; 15x15 -> 7x7
    f2 = conv2_pool_bn_relu(_width_im2col_conv2(f1), p['conv2_taps'],
                            p['bn2_scale'], p['bn2_shift'])           # (N,7,7,64) bf16
    # NHWC flatten consumed directly (fc1 rows were permuted to match torch's view)
    flat = f2.reshape(N, 7 * 7 * 64)
    return classifier(flat, p['fc1_w'], p['bnf1_scale'], p['bnf1_shift'],
                      p['fc2_w'], p['bnf2_scale'], p['bnf2_shift'],
                      p['fc3_w'], p['fc3_b'])


# Pure-JAX reference with matching numerics (bf16 matmul operands, f32 accum).
def reference_forward(x_nchw, r):
    N = x_nchw.shape[0]
    x = jnp.transpose(x_nchw, (0, 2, 3, 1))

    def block(x, w_oihw, s, t):
        w = jnp.transpose(w_oihw, (2, 3, 1, 0)).astype(jnp.bfloat16)  # HWIO
        y = lax.conv_general_dilated(x.astype(jnp.bfloat16), w, (1, 1),
                                     [(2, 2), (2, 2)],
                                     dimension_numbers=('NHWC', 'HWIO', 'NHWC'),
                                     preferred_element_type=jnp.float32)
        y = lax.reduce_window(y, -jnp.inf, lax.max, (1, 3, 3, 1), (1, 2, 2, 1), 'VALID')
        return jnp.maximum(y * s + t, 0.0)

    def lin(a, w_oi):
        return jnp.dot(a.astype(jnp.bfloat16), w_oi.T.astype(jnp.bfloat16),
                       preferred_element_type=jnp.float32)

    y = block(x, r['conv1_w'], r['s1'], r['t1'])
    y = block(y, r['conv2_w'], r['s2'], r['t2'])
    flat = jnp.transpose(y, (0, 3, 1, 2)).reshape(N, -1)   # torch .view(-1, 64*7*7)
    h = jnp.maximum(lin(flat, r['fc1_w']) * r['sf1'] + r['tf1'], 0.0)
    h = jnp.maximum(lin(h, r['fc2_w']) * r['sf2'] + r['tf2'], 0.0)
    return lin(h, r['fc3_w']) + r['fc3_b']


if __name__ == "__main__":
    key = jax.random.PRNGKey(0)
    kx, kp = jax.random.split(key)
    # CIFAR-shaped input is required by the 64*7*7 flatten: NCHW (2, 3, 32, 32).
    x = jax.random.normal(kx, (2, 3, 32, 32), jnp.float32)
    params, ref_params = init_params(kp, num_classes=10)

    out = jax.block_until_ready(alexnet_forward(x, params))
    assert out.shape == (2, 10), out.shape

    ref = jax.block_until_ready(reference_forward(x, ref_params))
    err = float(jnp.max(jnp.abs(out - ref)))
    assert err < 5e-2, f"mismatch vs reference: max abs err = {err}"

    print("KERNEL_OK")
</pallas_src>

<mosaic_0001>
module attributes {stable_mosaic.version = 11 : i64} {
  func.func @kernel(%arg0: i32, %arg1: memref<1x1024x128xbf16, #tpu.memory_space<vmem>>, %arg2: memref<128x64xbf16, #tpu.memory_space<vmem>>, %arg3: memref<1x1x64xf32, #tpu.memory_space<vmem>>, %arg4: memref<1x1x64xf32, #tpu.memory_space<vmem>>, %arg5: memref<1x15x15x64xbf16, #tpu.memory_space<vmem>>) attributes {dimension_semantics = [#tpu.dimension_semantics<parallel>], iteration_bounds = array<i64: 2>, scalar_prefetch = 0 : i64, scratch_operands = 0 : i64, tpu.core_type = #tpu.core_type<tc>, window_params = [{transform_indices = @transform_0, window_bounds = array<i64: 1, 1024, 128>}, {pipeline_mode = #tpu.pipeline_mode<synchronous>, transform_indices = @transform_1, window_bounds = array<i64: 128, 64>}, {pipeline_mode = #tpu.pipeline_mode<synchronous>, transform_indices = @transform_2, window_bounds = array<i64: 1, 1, 64>}, {pipeline_mode = #tpu.pipeline_mode<synchronous>, transform_indices = @transform_3, window_bounds = array<i64: 1, 1, 64>}, {transform_indices = @transform_4, window_bounds = array<i64: 1, 15, 15, 64>}]} {
    %c0 = arith.constant 0 : index
    %c0_0 = arith.constant 0 : index
    %c0_1 = arith.constant 0 : index
    %0 = vector.load %arg1[%c0, %c0_0, %c0_1] : memref<1x1024x128xbf16, #tpu.memory_space<vmem>>, vector<1x1024x128xbf16>
    %1 = vector.shape_cast %0 : vector<1x1024x128xbf16> to vector<1024x128xbf16>
    %c0_2 = arith.constant 0 : index
    %c0_3 = arith.constant 0 : index
    %2 = vector.load %arg2[%c0_2, %c0_3] : memref<128x64xbf16, #tpu.memory_space<vmem>>, vector<128x64xbf16>
    %cst = arith.constant dense<0.000000e+00> : vector<1024x64xf32>
    %3 = tpu.matmul %1, %2, %cst {dimension_numbers = #tpu.dot_dimension_numbers<[1], [0], [0], [1], [0, 0, 1, 1], [], []>} : vector<1024x128xbf16>, vector<128x64xbf16>, vector<1024x64xf32> -> vector<1024x64xf32>
    %4 = vector.shape_cast %3 : vector<1024x64xf32> to vector<1x32x32x64xf32>
    %c0_4 = arith.constant 0 : index
    %c0_5 = arith.constant 0 : index
    %c0_6 = arith.constant 0 : index
    %5 = vector.load %arg3[%c0_4, %c0_5, %c0_6] : memref<1x1x64xf32, #tpu.memory_space<vmem>>, vector<1x1x64xf32>
    %c0_7 = arith.constant 0 : index
    %c0_8 = arith.constant 0 : index
    %c0_9 = arith.constant 0 : index
    %6 = vector.load %arg4[%c0_7, %c0_8, %c0_9] : memref<1x1x64xf32, #tpu.memory_space<vmem>>, vector<1x1x64xf32>
    %7 = vector.shape_cast %4 : vector<1x32x32x64xf32> to vector<1x16x2x32x64xf32>
    %8 = vector.extract_strided_slice %7 {offsets = [0, 0, 0, 0, 0], sizes = [1, 16, 1, 32, 64], strides = [1, 1, 1, 1, 1]} : vector<1x16x2x32x64xf32> to vector<1x16x1x32x64xf32>
    %9 = vector.shape_cast %8 : vector<1x16x1x32x64xf32> to vector<1x16x32x64xf32>
    %10 = vector.extract_strided_slice %7 {offsets = [0, 0, 1, 0, 0], sizes = [1, 16, 1, 32, 64], strides = [1, 1, 1, 1, 1]} : vector<1x16x2x32x64xf32> to vector<1x16x1x32x64xf32>
    %11 = vector.shape_cast %10 : vector<1x16x1x32x64xf32> to vector<1x16x32x64xf32>
    %12 = vector.extract_strided_slice %9 {offsets = [0, 0, 0, 0], sizes = [1, 15, 32, 64], strides = [1, 1, 1, 1]} : vector<1x16x32x64xf32> to vector<1x15x32x64xf32>
    %13 = vector.extract_strided_slice %11 {offsets = [0, 0, 0, 0], sizes = [1, 15, 32, 64], strides = [1, 1, 1, 1]} : vector<1x16x32x64xf32> to vector<1x15x32x64xf32>
    %14 = arith.maximumf %12, %13 : vector<1x15x32x64xf32>
    %15 = vector.extract_strided_slice %9 {offsets = [0, 1, 0, 0], sizes = [1, 15, 32, 64], strides = [1, 1, 1, 1]} : vector<1x16x32x64xf32> to vector<1x15x32x64xf32>
    %16 = arith.maximumf %14, %15 : vector<1x15x32x64xf32>
    %17 = vector.shape_cast %16 : vector<1x15x32x64xf32> to vector<1x15x16x2x64xf32>
    %18 = vector.extract_strided_slice %17 {offsets = [0, 0, 0, 0, 0], sizes = [1, 15, 16, 1, 64], strides = [1, 1, 1, 1, 1]} : vector<1x15x16x2x64xf32> to vector<1x15x16x1x64xf32>
    %19 = vector.shape_cast %18 : vector<1x15x16x1x64xf32> to vector<1x15x16x64xf32>
    %20 = vector.extract_strided_slice %17 {offsets = [0, 0, 0, 1, 0], sizes = [1, 15, 16, 1, 64], strides = [1, 1, 1, 1, 1]} : vector<1x15x16x2x64xf32> to vector<1x15x16x1x64xf32>
    %21 = vector.shape_cast %20 : vector<1x15x16x1x64xf32> to vector<1x15x16x64xf32>
    %22 = vector.extract_strided_slice %19 {offsets = [0, 0, 0, 0], sizes = [1, 15, 15, 64], strides = [1, 1, 1, 1]} : vector<1x15x16x64xf32> to vector<1x15x15x64xf32>
    %23 = vector.extract_strided_slice %21 {offsets = [0, 0, 0, 0], sizes = [1, 15, 15, 64], strides = [1, 1, 1, 1]} : vector<1x15x16x64xf32> to vector<1x15x15x64xf32>
    %24 = arith.maximumf %22, %23 : vector<1x15x15x64xf32>
    %25 = vector.extract_strided_slice %19 {offsets = [0, 0, 1, 0], sizes = [1, 15, 15, 64], strides = [1, 1, 1, 1]} : vector<1x15x16x64xf32> to vector<1x15x15x64xf32>
    %26 = arith.maximumf %24, %25 : vector<1x15x15x64xf32>
    %27 = vector.shape_cast %5 : vector<1x1x64xf32> to vector<1x1x1x64xf32>
    %28 = vector.broadcast %27 : vector<1x1x1x64xf32> to vector<1x15x15x64xf32>
    %29 = arith.mulf %26, %28 : vector<1x15x15x64xf32>
    %30 = vector.shape_cast %6 : vector<1x1x64xf32> to vector<1x1x1x64xf32>
    %31 = vector.broadcast %30 : vector<1x1x1x64xf32> to vector<1x15x15x64xf32>
    %32 = arith.addf %29, %31 : vector<1x15x15x64xf32>
    %cst_10 = arith.constant 0.000000e+00 : f32
    %33 = vector.broadcast %cst_10 : f32 to vector<1x15x15x64xf32>
    %34 = arith.maximumf %32, %33 : vector<1x15x15x64xf32>
    %35 = arith.truncf %34 : vector<1x15x15x64xf32> to vector<1x15x15x64xbf16>
    %c0_11 = arith.constant 0 : index
    %c0_12 = arith.constant 0 : index
    %c0_13 = arith.constant 0 : index
    %c0_14 = arith.constant 0 : index
    %36 = vector.load %arg5[%c0_11, %c0_12, %c0_13, %c0_14] : memref<1x15x15x64xbf16, #tpu.memory_space<vmem>>, vector<1x15x15x64xbf16>
    tpu.vector_store %arg5[%c0_11, %c0_12, %c0_13, %c0_14], %35 {strides = array<i32>} : memref<1x15x15x64xbf16, #tpu.memory_space<vmem>>, vector<1x15x15x64xbf16>,
    return
  }
  func.func @transform_0(%arg0: i32) -> (i32, i32, i32) {
    %c0_i32 = arith.constant 0 : i32
    %c0_i32_0 = arith.constant 0 : i32
    %c0_i32_1 = arith.constant 0 : i32
    return %arg0, %c0_i32, %c0_i32_0 : i32, i32, i32
  }
  func.func @transform_1(%arg0: i32) -> (i32, i32) {
    %c0_i32 = arith.constant 0 : i32
    %c0_i32_0 = arith.constant 0 : i32
    %c0_i32_1 = arith.constant 0 : i32
    return %c0_i32, %c0_i32_0 : i32, i32
  }
  func.func @transform_2(%arg0: i32) -> (i32, i32, i32) {
    %c0_i32 = arith.constant 0 : i32
    %c0_i32_0 = arith.constant 0 : i32
    %c0_i32_1 = arith.constant 0 : i32
    %c0_i32_2 = arith.constant 0 : i32
    return %c0_i32, %c0_i32_0, %c0_i32_1 : i32, i32, i32
  }
  func.func @transform_3(%arg0: i32) -> (i32, i32, i32) {
    %c0_i32 = arith.constant 0 : i32
    %c0_i32_0 = arith.constant 0 : i32
    %c0_i32_1 = arith.constant 0 : i32
    %c0_i32_2 = arith.constant 0 : i32
    return %c0_i32, %c0_i32_0, %c0_i32_1 : i32, i32, i32
  }
  func.func @transform_4(%arg0: i32) -> (i32, i32, i32, i32) {
    %c0_i32 = arith.constant 0 : i32
    %c0_i32_0 = arith.constant 0 : i32
    %c0_i32_1 = arith.constant 0 : i32
    %c0_i32_2 = arith.constant 0 : i32
    return %arg0, %c0_i32, %c0_i32_0, %c0_i32_1 : i32, i32, i32, i32
  }
}

</mosaic_0001>

<bundles_post_ra>
// kernel: tpu_custom_call.1
= control target key start
LH: loop header
LB: loop body
LE: loop exit
PB: predicated region body
PF: predicated region fallthrough
CT: control target
= control target key end

     0   :  { %9 = vsyncpa [#allocation3], 0  ;;  %s9599_s0 = inlined_call_operand.hbm [shape: bf16[2,1024,128], index: 0, kind: input, shape index: {}]   ;;  %s9600_s1 = inlined_call_operand.vmem [shape: bf16[128,64], index: 1, kind: input, shape index: {}]   ;;  %s9601_s2 = inlined_call_operand.vmem [shape: f32[1,1,64], index: 2, kind: input, shape index: {}]   ;;  %s9602_s3 = inlined_call_operand.vmem [shape: f32[1,1,64], index: 3, kind: input, shape index: {}]   ;;  %s9603_s4 = inlined_call_operand.vmem [shape: bf16[2,15,15,64], index: 4, kind: output, shape index: {}]  }
   0x1   :  { %11 = vsyncpa [#allocation3 + $0x1], 0  ;;  %s7562_s15 = smov 0   ;;  %s7564_s16 = smov 0  }
   0x2   :  { %s7566_s17 = smov 0   ;;  %s7568_s18 = smov 0  }
   0x3 LB: > { %s7581_s19 = sadd.s32 4294967295, %s7531_s18   ;;  %s7584_s20 = sadd.s32 1, %s7531_s18   ;;  %s7531_s18 = sphi %s7568_s18, %s9956_s18   ;;  %s7527_s17 = sphi %s7566_s17, %s9955_s17   ;;  %s7523_s16 = sphi %s7564_s16, %s9954_s16   ;;  %s7519_s15 = sphi %s7562_s15, %s9953_s15  }
   0x4   : > { %s21_s21 = ssub.s32 %s7531_s18, %s7584_s20  ;;  %s24_s22 = sadd.s32 1, %s7527_s17 }
   0x5   : > { %p22_p0 = scmp.eq.s32.totalorder %s21_s21, 0  ;;  %p31_p1 = scmp.ne.s32.totalorder %s7527_s17, %s7523_s16 }
   0x6   : > { %p32_p2 = scmp.eq.s32.totalorder %s7531_s18, 0  ;;  %p37_p3 = scmp.ne.s32.totalorder %s7523_s16, %s7519_s15 }
   0x7   : > { %s7594_s23 = scalar_select %p22_p0, %s7527_s17, %s24_s22  }
   0x8   : > { %p33_p4 = por %p32_p2, %p31_p1  ;;  %p38_p5 = scmp.eq.s32.totalorder %s7581_s19, 0 }
   0x9   : > { %p7359_p6 = scmp.lt.s32.totalorder %s7531_s18, 2  ;;  %s159_s25 = sand.u32 1, %s7527_s17  }
   0xa   : > { %p7598_p7 = por %p38_p5, %p37_p3  ;;  %s6362_s26 = sshll.u32 %s159_s25, 9 }
   0xb   : > { %s6894_s27 = sshll.u32 %s7531_s18, 13  ;;  %s163_s5 = scalar_lea.vmem [#allocation2], %s6362_s26 }
   0xc   : > { %s7607_s30 = scalar_lea.hbm %s9599_s0, %s6894_s27  ;;  %s170_s6 = sshll.u32 %s163_s5, 4  ;;  %s7609_s6 = int_to_ptr.vmem [resolvable:$true] %s170_s6 }
   0xd   : > { %p7611_p8 = pnand %p7359_p6, %p33_p4  ;;  %s7616_s8 = scalar_lea.sflag [#allocation3], %s159_s25 }
   0xe   : > { %s7467_s9 = scalar_lea.hbm %s7607_s30, 8192  ;;  %s7472_s12 = scalar_lea.hbm %s9599_s0, 16384 }
   0xf   : > { %p7468_p10 = scmp.ne.s32.totalorder %s7607_s30, %s7467_s9  ;;  %p7469_p11 = pneg %p7611_p8 }
  0x10   : > { %p7473_p0 = scmp.lt.u32.totalorder %s7607_s30, %s9599_s0  ;;  %p7474_p1 = scmp.lt.u32.totalorder %s7472_s12, %s7467_s9 }
  0x11   : > { %p7470_p12 = pnand %p7469_p11, %p7468_p10  ;;  %p7476_p3 = scmp.lt.u32.totalorder %s7467_s9, %s7607_s30 }
  0x12   : > { %p7475_p2 = por %p7474_p1, %p7473_p0 }
  0x13   : > { %p7471_p13 = pneg %p7470_p12 }
  0x14   : > { %p7477_p4 = por %p7476_p3, %p7475_p2 }
  0x16   : > { %p7478_p5 = pnand %p7477_p4, %p7471_p13 }
  0x18   : > { %7481 = shalt.err (!%p7478_p5)
}
  0x19   : > { %s7482_s15 = scalar_lea.vmem %s7609_s6, 8192  ;;  %s7533_s21 = smov [#allocation2]  }
  0x1a   : > { %p7483_p6 = scmp.ne.s32.totalorder %s7609_s6, %s7482_s15  ;;  %s7487_s22 = sshll.u32 %s7533_s21, 4  ;;  %s7488_s22 = int_to_ptr.vmem [resolvable:$false] %s7487_s22 }
  0x1b   : > { %s7489_s25 = scalar_lea.vmem %s7488_s22, 16384  ;;  %p7490_p9 = scmp.lt.s32.totalorder %s7609_s6, %s7488_s22 }
  0x1c   : > { %p7485_p10 = pnand %p7483_p6, %p7469_p11  ;;  %p7491_p0 = scmp.lt.s32.totalorder %s7489_s25, %s7482_s15 }
  0x1e   : > { %p7486_p12 = pneg %p7485_p10  ;;  %p7492_p1 = por %p7491_p0, %p7490_p9 }
  0x20   : > { %p7493_p2 = pnand %p7492_p1, %p7486_p12 }
  0x22   : > { %7496 = shalt.err (!%p7493_p2)
}
  0x23   : > { %s7534_s26 = smov 64   ;;  %s7535_s27 = smov 4  }
  0x24   : > { %7358 = dma.hbm_to_vmem [thread:$0]  (!%p7611_p8), %s7607_s30, 8192, %s7609_s6, %s7616_s8, %s7534_s26, %s7534_s26, %s7535_s27  }
  0x25   : > { %p178_p11 = scmp.lt.s32.totalorder %s7531_s18, 3  ;;  %p9693_p13 = scmp.ge.s32.totalorder %s7531_s18, 1 }
  0x27   : > { %p179_p3 = pnand %p9693_p13, %p178_p11 }
  0x29   : > { %182 = sbr.rel (%p179_p3) target bundleno = 992 (0x3e0), region = 36 }
  0x30   : > { %s184_s28 = sand.u32 1, %s7523_s16  }
  0x31   : > { %s6366_s29 = sshll.u32 %s184_s28, 9  ;;  %s185_s5 = scalar_lea.sflag [#allocation3], %s184_s28 }
  0x32   : > { %s7648_s9 = scalar_lea.vmem [#allocation2], %s6366_s29 }
  0x33   : > { %7514 = dma.done.wait (%p7598_p7), %s185_s5, 8192  }
  0x34   : > { %7516 = vsyncadd (%p7598_p7), %s185_s5, 4294959104  ;;  %v7395_v0 = vld [vmem:[%s9600_s1] sm:$0xff]   ;;  %v7396_v1 = vld [vmem:[%s9600_s1 + $0x8] sm:$0xff]   ;;  %vm5772_vm0 = vcmask 1041409   ;;  %vm5775_vm1 = vcmask 1042434   ;;  %p213_p7 = scmp.lt.s32.totalorder %s7581_s19, 1 }
  0x35   : > { %7192 = vmatprep.subr.bf16.mxu0 %v7395_v0  ;;  %7336 = vmatprep.subr.bf16.mxu1 %v7395_v0  ;;  %v7397_v2 = vld [vmem:[%s9600_s1 + $0x10] sm:$0xff]   ;;  %v7398_v3 = vld [vmem:[%s9600_s1 + $0x18] sm:$0xff]   ;;  %v7403_v4 = vld [vmem:[%s7648_s9] sm:$0xff]   ;;  %vm5778_vm2 = vcmask 1043459   ;;  %vm5781_vm3 = vcmask 1044484   ;;  %vm5784_vm4 = vcmask 1045509  }
  0x36   : > { %7193 = vmatpush3.bf16.msra.mxu0 %v7395_v0  ;;  %7344 = vmatpush3.bf16.msra.mxu1 %v7395_v0  ;;  %v7404_v5 = vld [vmem:[%s7648_s9 + $0x100] sm:$0xff]   ;;  %v7400_v7 = vld [vmem:[%s9600_s1 + $0x28] sm:$0xff]   ;;  %v7401_v8 = vld [vmem:[%s9600_s1 + $0x30] sm:$0xff]   ;;  %s9958_s19 = smov (!%p213_p7, %s7581_s19), 1  ;;  %vm5787_vm5 = vcmask 1046534   ;;  %vm6228_vm6 = vcmask 519168  }
  0x37   : > { %7194 = vmatprep.subr.bf16.mxu0 %v7396_v1  ;;  %7337 = vmatprep.subr.bf16.mxu1 %v7396_v1  ;;  %v7399_v6 = vld [vmem:[%s9600_s1 + $0x20] sm:$0xff]   ;;  %v7402_v9 = vld [vmem:[%s9600_s1 + $0x38] sm:$0xff]   ;;  %v7405_v10 = vld [vmem:[%s7648_s9 + $0x8] sm:$0xff]   ;;  %vm6231_vm7 = vsmask.f32 3328  ;;  %vm5790_vm9 = vcmask 1047559  }
  0x38   : > { %7208 = vmatprep.mubr.bf16.mxu0 %v7403_v4  ;;  %7272 = vmatprep.mubr.bf16.mxu1 %v7404_v5  ;;  %v7406_v11 = vld [vmem:[%s7648_s9 + $0x108] sm:$0xff]   ;;  %v7407_v12 = vld [vmem:[%s7648_s9 + $0x10] sm:$0xff]   ;;  %v7409_v14 = vld [vmem:[%s7648_s9 + $0x18] sm:$0xff]  }
  0x39   : > { %v7408_v13 = vld [vmem:[%s7648_s9 + $0x110] sm:$0xff]   ;;  %v7410_v15 = vld [vmem:[%s7648_s9 + $0x118] sm:$0xff]   ;;  %v7411_v16 = vld [vmem:[%s7648_s9 + $0x20] sm:$0xff]  }
  0x3a   : > { %7195 = vmatpush3.bf16.msra.mxu0 %v7396_v1  ;;  %7345 = vmatpush3.bf16.msra.mxu1 %v7396_v1  ;;  %v7412_v17 = vld [vmem:[%s7648_s9 + $0x120] sm:$0xff]   ;;  %v7413_v18 = vld [vmem:[%s7648_s9 + $0x28] sm:$0xff]   ;;  %v7415_v20 = vld [vmem:[%s7648_s9 + $0x30] sm:$0xff]  }
  0x3b   : > { %7196 = vmatprep.subr.bf16.mxu0 %v7397_v2  ;;  %7338 = vmatprep.subr.bf16.mxu1 %v7397_v2  ;;  %v7414_v19 = vld [vmem:[%s7648_s9 + $0x128] sm:$0xff]   ;;  %v7416_v21 = vld [vmem:[%s7648_s9 + $0x130] sm:$0xff]   ;;  %v7417_v22 = vld [vmem:[%s7648_s9 + $0x38] sm:$0xff]  }
  0x3c   : > { %v7418_v23 = vld [vmem:[%s7648_s9 + $0x138] sm:$0xff]   ;;  %v7419_v24 = vld [vmem:[%s7648_s9 + $0x40] sm:$0xff]   ;;  %v7421_v26 = vld [vmem:[%s7648_s9 + $0x48] sm:$0xff]  }
  0x3d   : > { %v7420_v25 = vld [vmem:[%s7648_s9 + $0x140] sm:$0xff]   ;;  %v7422_v27 = vld [vmem:[%s7648_s9 + $0x148] sm:$0xff]   ;;  %v7423_v28 = vld [vmem:[%s7648_s9 + $0x50] sm:$0xff]  }
  0x3e   : > { %7197 = vmatpush3.bf16.msra.mxu0 %v7397_v2  ;;  %7346 = vmatpush3.bf16.msra.mxu1 %v7397_v2  ;;  %v7424_v29 = vld [vmem:[%s7648_s9 + $0x150] sm:$0xff]   ;;  %v7425_v30 = vld [vmem:[%s7648_s9 + $0x58] sm:$0xff]   ;;  %v7427_v32 = vld [vmem:[%s7648_s9 + $0x60] sm:$0xff]  }
  0x3f   : > { %7198 = vmatprep.subr.bf16.mxu0 %v7398_v3  ;;  %7339 = vmatprep.subr.bf16.mxu1 %v7398_v3  ;;  %v7426_v31 = vld [vmem:[%s7648_s9 + $0x158] sm:$0xff]   ;;  %v7428_v33 = vld [vmem:[%s7648_s9 + $0x160] sm:$0xff]   ;;  %v7429_v34 = vld [vmem:[%s7648_s9 + $0x68] sm:$0xff]  }
  0x40   : > { %v7430_v35 = vld [vmem:[%s7648_s9 + $0x168] sm:$0xff]   ;;  %v7431_v36 = vld [vmem:[%s7648_s9 + $0x70] sm:$0xff]   ;;  %v7433_v38 = vld [vmem:[%s7648_s9 + $0x78] sm:$0xff]  }
  0x41   : > { %v7432_v37 = vld [vmem:[%s7648_s9 + $0x170] sm:$0xff]   ;;  %v7434_v39 = vld [vmem:[%s7648_s9 + $0x178] sm:$0xff]   ;;  %v7435_v40 = vld [vmem:[%s7648_s9 + $0x80] sm:$0xff]  }
  0x42   : > { %7199 = vmatpush3.bf16.msra.mxu0 %v7398_v3  ;;  %7347 = vmatpush3.bf16.msra.mxu1 %v7398_v3  ;;  %v7436_v41 = vld [vmem:[%s7648_s9 + $0x180] sm:$0xff]   ;;  %v7437_v42 = vld [vmem:[%s7648_s9 + $0x88] sm:$0xff]   ;;  %v7439_v44 = vld [vmem:[%s7648_s9 + $0x90] sm:$0xff]  }
  0x43   : > { %7200 = vmatprep.subr.bf16.mxu0 %v7399_v6  ;;  %7340 = vmatprep.subr.bf16.mxu1 %v7399_v6  ;;  %v7438_v43 = vld [vmem:[%s7648_s9 + $0x188] sm:$0xff]   ;;  %v7440_v45 = vld [vmem:[%s7648_s9 + $0x190] sm:$0xff]   ;;  %v7441_v46 = vld [vmem:[%s7648_s9 + $0x98] sm:$0xff]  }
  0x44   : > { %v7442_v47 = vld [vmem:[%s7648_s9 + $0x198] sm:$0xff]   ;;  %v7443_v48 = vld [vmem:[%s7648_s9 + $0xa0] sm:$0xff]   ;;  %v7445_v50 = vld [vmem:[%s7648_s9 + $0xa8] sm:$0xff]  }
  0x45   : > { %v7444_v49 = vld [vmem:[%s7648_s9 + $0x1a0] sm:$0xff]   ;;  %v7446_v51 = vld [vmem:[%s7648_s9 + $0x1a8] sm:$0xff]   ;;  %v7447_v52 = vld [vmem:[%s7648_s9 + $0xb0] sm:$0xff]  }
  0x46   : > { %7201 = vmatpush3.bf16.msra.mxu0 %v7399_v6  ;;  %7348 = vmatpush3.bf16.msra.mxu1 %v7399_v6  ;;  %v7448_v53 = vld [vmem:[%s7648_s9 + $0x1b0] sm:$0xff]   ;;  %v7449_v54 = vld [vmem:[%s7648_s9 + $0xb8] sm:$0xff]   ;;  %v7451_v56 = vld [vmem:[%s7648_s9 + $0xc0] sm:$0xff]  }
  0x47   : > { %7202 = vmatprep.subr.bf16.mxu0 %v7400_v7  ;;  %7341 = vmatprep.subr.bf16.mxu1 %v7400_v7  ;;  %v7450_v55 = vld [vmem:[%s7648_s9 + $0x1b8] sm:$0xff]   ;;  %v7452_v57 = vld [vmem:[%s7648_s9 + $0x1c0] sm:$0xff]   ;;  %v7453_v58 = vld [vmem:[%s7648_s9 + $0xc8] sm:$0xff]  }
  0x48   : > { %v7454_v59 = vld [vmem:[%s7648_s9 + $0x1c8] sm:$0xff]   ;;  %v7455_v60 = vld [vmem:[%s7648_s9 + $0xd0] sm:$0xff]   ;;  %v7457_v62 = vld [vmem:[%s7648_s9 + $0xd8] sm:$0xff]  }
  0x49   : > { %v7456_v61 = vld [vmem:[%s7648_s9 + $0x1d0] sm:$0xff]   ;;  %v7458_v63 = vld [vmem:[%s7648_s9 + $0x1d8] sm:$0xff]   ;;  %v7459_v0 = vld [vmem:[%s7648_s9 + $0xe0] sm:$0xff]  }
  0x4a   : > { %7203 = vmatpush3.bf16.msra.mxu0 %v7400_v7  ;;  %7349 = vmatpush3.bf16.msra.mxu1 %v7400_v7  ;;  %v7460_v1 = vld [vmem:[%s7648_s9 + $0x1e0] sm:$0xff]   ;;  %v7461_v2 = vld [vmem:[%s7648_s9 + $0xe8] sm:$0xff]   ;;  %v7463_v4 = vld [vmem:[%s7648_s9 + $0xf0] sm:$0xff]  }
  0x4b   : > { %7204 = vmatprep.subr.bf16.mxu0 %v7401_v8  ;;  %7342 = vmatprep.subr.bf16.mxu1 %v7401_v8  ;;  %v7462_v3 = vld [vmem:[%s7648_s9 + $0x1e8] sm:$0xff]   ;;  %v7465_v5 = vld [vmem:[%s7648_s9 + $0x1f0] sm:$0xff]   ;;  %v7464_v6 = vld [vmem:[%s7648_s9 + $0xf8] sm:$0xff]  }
  0x4c   : > { %v7466_v7 = vld [vmem:[%s7648_s9 + $0x1f8] sm:$0xff]   ;;  %s7352_s9 = smul.u32 120, %s9958_s19  ;;  %vm8050_vm8 = vmand %vm6228_vm6, %vm6231_vm7 }
  0x4e   : > { %7205 = vmatpush3.bf16.msra.mxu0 %v7401_v8  ;;  %7350 = vmatpush3.bf16.msra.mxu1 %v7401_v8  ;;  %v7536_v8 = vmov 1983009808   ;;  %s8033_s19 = scalar_lea.vmem %s9603_s4, %s7352_s9 }
  0x4f   : > { %7206 = vmatprep.subr.bf16.mxu0 %v7402_v9  ;;  %7343 = vmatprep.subr.bf16.mxu1 %v7402_v9 }
  0x52   : > { %7207 = vmatpush3.bf16.msra.mxu0 %v7402_v9  ;;  %7351 = vmatpush3.bf16.msra.mxu1 %v7402_v9  ;;  %v1520_v9 = vunpack.c.l.s4 %v7536_v8 }
  0x55   : > { %7209 = vmatmul.mubr.bf16.vlgmr.msra.gmra.mrb[0].mxu0 %v7405_v10  ;;  %7273 = vmatmul.mubr.bf16.vlgmr.msra.gmra.mrb[0].mxu1 %v7406_v11  ;;  %v1522_v10 = vlaneseq }
  0x56   : > { %7212 = vmatprep.mubr.bf16.mxu0 %v7407_v12  ;;  %7276 = vmatprep.mubr.bf16.mxu1 %v7408_v13 }
  0x5d   : > { %7213 = vmatmul.mubr.bf16.gmra.mrb[4].mxu0 %v7409_v14  ;;  %7277 = vmatmul.mubr.bf16.gmra.mrb[4].mxu1 %v7410_v15 }
  0x5e   : > { %7216 = vmatprep.mubr.bf16.mxu0 %v7411_v16  ;;  %7280 = vmatprep.mubr.bf16.mxu1 %v7412_v17  ;;  %v1521_v17 = vunpack.c.0.s8 %v1520_v9 }
  0x65   : > { %7217 = vmatmul.mubr.bf16.gmra.mrb[8].mxu0 %v7413_v18  ;;  %7281 = vmatmul.mubr.bf16.gmra.mrb[8].mxu1 %v7414_v19  ;;  %v1523_v18 = vshrl.u32 %v1522_v10, 7 }
  0x66   : > { %7220 = vmatprep.mubr.bf16.mxu0 %v7415_v20  ;;  %7284 = vmatprep.mubr.bf16.mxu1 %v7416_v21  ;;  %v6665_v21 = vld [vmem:[%s9601_s2] ss:$0 sm:$0xff] }
  0x6d   : > { %7221 = vmatmul.mubr.bf16.gmra.mrb[12].mxu0 %v7417_v22  ;;  %7285 = vmatmul.mubr.bf16.gmra.mrb[12].mxu1 %v7418_v23  ;;  %v6666_v22 = vld [vmem:[%s9602_s3] ss:$0 sm:$0xff]  ;;  %v7760_v23 = vsub.s32 %v1521_v17, %v1523_v18 }
  0x6e   : > { %7224 = vmatprep.mubr.bf16.mxu0 %v7419_v24  ;;  %7288 = vmatprep.mubr.bf16.mxu1 %v7420_v25  ;;  %v3908_v24 = vcombine.high %v6665_v21, %v6665_v21  ;;  %v4167_v25 = vcombine.high %v6666_v22, %v6666_v22 }
  0x75   : > { %7225 = vmatmul.mubr.bf16.gmra.mrb[16].mxu0 %v7421_v26  ;;  %7289 = vmatmul.mubr.bf16.gmra.mrb[16].mxu1 %v7422_v27 }
  0x76   : > { %7228 = vmatprep.mubr.bf16.mxu0 %v7423_v28  ;;  %7292 = vmatprep.mubr.bf16.mxu1 %v7424_v29  ;;  %v7763_v28 = vrot.slane %v6665_v21, %v7760_v23 }
  0x7d   : > { %7229 = vmatmul.mubr.bf16.gmra.mrb[20].mxu0 %v7425_v30  ;;  %7293 = vmatmul.mubr.bf16.gmra.mrb[20].mxu1 %v7426_v31 }
  0x7e   : > { %7232 = vmatprep.mubr.bf16.mxu0 %v7427_v32  ;;  %7296 = vmatprep.mubr.bf16.mxu1 %v7428_v33  ;;  %v7767_v33 = vrot.slane %v6666_v22, %v7760_v23 }
  0x80   : > { %9698 = vst [vmem:[#allocation9_spill] sm:$0xff] %v7767_v33 }
  0x85   : > { %7233 = vmatmul.mubr.bf16.gmra.mrb[24].mxu0 %v7429_v34  ;;  %7297 = vmatmul.mubr.bf16.gmra.mrb[24].mxu1 %v7430_v35 }
  0x86   : > { %7236 = vmatprep.mubr.bf16.mxu0 %v7431_v36  ;;  %7300 = vmatprep.mubr.bf16.mxu1 %v7432_v37 }
  0x8d   : > { %7237 = vmatmul.mubr.bf16.gmra.mrb[28].mxu0 %v7433_v38  ;;  %7301 = vmatmul.mubr.bf16.gmra.mrb[28].mxu1 %v7434_v39  ;;  %v7775_v38 = vrot.slane %v3908_v24, %v7760_v23  ;;  %v7778_v39 = vrot.slane %v4167_v25, %v7760_v23 }
  0x8e   : > { %7240 = vmatprep.mubr.bf16.mxu0 %v7435_v40  ;;  %7304 = vmatprep.mubr.bf16.mxu1 %v7436_v41 }
  0x95   : > { %7241 = vmatmul.mubr.bf16.gmra.mrb[32].mxu0 %v7437_v42  ;;  %7305 = vmatmul.mubr.bf16.gmra.mrb[32].mxu1 %v7438_v43 }
  0x96   : > { %7244 = vmatprep.mubr.bf16.mxu0 %v7439_v44  ;;  %7308 = vmatprep.mubr.bf16.mxu1 %v7440_v45 }
  0x9d   : > { %7245 = vmatmul.mubr.bf16.gmra.mrb[36].mxu0 %v7441_v46  ;;  %7309 = vmatmul.mubr.bf16.gmra.mrb[36].mxu1 %v7442_v47  ;;  %v7794_v46 = vcombine.high %v7763_v28, %v7763_v28  ;;  %v7798_v47 = vcombine.high %v7767_v33, %v7767_v33 }
  0x9e   : > { %7248 = vmatprep.mubr.bf16.mxu0 %v7443_v48  ;;  %7312 = vmatprep.mubr.bf16.mxu1 %v7444_v49  ;;  %v7802_v48 = vcombine.high %v7775_v38, %v7775_v38  ;;  %v7806_v49 = vcombine.high %v7778_v39, %v7778_v39 }
  0x9f   : > { %9699 = vst [vmem:[#allocation10_spill] sm:$0xff] %v7794_v46 }
  0xa5   : > { %7249 = vmatmul.mubr.bf16.gmra.mrb[40].mxu0 %v7445_v50  ;;  %7313 = vmatmul.mubr.bf16.gmra.mrb[40].mxu1 %v7446_v51  ;;  %v7811_v51 = vrot.slane %v7763_v28, 1 }
  0xa6   : > { %7252 = vmatprep.mubr.bf16.mxu0 %v7447_v52  ;;  %7316 = vmatprep.mubr.bf16.mxu1 %v7448_v53  ;;  %v7814_v52 = vrot.slane %v7767_v33, 1 }
  0xad   : > { %7253 = vmatmul.mubr.bf16.gmra.mrb[44].mxu0 %v7449_v54  ;;  %7317 = vmatmul.mubr.bf16.gmra.mrb[44].mxu1 %v7450_v55  ;;  %v7819_v54 = vrot.slane %v7794_v46, 1  ;;  %v7822_v55 = vrot.slane %v7775_v38, 1 }
  0xae   : > { %7256 = vmatprep.mubr.bf16.mxu0 %v7451_v56  ;;  %7320 = vmatprep.mubr.bf16.mxu1 %v7452_v57 }
  0xb5   : > { %7257 = vmatmul.mubr.bf16.gmra.mrb[48].mxu0 %v7453_v58  ;;  %7321 = vmatmul.mubr.bf16.gmra.mrb[48].mxu1 %v7454_v59 }
  0xb6   : > { %7260 = vmatprep.mubr.bf16.mxu0 %v7455_v60  ;;  %7324 = vmatprep.mubr.bf16.mxu1 %v7456_v61  ;;  %v7831_v60 = vrot.slane %v7798_v47, 1  ;;  %v7834_v61 = vrot.slane %v7778_v39, 1 }
  0xbd   : > { %7261 = vmatmul.mubr.bf16.gmra.mrb[52].mxu0 %v7457_v62  ;;  %7325 = vmatmul.mubr.bf16.gmra.mrb[52].mxu1 %v7458_v63 }
  0xbe   : > { %7264 = vmatprep.mubr.bf16.mxu0 %v7459_v0  ;;  %7328 = vmatprep.mubr.bf16.mxu1 %v7460_v1 }
  0xc5   : > { %7265 = vmatmul.mubr.bf16.gmra.mrb[56].mxu0 %v7461_v2  ;;  %7329 = vmatmul.mubr.bf16.gmra.mrb[56].mxu1 %v7462_v3  ;;  %v7845_v2 = vrot.slane %v7802_v48, 1  ;;  %v7848_v3 = vrot.slane %v7806_v49, 1 }
  0xc6   : > { %7268 = vmatprep.mubr.bf16.mxu0 %v7463_v4  ;;  %7332 = vmatprep.mubr.bf16.mxu1 %v7465_v5 }
  0xcd   : > { %7269 = vmatmul.mubr.bf16.gmra.mrb[60].mxu0 %v7464_v6  ;;  %7333 = vmatmul.mubr.bf16.gmra.mrb[60].mxu1 %v7466_v7 }
 0x128   : > { %v7210_v11 = vpop.f32.mrb[0].mxu0  ;;  %v7742_v12 = vpop.f32.mrb[0].mxu1 }
 0x129   : > { %9694 = vst [vmem:[#allocation5_spill] sm:$0xff] %v7742_v12  ;;  %v829_v13 = vpop.f32.mrb[1].mxu0  ;;  %v7744_v14 = vpop.f32.mrb[1].mxu1 }
 0x12a   : > { %9695 = vst [vmem:[#allocation6_spill] sm:$0xff] %v7744_v14  ;;  %v7746_v15 = vpop.f32.mrb[2].mxu0  ;;  %v7748_v16 = vpop.f32.mrb[2].mxu1 }
 0x12b   : > { %9696 = vst [vmem:[#allocation7_spill] sm:$0xff] %v7748_v16  ;;  %v7750_v19 = vpop.f32.mrb[3].mxu0  ;;  %v7752_v20 = vpop.f32.mrb[3].mxu1 }
 0x12c   : > { %9697 = vst [vmem:[#allocation8_spill] sm:$0xff] %v7752_v20 }
 0x130   : > { %v7214_v26 = vpop.f32.mrb[4].mxu0  ;;  %v7278_v27 = vpop.f32.mrb[4].mxu1 }
 0x131   : > { %v1340_v29 = vmax.f32 %v7210_v11, %v7214_v26  ;;  %v1372_v30 = vmax.f32 %v7742_v12, %v7278_v27  ;;  %v845_v31 = vpop.f32.mrb[5].mxu0  ;;  %v1101_v32 = vpop.f32.mrb[5].mxu1 }
 0x132   : > { %v1338_v34 = vmax.f32 %v829_v13, %v845_v31  ;;  %v1370_v35 = vmax.f32 %v7744_v14, %v1101_v32  ;;  %v7770_v36 = vpop.f32.mrb[6].mxu0  ;;  %v7772_v37 = vpop.f32.mrb[6].mxu1 }
 0x133   : > { %v7784_v42 = vpop.f32.mrb[7].mxu0  ;;  %v7786_v43 = vpop.f32.mrb[7].mxu1 }
 0x138   : > { %v7808_v50 = vpop.f32.mrb[8].mxu0  ;;  %v7816_v53 = vpop.f32.mrb[8].mxu1 }
 0x139   : > { %9700 = vst [vmem:[#allocation11_spill] sm:$0xff] %v7816_v53  ;;  %v1400_v56 = vmax.f32 %v1340_v29, %v7808_v50  ;;  %v1432_v57 = vmax.f32 %v1372_v30, %v7816_v53  ;;  %v7826_v58 = vpop.f32.mrb[9].mxu0  ;;  %v7828_v59 = vpop.f32.mrb[9].mxu1 }
 0x13a   : > { %9701 = vst [vmem:[#allocation12_spill] sm:$0xff] %v7826_v58  ;;  %9702 = vst [vmem:[#allocation13_spill] sm:$0xff] %v7828_v59  ;;  %v1398_v62 = vmax.f32 %v1338_v34, %v7826_v58  ;;  %v7838_v63 = vmax.f32 %v1370_v35, %v7828_v59  ;;  %v7840_v0 = vpop.f32.mrb[10].mxu0  ;;  %v7842_v1 = vpop.f32.mrb[10].mxu1 }
 0x13b   : > { %v1552_v4 = vcombine.high %v1400_v56, %v1400_v56  ;;  %v7851_v5 = vrot.slane %v1400_v56, %v7760_v23  ;;  %v2096_v6 = vcombine.high %v1432_v57, %v1432_v57  ;;  %v7854_v7 = vrot.slane %v1432_v57, %v7760_v23  ;;  %v7856_v8 = vpop.f32.mrb[11].mxu0  ;;  %v7858_v9 = vpop.f32.mrb[11].mxu1 }
 0x13c   : > { %v1518_v10 = vcombine.high %v1398_v62, %v1398_v62  ;;  %v1525_v11 = vrot.slane %v1398_v62, %v7760_v23  ;;  %v7865_v17 = vrot.slane %v7838_v63, %v7760_v23 }
 0x13d   : > { %9703 = vst [vmem:[#allocation14_spill] sm:$0xff] %v7854_v7  ;;  %v1566_v18 = vrot.slane %v1552_v4, %v7760_v23  ;;  %v1567_v21 = vcombine.high %v7851_v5, %v7851_v5  ;;  %v6448_v22 = vrot.slane %v7851_v5, 9  ;;  %v2110_v24 = vrot.slane %v2096_v6, %v7760_v23 }
 0x13e   : > { %v2111_v25 = vcombine.high %v7854_v7, %v7854_v7  ;;  %v6568_v26 = vrot.slane %v7854_v7, 9  ;;  %v7876_v27 = vrot.slane %v1518_v10, %v7760_v23  ;;  %v7878_v29 = vcombine.high %v1525_v11, %v1525_v11 }
 0x13f   : > { %v7880_v30 = vcombine.high %v1566_v18, %v1566_v18  ;;  %v6449_v31 = vrot.slane %v1567_v21, 9  ;;  %v6450_v32 = vrot.slane %v1566_v18, 9  ;;  %v3461_v34 = vmax.f32 %v7851_v5, %v6448_v22 }
 0x140   : > { %v7883_v35 = vcombine.high %v2110_v24, %v2110_v24  ;;  %v6569_v56 = vrot.slane %v2111_v25, 9  ;;  %v6570_v57 = vrot.slane %v2110_v24, 9  ;;  %v3581_v62 = vmax.f32 %v7854_v7, %v6568_v26  ;;  %v7886_v4 = vpop.f32.mrb[12].mxu0  ;;  %v7888_v6 = vpop.f32.mrb[12].mxu1 }
 0x141   : > { %9704 = vst [vmem:[#allocation15_spill] sm:$0xff] %v7888_v6  ;;  %v3462_v10 = vmax.f32 %v1567_v21, %v6449_v31  ;;  %v3463_v45 = vmax.f32 %v1566_v18, %v6450_v32  ;;  %v3686_v44 = vmax.f32 %v3461_v34, %v1567_v21  ;;  %v7892_v41 = vcombine.high %v7876_v27, %v7876_v27  ;;  %v7894_v40 = vpop.f32.mrb[13].mxu0  ;;  %v7896_v22 = vpop.f32.mrb[13].mxu1 }
 0x142   : > { %9705 = vst [vmem:[#allocation16_spill] sm:$0xff] %v7894_v40  ;;  %9706 = vst [vmem:[#allocation17_spill] sm:$0xff] %v7896_v22  ;;  %v3582_v13 = vmax.f32 %v2111_v25, %v6569_v56  ;;  %v3583_v14 = vmax.f32 %v2110_v24, %v6570_v57  ;;  %v3806_v12 = vmax.f32 %v3581_v62, %v2111_v25  ;;  %v6440_v59 = vrot.slane %v1525_v11, 9  ;;  %v7898_v26 = vpop.f32.mrb[14].mxu0  ;;  %v7900_v58 = vpop.f32.mrb[14].mxu1 }
 0x143   : > { %9707 = vst [vmem:[#allocation18_spill] sm:$0xff] %v7898_v26  ;;  %9708 = vst [vmem:[#allocation19_spill] sm:$0xff] %v7900_v58  ;;  %v3687_v53 = vmax.f32 %v3462_v10, %v1566_v18  ;;  %v3688_v31 = vmax.f32 %v3463_v45, %v7880_v30  ;;  %v3945_v21 = vmul.f32 %v7763_v28, %v3686_v44  ;;  %v6441_v32 = vrot.slane %v7878_v29, 9  ;;  %v7905_v34 = vpop.f32.mrb[15].mxu0  ;;  %v7907_v40 = vpop.f32.mrb[15].mxu1 }
 0x144   : > { %9709 = vst [vmem:[#allocation20_spill] sm:$0xff] %v7905_v34  ;;  %9710 = vst [vmem:[#allocation21_spill] sm:$0xff] %v7907_v40  ;;  %v3807_v22 = vmax.f32 %v3582_v13, %v2110_v24  ;;  %v3808_v56 = vmax.f32 %v3583_v14, %v7883_v35  ;;  %v4065_v25 = vmul.f32 %v7763_v28, %v3806_v12  ;;  %v6442_v57 = vrot.slane %v7876_v27, 9 }
 0x145   : > { %v3946_v62 = vmul.f32 %v7811_v51, %v3687_v53  ;;  %v3947_v18 = vmul.f32 %v7794_v46, %v3688_v31  ;;  %v4204_v45 = vadd.f32 %v7767_v33, %v3945_v21  ;;  %v3453_v44 = vmax.f32 %v1525_v11, %v6440_v59 }
 0x146   : > { %v4066_v10 = vmul.f32 %v7811_v51, %v3807_v22  ;;  %v4067_v34 = vmul.f32 %v7794_v46, %v3808_v56  ;;  %v4324_v13 = vadd.f32 %v7767_v33, %v4065_v25  ;;  %v3454_v14 = vmax.f32 %v7878_v29, %v6441_v32 }
 0x147   : > { %v4205_v12 = vadd.f32 %v7814_v52, %v3946_v62  ;;  %v4206_v24 = vadd.f32 %v7798_v47, %v3947_v18  ;;  %v4429_v40 = vmax.f32 %v4204_v45, 0.0  ;;  %v3455_v53 = vmax.f32 %v7876_v27, %v6442_v57 }
 0x148   : > { %v4325_v31 = vadd.f32 %v7814_v52, %v4066_v10  ;;  %v4326_v59 = vadd.f32 %v7798_v47, %v4067_v34  ;;  %v4549_v11 = vmax.f32 %v4324_v13, 0.0  ;;  %v3678_v22 = vmax.f32 %v3453_v44, %v7878_v29  ;;  %v7925_v21 = vpop.f32.mrb[16].mxu0  ;;  %v7927_v56 = vpop.f32.mrb[16].mxu1 }
 0x149   : > { %9711 = vst [vmem:[#allocation22_spill] sm:$0xff] %v7925_v21  ;;  %9712 = vst [vmem:[#allocation23_spill] sm:$0xff] %v7927_v56  ;;  %v4430_v25 = vmax.f32 %v4205_v12, 0.0  ;;  %v4431_v32 = vmax.f32 %v4206_v24, 0.0  ;;  %v6903_v58 = vpack.c.bf16 %v4429_v40, %v4429_v40  ;;  %v3679_v62 = vmax.f32 %v3454_v14, %v7876_v27  ;;  %v7930_v18 = vpop.f32.mrb[17].mxu0  ;;  %v7932_v45 = vpop.f32.mrb[17].mxu1 }
 0x14a   : > { %9713 = vst [vmem:[#allocation24_spill] sm:$0xff] %v7930_v18  ;;  %9714 = vst [vmem:[#allocation25_spill] sm:$0xff] %v7932_v45  ;;  %v4550_v57 = vmax.f32 %v4325_v31, 0.0  ;;  %v4551_v10 = vmax.f32 %v4326_v59, 0.0  ;;  %v7023_v26 = vpack.c.bf16 %v4549_v11, %v4549_v11  ;;  %v3680_v34 = vmax.f32 %v3455_v53, %v7892_v41  ;;  %v7935_v13 = vpop.f32.mrb[18].mxu0  ;;  %v7937_v29 = vpop.f32.mrb[18].mxu1 }
 0x14b   : > { %9715 = vst [vmem:[#allocation26_spill] sm:$0xff] %v7935_v13  ;;  %9716 = vst [vmem:[#allocation27_spill] sm:$0xff] %v7937_v29  ;;  %v6904_v44 = vpack.c.bf16 %v4430_v25, %v4430_v25  ;;  %v6905_v56 = vpack.c.bf16 %v4431_v32, %v4431_v32  ;;  %v5554_v12 = vunpack.c.l.b16 %v6903_v58  ;;  %v3937_v40 = vmul.f32 %v7763_v28, %v3678_v22  ;;  %v7940_v24 = vpop.f32.mrb[19].mxu0  ;;  %v7942_v27 = vpop.f32.mrb[19].mxu1 }
 0x14c   : > { %9717 = vst [vmem:[#allocation28_spill] sm:$0xff] %v7940_v24  ;;  %9718 = vst [vmem:[#allocation29_spill] sm:$0xff] %v7942_v27  ;;  %v7024_v14 = vpack.c.bf16 %v4550_v57, %v4550_v57  ;;  %v7025_v45 = vpack.c.bf16 %v4551_v10, %v4551_v10  ;;  %v5674_v31 = vunpack.c.l.b16 %v7023_v26  ;;  %v3938_v59 = vmul.f32 %v7811_v51, %v3679_v62 }
 0x14d   : > { %v5555_v11 = vunpack.c.l.b16 %v6904_v44  ;;  %v5556_v53 = vunpack.c.l.b16 %v6905_v56  ;;  %v3939_v13 = vmul.f32 %v7794_v46, %v3680_v34  ;;  %v4196_v29 = vadd.f32 %v7767_v33, %v3937_v40 }
 0x14e   : > { %v5675_v25 = vunpack.c.l.b16 %v7024_v14  ;;  %v5676_v32 = vunpack.c.l.b16 %v7025_v45  ;;  %v4197_v58 = vadd.f32 %v7814_v52, %v3938_v59  ;;  %v9719_v22 = vcombine.high %v7838_v63, %v7838_v63 }
 0x14f   : > { %v5792_v10 = vrot.slane %v5555_v11, 7  ;;  %v5794_v26 = vrot.slane %v5556_v53, 6  ;;  %v4198_v62 = vadd.f32 %v7798_v47, %v3939_v13  ;;  %v4421_v44 = vmax.f32 %v4196_v29, 0.0 }
 0x150   : > { %v2076_v57 = vrot.slane %v9719_v22, %v7760_v23  ;;  %v6000_v56 = vrot.slane %v5675_v25, 7  ;;  %v7953_v27 = vrot.slane %v5676_v32, 6  ;;  %v4422_v34 = vmax.f32 %v4197_v58, 0.0 }
 0x151   : > { %v2077_v45 = vcombine.high %v7865_v17, %v7865_v17  ;;  %v5793_v40 = vsel %vm5772_vm0, %v5792_v10, %v5554_v12  ;;  %v4423_v14 = vmax.f32 %v4198_v62, 0.0  ;;  %v6895_v59 = vpack.c.bf16 %v4421_v44, %v4421_v44 }
 0x152   : > { %v7958_v24 = vcombine.high %v2076_v57, %v2076_v57  ;;  %v7961_v63 = vsel %vm5772_vm0, %v6000_v56, %v5674_v31  ;;  %v6896_v11 = vpack.c.bf16 %v4422_v34, %v4422_v34  ;;  %v6560_v13 = vrot.slane %v7865_v17, 9 }
 0x153   : > { %v6561_v29 = vrot.slane %v2077_v45, 9  ;;  %v6897_v53 = vpack.c.bf16 %v4423_v14, %v4423_v14  ;;  %v5546_v25 = vunpack.c.l.b16 %v6895_v59  ;;  %v6562_v32 = vrot.slane %v2076_v57, 9 }
 0x154   : > { %v9720_v58 = vmax.f32 %v7746_v15, %v7770_v36  ;;  %v5547_v12 = vunpack.c.l.b16 %v6896_v11  ;;  %v3573_v10 = vmax.f32 %v7865_v17, %v6560_v13  ;;  %v6451_v44 = vrot.slane %v7880_v30, 9 }
 0x155   : > { %v3574_v62 = vmax.f32 %v2077_v45, %v6561_v29  ;;  %v5548_v31 = vunpack.c.l.b16 %v6897_v53  ;;  %v3575_v56 = vmax.f32 %v2076_v57, %v6562_v32 }
 0x156   : > { %v1401_v22 = vmax.f32 %v9720_v58, %v7840_v0  ;;  %v5771_v21 = vrot.slane %v5547_v12, 7  ;;  %v3798_v14 = vmax.f32 %v3573_v10, %v2077_v45  ;;  %v3464_v6 = vmax.f32 %v7880_v30, %v6451_v44 }
 0x157   : > { %v3799_v59 = vmax.f32 %v3574_v62, %v2076_v57  ;;  %v5774_v7 = vrot.slane %v5548_v31, 6  ;;  %v3800_v15 = vmax.f32 %v3575_v56, %v7958_v24 }
 0x158   : > { %v1569_v34 = vcombine.high %v1401_v22, %v1401_v22  ;;  %v1576_v18 = vrot.slane %v1401_v22, %v7760_v23  ;;  %v5773_v17 = vsel %vm5772_vm0, %v5771_v21, %v5546_v25  ;;  %v4057_v13 = vmul.f32 %v7763_v28, %v3798_v14  ;;  %v7983_v21 = vpop.f32.mrb[20].mxu0 }
 0x159   : > { %v4058_v29 = vmul.f32 %v7811_v51, %v3799_v59  ;;  %v7978_v32 = vsel %vm5775_vm1, %v5774_v7, %v5773_v17  ;;  %v4059_v57 = vmul.f32 %v7794_v46, %v3800_v15  ;;  %v7987_v7 = vsel %vm5775_vm1, %v5794_v26, %v5793_v40 }
 0x15a   : > { %v1583_v36 = vrot.slane %v1569_v34, %v7760_v23  ;;  %v1584_v11 = vcombine.high %v1576_v18, %v1576_v18  ;;  %v6452_v53 = vrot.slane %v1576_v18, 9  ;;  %v4316_v58 = vadd.f32 %v7767_v33, %v4057_v13 }
 0x15b   : > { %v4317_v22 = vadd.f32 %v7814_v52, %v4058_v29  ;;  %v4318_v25 = vadd.f32 %v7798_v47, %v4059_v57  ;;  %v3689_v44 = vmax.f32 %v3464_v6, %v1576_v18  ;;  %v9721_v13 = vmax.f32 %v7748_v16, %v7772_v37 }
 0x15c   : > { %v1585_v45 = vcombine.high %v1583_v36, %v1583_v36  ;;  %v6453_v30 = vrot.slane %v1584_v11, 9  ;;  %v6454_v12 = vrot.slane %v1583_v36, 9  ;;  %v3465_v10 = vmax.f32 %v1576_v18, %v6452_v53  ;;  %v7995_v53 = vpop.f32.mrb[20].mxu1 }
 0x15d   : > { %v4541_v31 = vmax.f32 %v4316_v58, 0.0  ;;  %v4542_v56 = vmax.f32 %v4317_v22, 0.0  ;;  %v4543_v59 = vmax.f32 %v4318_v25, 0.0  ;;  %v3948_v17 = vmul.f32 %v7819_v54, %v3689_v44  ;;  %9722 = vst [vmem:[#allocation30_spill] sm:$0xff] %v7995_v53 }
 0x15e   : > { %v3466_v62 = vmax.f32 %v1584_v11, %v6453_v30  ;;  %v3467_v34 = vmax.f32 %v1583_v36, %v6454_v12  ;;  %v3690_v14 = vmax.f32 %v3465_v10, %v1584_v11  ;;  %v1433_v29 = vmax.f32 %v9721_v13, %v7842_v1  ;;  %v7998_v11 = vpop.f32.mrb[21].mxu0 }
 0x15f   : > { %v7015_v6 = vpack.c.bf16 %v4541_v31, %v4541_v31  ;;  %v7016_v18 = vpack.c.bf16 %v4542_v56, %v4542_v56  ;;  %9723 = vst [vmem:[#allocation31_spill] sm:$0xff] %v7998_v11  ;;  %v4207_v30 = vadd.f32 %v7831_v60, %v3948_v17  ;;  %v8011_v31 = vpop.f32.mrb[21].mxu1 }
 0x160   : > { %v3691_v15 = vmax.f32 %v3466_v62, %v1583_v36  ;;  %v3692_v26 = vmax.f32 %v3467_v34, %v1585_v45  ;;  %v3949_v40 = vmul.f32 %v7775_v38, %v3690_v14  ;;  %v7017_v36 = vpack.c.bf16 %v4543_v59, %v4543_v59  ;;  %9724 = vst [vmem:[#allocation32_spill] sm:$0xff] %v8011_v31  ;;  %v8017_v17 = vpop.f32.mrb[22].mxu1 }
 0x161   : > { %v2113_v37 = vcombine.high %v1433_v29, %v1433_v29  ;;  %v5666_v58 = vunpack.c.l.b16 %v7015_v6  ;;  %v5667_v22 = vunpack.c.l.b16 %v7016_v18  ;;  %v4432_v62 = vmax.f32 %v4207_v30, 0.0  ;;  %9726 = vst [vmem:[#allocation34_spill] sm:$0xff] %v8017_v17 }
 0x162   : > { %v3950_v57 = vmul.f32 %v7822_v55, %v3691_v15  ;;  %v3951_v12 = vmul.f32 %v7802_v48, %v3692_v26  ;;  %v4208_v10 = vadd.f32 %v7778_v39, %v3949_v40  ;;  %v5668_v45 = vunpack.c.l.b16 %v7017_v36  ;;  %v8015_v15 = vpop.f32.mrb[22].mxu0 }
 0x163   : > { %v2120_v44 = vrot.slane %v1433_v29, %v7760_v23  ;;  %v5986_v56 = vrot.slane %v5667_v22, 7  ;;  %v2127_v59 = vrot.slane %v2113_v37, %v7760_v23  ;;  %9725 = vst [vmem:[#allocation33_spill] sm:$0xff] %v8015_v15  ;;  %v6906_v18 = vpack.c.bf16 %v4432_v62, %v4432_v62  ;;  %v8020_v30 = vpop.f32.mrb[23].mxu0  ;;  %v8022_v22 = vpop.f32.mrb[23].mxu1 }
 0x164   : > { %v4209_v25 = vadd.f32 %v7834_v61, %v3950_v57  ;;  %v4210_v34 = vadd.f32 %v7806_v49, %v3951_v12  ;;  %v4433_v14 = vmax.f32 %v4208_v10, 0.0  ;;  %v5988_v13 = vrot.slane %v5668_v45, 6  ;;  %9727 = vst [vmem:[#allocation35_spill] sm:$0xff] %v8020_v30  ;;  %9728 = vst [vmem:[#allocation36_spill] sm:$0xff] %v8022_v22 }
 0x165   : > { %v2128_v26 = vcombine.high %v2120_v44, %v2120_v44  ;;  %v5987_v40 = vsel %vm5772_vm0, %v5986_v56, %v5666_v58  ;;  %v2129_v57 = vcombine.high %v2127_v59, %v2127_v59  ;;  %v5557_v10 = vunpack.c.l.b16 %v6906_v18 }
 0x166   : > { %v4434_v6 = vmax.f32 %v4209_v25, 0.0  ;;  %v4435_v29 = vmax.f32 %v4210_v34, 0.0  ;;  %v6907_v36 = vpack.c.bf16 %v4433_v14, %v4433_v14  ;;  %v8025_v12 = vsel %vm5775_vm1, %v5988_v13, %v5987_v40 }
 0x167   : > { %v6571_v45 = vrot.slane %v7883_v35, 9  ;;  %v6572_v16 = vrot.slane %v2120_v44, 9  ;;  %v6573_v17 = vrot.slane %v2128_v26, 9  ;;  %v5796_v56 = vrot.slane %v5557_v10, 5 }
 0x168   : > { %v6908_v37 = vpack.c.bf16 %v4434_v6, %v4434_v6  ;;  %v6909_v25 = vpack.c.bf16 %v4435_v29, %v4435_v29  ;;  %v5558_v62 = vunpack.c.l.b16 %v6907_v36  ;;  %v6574_v34 = vrot.slane %v2127_v59, 9  ;;  %v8037_v29 = vpop.f32.mrb[24].mxu0  ;;  %v8039_v36 = vpop.f32.mrb[24].mxu1 }
 0x169   : > { %v3584_v14 = vmax.f32 %v7883_v35, %v6571_v45  ;;  %v3585_v22 = vmax.f32 %v2120_v44, %v6572_v16  ;;  %v3586_v31 = vmax.f32 %v2128_v26, %v6573_v17  ;;  %v5797_v13 = vsel %vm5778_vm2, %v5796_v56, %v7987_v7  ;;  %9729 = vst [vmem:[#allocation37_spill] sm:$0xff] %v8037_v29 }
 0x16a   : > { %v5559_v58 = vunpack.c.l.b16 %v6908_v37  ;;  %v5560_v30 = vunpack.c.l.b16 %v6909_v25  ;;  %v5798_v15 = vrot.slane %v5558_v62, 4  ;;  %v3587_v18 = vmax.f32 %v2127_v59, %v6574_v34  ;;  %9730 = vst [vmem:[#allocation38_spill] sm:$0xff] %v8039_v36 }
 0x16b   : > { %v3809_v40 = vmax.f32 %v3584_v14, %v2120_v44  ;;  %v3810_v17 = vmax.f32 %v3585_v22, %v2128_v26  ;;  %v3811_v37 = vmax.f32 %v3586_v31, %v2127_v59  ;;  %v6003_v7 = vsel %vm5775_vm1, %v7953_v27, %v7961_v63  ;;  %v8061_v27 = vpop.f32.mrb[25].mxu0 }
 0x16c   : > { %v5800_v6 = vrot.slane %v5559_v58, 3  ;;  %v5799_v35 = vsel %vm5781_vm3, %v5798_v15, %v5797_v13  ;;  %v5802_v16 = vrot.slane %v5560_v30, 2  ;;  %v3812_v45 = vmax.f32 %v3587_v18, %v2129_v57  ;;  %v6233_v15 = vld [vmem:[%s8033_s19 + $0x4] sm:$0xf]  ;;  %9734 = vst [vmem:[#allocation39_spill] sm:$0xff] %v8061_v27 }
 0x16d   : > { %v4068_v25 = vmul.f32 %v7819_v54, %v3809_v40  ;;  %v4069_v31 = vmul.f32 %v7775_v38, %v3810_v17  ;;  %v4070_v59 = vmul.f32 %v7822_v55, %v3811_v37  ;;  %v9733_v26 = vmax.f32 %v7750_v19, %v7784_v42 }
 0x16e   : > { %v5801_v10 = vsel %vm5784_vm4, %v5800_v6, %v5799_v35  ;;  %v4071_v30 = vmul.f32 %v7802_v48, %v3812_v45  ;;  %v6443_v58 = vrot.slane %v7892_v41, 9 }
 0x16f   : > { %v5803_v44 = vsel %vm5787_vm5, %v5802_v16, %v5801_v10  ;;  %v1399_v57 = vmax.f32 %v9733_v26, %v7856_v8  ;;  %v4327_v22 = vadd.f32 %v7831_v60, %v4068_v25  ;;  %v4328_v56 = vadd.f32 %v7778_v39, %v4069_v31 }
 0x170   : > { %v6169_v63 = vpack.c.b16 %v5803_v44, %v5803_v44  ;;  %v4329_v34 = vadd.f32 %v7834_v61, %v4070_v59  ;;  %v4330_v42 = vadd.f32 %v7806_v49, %v4071_v30  ;;  %v3456_v18 = vmax.f32 %v7892_v41, %v6443_v58 }
 0x171   : > { %v1535_v14 = vcombine.high %v1399_v57, %v1399_v57  ;;  %v1542_v13 = vrot.slane %v1399_v57, %v7760_v23  ;;  %v4552_v6 = vmax.f32 %v4327_v22, 0.0  ;;  %v4553_v40 = vmax.f32 %v4328_v56, 0.0 }
 0x172   : > { %v6234_v19 = vsel %vm8050_vm8, %v6169_v63, %v6233_v15  ;;  %v4554_v35 = vmax.f32 %v4329_v34, 0.0  ;;  %v4555_v37 = vmax.f32 %v4330_v42, 0.0  ;;  %v8075_v15 = vpop.f32.mrb[25].mxu1 }
 0x173   : > { %6235 = vst [vmem:[%s8033_s19 + $0x4] sm:$0xf] %v6234_v19  ;;  %v1549_v16 = vrot.slane %v1535_v14, %v7760_v23  ;;  %v1550_v17 = vcombine.high %v1542_v13, %v1542_v13  ;;  %v7026_v10 = vpack.c.bf16 %v4552_v6, %v4552_v6  ;;  %v6444_v45 = vrot.slane %v1542_v13, 9  ;;  %9735 = vst [vmem:[#allocation40_spill] sm:$0xff] %v8075_v15 }
 0x174   : > { %v3681_v25 = vmax.f32 %v3456_v18, %v1542_v13  ;;  %v7027_v44 = vpack.c.bf16 %v4553_v40, %v4553_v40  ;;  %v7028_v31 = vpack.c.bf16 %v4554_v35, %v4554_v35  ;;  %v7029_v57 = vpack.c.bf16 %v4555_v37, %v4555_v37 }
 0x175   : > { %v1551_v59 = vcombine.high %v1549_v16, %v1549_v16  ;;  %v6445_v26 = vrot.slane %v1550_v17, 9  ;;  %v5677_v63 = vunpack.c.l.b16 %v7026_v10  ;;  %v6446_v30 = vrot.slane %v1549_v16, 9 }
 0x176   : > { %v3457_v41 = vmax.f32 %v1542_v13, %v6444_v45  ;;  %v5678_v22 = vunpack.c.l.b16 %v7027_v44  ;;  %v5679_v58 = vunpack.c.l.b16 %v7028_v31  ;;  %v5680_v14 = vunpack.c.l.b16 %v7029_v57 }
 0x177   : > { %v6447_v56 = vrot.slane %v1551_v59, 9  ;;  %v3458_v34 = vmax.f32 %v1550_v17, %v6445_v26  ;;  %v6004_v19 = vrot.slane %v5677_v63, 5  ;;  %v3459_v42 = vmax.f32 %v1549_v16, %v6446_v30 }
 0x178   : > { %v3682_v6 = vmax.f32 %v3457_v41, %v1550_v17  ;;  %v6006_v27 = vrot.slane %v5678_v22, 4  ;;  %v6008_v18 = vrot.slane %v5679_v58, 3  ;;  %v6010_v15 = vrot.slane %v5680_v14, 2 }
 0x179   : > { %v3460_v40 = vmax.f32 %v1551_v59, %v6447_v56  ;;  %v3683_v35 = vmax.f32 %v3458_v34, %v1549_v16  ;;  %v6005_v36 = vsel %vm5778_vm2, %v6004_v19, %v6003_v7  ;;  %v3684_v37 = vmax.f32 %v3459_v42, %v1551_v59 }
 0x17a   : > { %v3940_v10 = vmul.f32 %v7819_v54, %v3681_v25  ;;  %v6007_v13 = vsel %vm5781_vm3, %v6006_v27, %v6005_v36  ;;  %v3941_v44 = vmul.f32 %v7775_v38, %v3682_v6  ;;  %v9736_v7 = vmax.f32 %v7752_v20, %v7786_v43  ;;  %v6265_v36 = vld [vmem:[%s8033_s19 + $0x44] sm:$0xf] }
 0x17b   : > { %v3685_v45 = vmax.f32 %v3460_v40, %v7851_v5  ;;  %v3942_v31 = vmul.f32 %v7822_v55, %v3683_v35  ;;  %v6009_v17 = vsel %vm5784_vm4, %v6008_v18, %v6007_v13  ;;  %v3943_v26 = vmul.f32 %v7802_v48, %v3684_v37 }
 0x17c   : > { %v4199_v16 = vadd.f32 %v7831_v60, %v3940_v10  ;;  %v1431_v59 = vmax.f32 %v9736_v7, %v7858_v9  ;;  %v6011_v25 = vsel %vm5787_vm5, %v6010_v15, %v6009_v17  ;;  %v4200_v27 = vadd.f32 %v7778_v39, %v3941_v44  ;;  %v8103_v44 = vpop.f32.mrb[26].mxu0 }
 0x17d   : > { %v3944_v5 = vmul.f32 %v7845_v2, %v3685_v45  ;;  %v4201_v57 = vadd.f32 %v7834_v61, %v3942_v31  ;;  %v6185_v63 = vpack.c.b16 %v6011_v25, %v6011_v25  ;;  %v4202_v30 = vadd.f32 %v7806_v49, %v3943_v26  ;;  %9737 = vst [vmem:[#allocation41_spill] sm:$0xff] %v8103_v44 }
 0x17e   : > { %v4424_v41 = vmax.f32 %v4199_v16, 0.0  ;;  %v2079_v22 = vcombine.high %v1431_v59, %v1431_v59  ;;  %v4425_v56 = vmax.f32 %v4200_v27, 0.0  ;;  %v2086_v15 = vrot.slane %v1431_v59, %v7760_v23 }
 0x17f   : > { %v4203_v58 = vadd.f32 %v7848_v3, %v3944_v5  ;;  %v4426_v43 = vmax.f32 %v4201_v57, 0.0  ;;  %v6266_v34 = vsel %vm8050_vm8, %v6185_v63, %v6265_v36  ;;  %v4427_v14 = vmax.f32 %v4202_v30, 0.0 }
 0x180   : > { %v6898_v19 = vpack.c.bf16 %v4424_v41, %v4424_v41  ;;  %v2093_v42 = vrot.slane %v2079_v22, %v7760_v23  ;;  %6267 = vst [vmem:[%s8033_s19 + $0x44] sm:$0xf] %v6266_v34  ;;  %v6899_v18 = vpack.c.bf16 %v4425_v56, %v4425_v56  ;;  %v2094_v35 = vcombine.high %v2086_v15, %v2086_v15 }
 0x181   : > { %v4428_v6 = vmax.f32 %v4203_v58, 0.0  ;;  %v6900_v40 = vpack.c.bf16 %v4426_v43, %v4426_v43  ;;  %v6901_v37 = vpack.c.bf16 %v4427_v14, %v4427_v14  ;;  %v6563_v45 = vrot.slane %v7958_v24, 9 }
 0x182   : > { %v5549_v10 = vunpack.c.l.b16 %v6898_v19  ;;  %v2095_v13 = vcombine.high %v2093_v42, %v2093_v42  ;;  %v5550_v17 = vunpack.c.l.b16 %v6899_v18  ;;  %v6564_v16 = vrot.slane %v2086_v15, 9  ;;  %v8109_v19 = vpop.f32.mrb[26].mxu1 }
 0x183   : > { %v6902_v31 = vpack.c.bf16 %v4428_v6, %v4428_v6  ;;  %v5551_v26 = vunpack.c.l.b16 %v6900_v40  ;;  %v5552_v7 = vunpack.c.l.b16 %v6901_v37  ;;  %v6565_v25 = vrot.slane %v2094_v35, 9  ;;  %9738 = vst [vmem:[#allocation42_spill] sm:$0xff] %v8109_v19 }
 0x184   : > { %v5777_v59 = vrot.slane %v5549_v10, 5  ;;  %v6566_v36 = vrot.slane %v2093_v42, 9  ;;  %v5780_v27 = vrot.slane %v5550_v17, 4  ;;  %v6567_v63 = vrot.slane %v2095_v13, 9  ;;  %v9739_v17 = vld [vmem:[#allocation14_spill] sm:$0xff] }
 0x185   : > { %v5553_v5 = vunpack.c.l.b16 %v6902_v31  ;;  %v5783_v57 = vrot.slane %v5551_v26, 3  ;;  %v5786_v41 = vrot.slane %v5552_v7, 2  ;;  %v3576_v22 = vmax.f32 %v7958_v24, %v6563_v45 }
 0x186   : > { %v5779_v30 = vsel %vm5778_vm2, %v5777_v59, %v7978_v32  ;;  %v3577_v58 = vmax.f32 %v2086_v15, %v6564_v16  ;;  %v3578_v34 = vmax.f32 %v2094_v35, %v6565_v25  ;;  %v3579_v14 = vmax.f32 %v2093_v42, %v6566_v36  ;;  %v9740_v25 = vld [vmem:[#allocation15_spill] sm:$0xff] }
 0x187   : > { %v5782_v56 = vsel %vm5781_vm3, %v5780_v27, %v5779_v30  ;;  %v5789_v43 = vrot.slane %v5553_v5, 1  ;;  %v3580_v18 = vmax.f32 %v2095_v13, %v6567_v63  ;;  %v3801_v40 = vmax.f32 %v3576_v22, %v2086_v15  ;;  %v9741_v36 = vld [vmem:[#allocation11_spill] sm:$0xff]  ;;  %v9742_v5 = vld [vmem:[#allocation16_spill] sm:$0xff]  ;;  %v9745_v22 = vld [vmem:[#allocation13_spill] sm:$0xff] }
 0x188   : > { %v5785_v6 = vsel %vm5784_vm4, %v5783_v57, %v5782_v56  ;;  %v3802_v37 = vmax.f32 %v3577_v58, %v2094_v35  ;;  %v3803_v32 = vmax.f32 %v3578_v34, %v2093_v42  ;;  %v3804_v31 = vmax.f32 %v3579_v14, %v2095_v13  ;;  %v9743_v27 = vld [vmem:[#allocation12_spill] sm:$0xff]  ;;  %v9746_v56 = vld [vmem:[#allocation18_spill] sm:$0xff] }
 0x189   : > { %v5788_v10 = vsel %vm5787_vm5, %v5786_v41, %v5785_v6  ;;  %v1344_v24 = vmax.f32 %v7808_v50, %v7886_v4  ;;  %v3805_v26 = vmax.f32 %v3580_v18, %v9739_v17  ;;  %v4060_v16 = vmul.f32 %v7819_v54, %v3801_v40  ;;  %v9744_v41 = vld [vmem:[#allocation17_spill] sm:$0xff]  ;;  %v9747_v18 = vld [vmem:[#allocation19_spill] sm:$0xff] }
 0x18a   : > { %v5791_v45 = vsel %vm5790_vm9, %v5789_v43, %v5788_v10  ;;  %v4061_v7 = vmul.f32 %v7775_v38, %v3802_v37  ;;  %v4062_v15 = vmul.f32 %v7822_v55, %v3803_v32  ;;  %v4063_v35 = vmul.f32 %v7802_v48, %v3804_v31  ;;  %v9748_v32 = vld [vmem:[#allocation20_spill] sm:$0xff] }
 0x18b   : > { %v6168_v59 = vpack.c.b16 %v5791_v45, %v5791_v45  ;;  %v1376_v42 = vmax.f32 %v9741_v36, %v9740_v25  ;;  %v4064_v13 = vmul.f32 %v7845_v2, %v3805_v26  ;;  %v4319_v50 = vadd.f32 %v7831_v60, %v4060_v16  ;;  %v9749_v45 = vld [vmem:[#allocation21_spill] sm:$0xff]  ;;  %v9751_v36 = vld [vmem:[#allocation23_spill] sm:$0xff] }
 0x18c   : > { %v4320_v4 = vadd.f32 %v7778_v39, %v4061_v7  ;;  %v1342_v57 = vmax.f32 %v9743_v27, %v9742_v5  ;;  %v4321_v63 = vadd.f32 %v7834_v61, %v4062_v15  ;;  %v4322_v30 = vadd.f32 %v7806_v49, %v4063_v35 }
 0x18d   : > { %6229 = vst.msk [vmem:[%s8033_s19] sm:$0xf] %vm6228_vm6, %v6168_v59  ;;  %v4323_v34 = vadd.f32 %v7848_v3, %v4064_v13  ;;  %v4544_v14 = vmax.f32 %v4319_v50, 0.0  ;;  %v9750_v59 = vld [vmem:[#allocation22_spill] sm:$0xff]  ;;  %v1436_v13 = vmax.f32 %v1376_v42, %v9751_v36  ;;  %v9752_v50 = vld [vmem:[#allocation24_spill] sm:$0xff] }
 0x18e   : > { %v4545_v6 = vmax.f32 %v4320_v4, 0.0  ;;  %v4546_v37 = vmax.f32 %v4321_v63, 0.0  ;;  %v4547_v10 = vmax.f32 %v4322_v30, 0.0  ;;  %v1404_v15 = vmax.f32 %v1344_v24, %v9750_v59 }
 0x18f   : > { %v4548_v26 = vmax.f32 %v4323_v34, 0.0  ;;  %v7018_v16 = vpack.c.bf16 %v4544_v14, %v4544_v14  ;;  %v1402_v4 = vmax.f32 %v1342_v57, %v9752_v50  ;;  %v2164_v34 = vcombine.high %v1436_v13, %v1436_v13 }
 0x190   : > { %v7019_v7 = vpack.c.bf16 %v4545_v6, %v4545_v6  ;;  %v7020_v35 = vpack.c.bf16 %v4546_v37, %v4546_v37  ;;  %v7021_v25 = vpack.c.bf16 %v4547_v10, %v4547_v10  ;;  %v1620_v30 = vcombine.high %v1404_v15, %v1404_v15 }
 0x191   : > { %v7022_v5 = vpack.c.bf16 %v4548_v26, %v4548_v26  ;;  %v5669_v27 = vunpack.c.l.b16 %v7018_v16  ;;  %v8147_v43 = vrot.slane %v1404_v15, %v7760_v23 }
 0x192   : > { %v5670_v63 = vunpack.c.l.b16 %v7019_v7  ;;  %v5671_v40 = vunpack.c.l.b16 %v7020_v35  ;;  %v5672_v31 = vunpack.c.l.b16 %v7021_v25  ;;  %v1634_v24 = vrot.slane %v1620_v30, %v7760_v23  ;;  %v8157_v35 = vpop.f32.mrb[27].mxu0 }
 0x193   : > { %v5673_v14 = vunpack.c.l.b16 %v7022_v5  ;;  %v5990_v6 = vrot.slane %v5669_v27, 5  ;;  %v1635_v42 = vcombine.high %v8147_v43, %v8147_v43  ;;  %v6463_v57 = vrot.slane %v8147_v43, 9  ;;  %9753 = vst [vmem:[#allocation14_spill] sm:$0xff] %v8157_v35 }
 0x194   : > { %v5992_v17 = vrot.slane %v5670_v63, 4  ;;  %v5994_v37 = vrot.slane %v5671_v40, 3  ;;  %v5996_v10 = vrot.slane %v5672_v31, 2  ;;  %v8155_v7 = vcombine.high %v1634_v24, %v1634_v24 }
 0x195   : > { %v5991_v26 = vsel %vm5778_vm2, %v5990_v6, %v8025_v12  ;;  %v5998_v16 = vrot.slane %v5673_v14, 1  ;;  %v6465_v15 = vrot.slane %v1634_v24, 9  ;;  %v6464_v5 = vrot.slane %v1635_v42, 9 }
 0x196   : > { %v5993_v25 = vsel %vm5781_vm3, %v5992_v17, %v5991_v26  ;;  %v3476_v40 = vmax.f32 %v8147_v43, %v6463_v57  ;;  %v8162_v31 = vrot.slane %v1436_v13, %v7760_v23  ;;  %v2178_v30 = vrot.slane %v2164_v34, %v7760_v23 }
 0x197   : > { %v5995_v27 = vsel %vm5784_vm4, %v5994_v37, %v5993_v25  ;;  %v3478_v63 = vmax.f32 %v1634_v24, %v6465_v15  ;;  %v1586_v12 = vcombine.high %v1402_v4, %v1402_v4  ;;  %v3477_v6 = vmax.f32 %v1635_v42, %v6464_v5 }
 0x198   : > { %v5997_v14 = vsel %vm5787_vm5, %v5996_v10, %v5995_v27  ;;  %v3701_v58 = vmax.f32 %v3476_v40, %v1635_v42  ;;  %v2179_v17 = vcombine.high %v8162_v31, %v8162_v31  ;;  %v8171_v13 = vcombine.high %v2178_v30, %v2178_v30 }
 0x199   : > { %v5999_v26 = vsel %vm5790_vm9, %v5998_v16, %v5997_v14  ;;  %v3703_v57 = vmax.f32 %v3478_v63, %v8155_v7  ;;  %v6583_v37 = vrot.slane %v8162_v31, 9  ;;  %v3702_v25 = vmax.f32 %v3477_v6, %v1634_v24 }
 0x19a   : > { %v6184_v15 = vpack.c.b16 %v5999_v26, %v5999_v26  ;;  %v3960_v34 = vmul.f32 %v7763_v28, %v3701_v58  ;;  %v6584_v20 = vrot.slane %v2179_v17, 9  ;;  %v6585_v5 = vrot.slane %v2178_v30, 9 }
 0x19b   : > { %v3962_v10 = vmul.f32 %v7794_v46, %v3703_v57  ;;  %v3596_v42 = vmax.f32 %v8162_v31, %v6583_v37  ;;  %v1593_v40 = vrot.slane %v1402_v4, %v7760_v23  ;;  %v3961_v16 = vmul.f32 %v7811_v51, %v3702_v25 }
 0x19c   : > { %6264 = vst.msk [vmem:[%s8033_s19 + $0x40] sm:$0xf] %vm6228_vm6, %v6184_v15  ;;  %v4219_v27 = vadd.f32 %v7767_v33, %v3960_v34  ;;  %v3597_v63 = vmax.f32 %v2179_v17, %v6584_v20  ;;  %v1600_v14 = vrot.slane %v1586_v12, %v7760_v23  ;;  %v3598_v58 = vmax.f32 %v2178_v30, %v6585_v5  ;;  %v8190_v5 = vpop.f32.mrb[27].mxu1 }
 0x19d   : > { %v4221_v24 = vadd.f32 %v7798_v47, %v3962_v10  ;;  %v3821_v6 = vmax.f32 %v3596_v42, %v2179_v17  ;;  %v1601_v26 = vcombine.high %v1593_v40, %v1593_v40  ;;  %v4220_v57 = vadd.f32 %v7814_v52, %v3961_v16  ;;  %9754 = vst [vmem:[#allocation15_spill] sm:$0xff] %v8190_v5 }
 0x19e   : > { %v4444_v35 = vmax.f32 %v4219_v27, 0.0  ;;  %v3822_v37 = vmax.f32 %v3597_v63, %v2178_v30  ;;  %v8185_v19 = vcombine.high %v1600_v14, %v1600_v14  ;;  %v3823_v15 = vmax.f32 %v3598_v58, %v8171_v13 }
 0x19f   : > { %v4446_v4 = vmax.f32 %v4221_v24, 0.0  ;;  %v4080_v25 = vmul.f32 %v7763_v28, %v3821_v6  ;;  %v6455_v34 = vrot.slane %v1593_v40, 9  ;;  %v4445_v20 = vmax.f32 %v4220_v57, 0.0 }
 0x1a0   : > { %v6918_v44 = vpack.c.bf16 %v4444_v35, %v4444_v35  ;;  %v4081_v12 = vmul.f32 %v7811_v51, %v3822_v37  ;;  %v6456_v10 = vrot.slane %v1601_v26, 9  ;;  %v4082_v42 = vmul.f32 %v7794_v46, %v3823_v15 }
 0x1a1   : > { %v6920_v17 = vpack.c.bf16 %v4446_v4, %v4446_v4  ;;  %v4339_v30 = vadd.f32 %v7767_v33, %v4080_v25  ;;  %v6457_v16 = vrot.slane %v1600_v14, 9  ;;  %v6919_v27 = vpack.c.bf16 %v4445_v20, %v4445_v20 }
 0x1a2   : > { %v5569_v63 = vunpack.c.l.b16 %v6918_v44  ;;  %v4340_v24 = vadd.f32 %v7814_v52, %v4081_v12  ;;  %v3468_v58 = vmax.f32 %v1593_v40, %v6455_v34  ;;  %v4341_v57 = vadd.f32 %v7798_v47, %v4082_v42 }
 0x1a3   : > { %v5571_v6 = vunpack.c.l.b16 %v6920_v17  ;;  %v4564_v35 = vmax.f32 %v4339_v30, 0.0  ;;  %v3469_v29 = vmax.f32 %v1601_v26, %v6456_v10  ;;  %v5570_v37 = vunpack.c.l.b16 %v6919_v27  ;;  %v9755_v10 = vld [vmem:[#allocation25_spill] sm:$0xff] }
 0x1a4   : > { %v4565_v50 = vmax.f32 %v4340_v24, 0.0  ;;  %v3470_v11 = vmax.f32 %v1600_v14, %v6457_v16  ;;  %v3693_v5 = vmax.f32 %v3468_v58, %v1601_v26  ;;  %v4566_v15 = vmax.f32 %v4341_v57, 0.0 }
 0x1a5   : > { %v8196_v4 = vrot.slane %v5571_v6, 6  ;;  %v7038_v36 = vpack.c.bf16 %v4564_v35, %v4564_v35  ;;  %v3694_v25 = vmax.f32 %v3469_v29, %v1600_v14  ;;  %v5818_v53 = vrot.slane %v5570_v37, 7  ;;  %v9757_v6 = vld [vmem:[#allocation26_spill] sm:$0xff] }
 0x1a6   : > { %v7039_v20 = vpack.c.bf16 %v4565_v50, %v4565_v50  ;;  %v3695_v44 = vmax.f32 %v3470_v11, %v8185_v19  ;;  %v3952_v40 = vmul.f32 %v7763_v28, %v3693_v5  ;;  %v7040_v34 = vpack.c.bf16 %v4566_v15, %v4566_v15 }
 0x1a7   : > { %v5689_v12 = vunpack.c.l.b16 %v7038_v36  ;;  %v3953_v17 = vmul.f32 %v7811_v51, %v3694_v25  ;;  %v9756_v42 = vmax.f32 %v9745_v22, %v9744_v41  ;;  %v5819_v30 = vsel %vm5772_vm0, %v5818_v53, %v5569_v63 }
 0x1a8   : > { %v5690_v16 = vunpack.c.l.b16 %v7039_v20  ;;  %v3954_v29 = vmul.f32 %v7794_v46, %v3695_v44  ;;  %v4211_v50 = vadd.f32 %v7767_v33, %v3952_v40  ;;  %v5691_v14 = vunpack.c.l.b16 %v7040_v34 }
 0x1a9   : > { %v1434_v26 = vmax.f32 %v9756_v42, %v9755_v10  ;;  %v4212_v11 = vadd.f32 %v7814_v52, %v3953_v17  ;;  %v9758_v41 = vmax.f32 %v7840_v0, %v9746_v56 }
 0x1aa   : > { %v6026_v27 = vrot.slane %v5690_v16, 7  ;;  %v4213_v24 = vadd.f32 %v7798_v47, %v3954_v29  ;;  %v4436_v58 = vmax.f32 %v4211_v50, 0.0  ;;  %v8215_v22 = vrot.slane %v5691_v14, 6 }
 0x1ab   : > { %v2130_v5 = vcombine.high %v1434_v26, %v1434_v26  ;;  %v2137_v36 = vrot.slane %v1434_v26, %v7760_v23  ;;  %v1405_v53 = vmax.f32 %v9758_v41, %v9757_v6  ;;  %v4437_v63 = vmax.f32 %v4212_v11, 0.0 }
 0x1ac   : > { %v8219_v37 = vsel %vm5772_vm0, %v6026_v27, %v5689_v12  ;;  %v4438_v15 = vmax.f32 %v4213_v24, 0.0  ;;  %v6910_v25 = vpack.c.bf16 %v4436_v58, %v4436_v58  ;;  %v6466_v27 = vrot.slane %v8155_v7, 9 }
 0x1ad   : > { %v2144_v57 = vrot.slane %v2130_v5, %v7760_v23  ;;  %v2145_v35 = vcombine.high %v2137_v36, %v2137_v36  ;;  %v6575_v20 = vrot.slane %v2137_v36, 9  ;;  %v6911_v44 = vpack.c.bf16 %v4437_v63, %v4437_v63 }
 0x1ae   : > { %v6912_v42 = vpack.c.bf16 %v4438_v15, %v4438_v15  ;;  %v5561_v0 = vunpack.c.l.b16 %v6910_v25  ;;  %v1637_v26 = vcombine.high %v1405_v53, %v1405_v53  ;;  %v1644_v14 = vrot.slane %v1405_v53, %v7760_v23 }
 0x1af   : > { %v8221_v40 = vcombine.high %v2144_v57, %v2144_v57  ;;  %v6576_v34 = vrot.slane %v2145_v35, 9  ;;  %v6577_v17 = vrot.slane %v2144_v57, 9  ;;  %v3588_v56 = vmax.f32 %v2137_v36, %v6575_v20 }
 0x1b0   : > { %v5562_v16 = vunpack.c.l.b16 %v6911_v44  ;;  %v5563_v11 = vunpack.c.l.b16 %v6912_v42  ;;  %v1651_v5 = vrot.slane %v1637_v26, %v7760_v23  ;;  %v1652_v63 = vcombine.high %v1644_v14, %v1644_v14  ;;  %v8236_v26 = vpop.f32.mrb[28].mxu0 }
 0x1b1   : > { %v3589_v29 = vmax.f32 %v2145_v35, %v6576_v34  ;;  %v3590_v50 = vmax.f32 %v2144_v57, %v6577_v17  ;;  %v3813_v12 = vmax.f32 %v3588_v56, %v2145_v35  ;;  %v6467_v20 = vrot.slane %v1644_v14, 9  ;;  %9759 = vst [vmem:[#allocation11_spill] sm:$0xff] %v8236_v26  ;;  %v9760_v26 = vld [vmem:[#allocation27_spill] sm:$0xff] }
 0x1b2   : > { %v5804_v24 = vrot.slane %v5562_v16, 7  ;;  %v5806_v15 = vrot.slane %v5563_v11, 6  ;;  %v1653_v25 = vcombine.high %v1651_v5, %v1651_v5  ;;  %v6468_v34 = vrot.slane %v1652_v63, 9 }
 0x1b3   : > { %v3814_v58 = vmax.f32 %v3589_v29, %v2144_v57  ;;  %v3815_v41 = vmax.f32 %v3590_v50, %v8221_v40  ;;  %v4072_v36 = vmul.f32 %v7763_v28, %v3813_v12  ;;  %v6469_v42 = vrot.slane %v1651_v5, 9 }
 0x1b4   : > { %v5805_v44 = vsel %vm5772_vm0, %v5804_v24, %v5561_v0  ;;  %v3479_v56 = vmax.f32 %v8155_v7, %v6466_v27  ;;  %v3480_v0 = vmax.f32 %v1644_v14, %v6467_v20  ;;  %v3481_v50 = vmax.f32 %v1652_v63, %v6468_v34  ;;  %v8249_v34 = vpop.f32.mrb[29].mxu0 }
 0x1b5   : > { %v4073_v53 = vmul.f32 %v7811_v51, %v3814_v58  ;;  %v4074_v35 = vmul.f32 %v7794_v46, %v3815_v41  ;;  %v8232_v17 = vsel %vm5775_vm1, %v5806_v15, %v5805_v44  ;;  %v4331_v57 = vadd.f32 %v7767_v33, %v4072_v36  ;;  %v8242_v33 = vpop.f32.mrb[28].mxu1  ;;  %9762 = vst [vmem:[#allocation16_spill] sm:$0xff] %v8249_v34 }
 0x1b6   : > { %v3482_v12 = vmax.f32 %v1651_v5, %v6469_v42  ;;  %v3704_v24 = vmax.f32 %v3479_v56, %v1644_v14  ;;  %v5821_v58 = vsel %vm5775_vm1, %v8196_v4, %v5819_v30  ;;  %v3705_v36 = vmax.f32 %v3480_v0, %v1652_v63 }
 0x1b7   : > { %v4332_v16 = vadd.f32 %v7814_v52, %v4073_v53  ;;  %v4333_v29 = vadd.f32 %v7798_v47, %v4074_v35  ;;  %v4556_v11 = vmax.f32 %v4331_v57, 0.0  ;;  %v3706_v44 = vmax.f32 %v3481_v50, %v1651_v5 }
 0x1b8   : > { %v3707_v27 = vmax.f32 %v3482_v12, %v1653_v25  ;;  %v3963_v53 = vmul.f32 %v7819_v54, %v3704_v24  ;;  %v9761_v20 = vmax.f32 %v7842_v1, %v9747_v18  ;;  %v3964_v4 = vmul.f32 %v7775_v38, %v3705_v36  ;;  %v8257_v18 = vpop.f32.mrb[29].mxu1  ;;  %v8262_v24 = vpop.f32.mrb[30].mxu0 }
 0x1b9   : > { %v4557_v41 = vmax.f32 %v4332_v16, 0.0  ;;  %v4558_v15 = vmax.f32 %v4333_v29, 0.0  ;;  %v7030_v7 = vpack.c.bf16 %v4556_v11, %v4556_v11  ;;  %v3965_v30 = vmul.f32 %v7822_v55, %v3706_v44  ;;  %9763 = vst [vmem:[#allocation12_spill] sm:$0xff] %v8257_v18  ;;  %9764 = vst [vmem:[#allocation17_spill] sm:$0xff] %v8262_v24 }
 0x1ba   : > { %v1437_v35 = vmax.f32 %v9761_v20, %v9760_v26  ;;  %v3966_v63 = vmul.f32 %v7802_v48, %v3707_v27  ;;  %v4222_v25 = vadd.f32 %v7831_v60, %v3963_v53  ;;  %v4223_v29 = vadd.f32 %v7778_v39, %v3964_v4 }
 0x1bb   : > { %v7031_v14 = vpack.c.bf16 %v4557_v41, %v4557_v41  ;;  %v7032_v57 = vpack.c.bf16 %v4558_v15, %v4558_v15  ;;  %v5681_v5 = vunpack.c.l.b16 %v7030_v7  ;;  %v4224_v1 = vadd.f32 %v7834_v61, %v3965_v30  ;;  %v8264_v7 = vpop.f32.mrb[30].mxu1 }
 0x1bc   : > { %v2181_v42 = vcombine.high %v1437_v35, %v1437_v35  ;;  %v4225_v0 = vadd.f32 %v7806_v49, %v3966_v63  ;;  %v4447_v50 = vmax.f32 %v4222_v25, 0.0  ;;  %v2188_v11 = vrot.slane %v1437_v35, %v7760_v23  ;;  %9765 = vst [vmem:[#allocation13_spill] sm:$0xff] %v8264_v7  ;;  %v8268_v4 = vpop.f32.mrb[31].mxu1 }
 0x1bd   : > { %v5682_v56 = vunpack.c.l.b16 %v7031_v14  ;;  %v5683_v16 = vunpack.c.l.b16 %v7032_v57  ;;  %v4448_v36 = vmax.f32 %v4223_v29, 0.0  ;;  %v4449_v44 = vmax.f32 %v4224_v1, 0.0  ;;  %v8266_v57 = vpop.f32.mrb[31].mxu0  ;;  %9767 = vst [vmem:[#allocation19_spill] sm:$0xff] %v8268_v4 }
 0x1be   : > { %v2195_v12 = vrot.slane %v2181_v42, %v7760_v23  ;;  %v4450_v27 = vmax.f32 %v4225_v0, 0.0  ;;  %v6921_v53 = vpack.c.bf16 %v4447_v50, %v4447_v50  ;;  %v2196_v20 = vcombine.high %v2188_v11, %v2188_v11  ;;  %9766 = vst [vmem:[#allocation18_spill] sm:$0xff] %v8266_v57 }
 0x1bf   : > { %v6012_v41 = vrot.slane %v5682_v56, 7  ;;  %v6014_v15 = vrot.slane %v5683_v16, 6  ;;  %v6922_v30 = vpack.c.bf16 %v4448_v36, %v4448_v36  ;;  %v6923_v63 = vpack.c.bf16 %v4449_v44, %v4449_v44 }
 0x1c0   : > { %v2197_v14 = vcombine.high %v2195_v12, %v2195_v12  ;;  %v6586_v25 = vrot.slane %v8171_v13, 9  ;;  %v6924_v56 = vpack.c.bf16 %v4450_v27, %v4450_v27  ;;  %v5572_v16 = vunpack.c.l.b16 %v6921_v53 }
 0x1c1   : > { %v6013_v35 = vsel %vm5772_vm0, %v6012_v41, %v5681_v5  ;;  %v6587_v29 = vrot.slane %v2188_v11, 9  ;;  %v5573_v1 = vunpack.c.l.b16 %v6922_v30  ;;  %v5574_v0 = vunpack.c.l.b16 %v6923_v63  ;;  %v8279_v30 = vpop.f32.mrb[32].mxu1 }
 0x1c2   : > { %v8273_v42 = vsel %vm5775_vm1, %v6014_v15, %v6013_v35  ;;  %v6588_v50 = vrot.slane %v2196_v20, 9  ;;  %v6589_v7 = vrot.slane %v2195_v12, 9  ;;  %v5575_v24 = vunpack.c.l.b16 %v6924_v56  ;;  %v8277_v35 = vpop.f32.mrb[32].mxu0  ;;  %9769 = vst [vmem:[#allocation21_spill] sm:$0xff] %v8279_v30 }
 0x1c3   : > { %v5822_v57 = vrot.slane %v5572_v16, 5  ;;  %v3599_v4 = vmax.f32 %v8171_v13, %v6586_v25  ;;  %v3600_v18 = vmax.f32 %v2188_v11, %v6587_v29  ;;  %v5824_v5 = vrot.slane %v5573_v1, 4  ;;  %9768 = vst [vmem:[#allocation20_spill] sm:$0xff] %v8277_v35 }
 0x1c4   : > { %v5826_v41 = vrot.slane %v5574_v0, 3  ;;  %v3601_v36 = vmax.f32 %v2196_v20, %v6588_v50  ;;  %v3602_v44 = vmax.f32 %v2195_v12, %v6589_v7  ;;  %v5828_v15 = vrot.slane %v5575_v24, 2 }
 0x1c5   : > { %v5823_v34 = vsel %vm5778_vm2, %v5822_v57, %v5821_v58  ;;  %v3824_v27 = vmax.f32 %v3599_v4, %v2188_v11  ;;  %v3825_v53 = vmax.f32 %v3600_v18, %v2196_v20  ;;  %v6029_v13 = vsel %vm5775_vm1, %v8215_v22, %v8219_v37  ;;  %v9770_v11 = vld [vmem:[#allocation28_spill] sm:$0xff]  ;;  %v8292_v57 = vpop.f32.mrb[33].mxu0 }
 0x1c6   : > { %v5825_v63 = vsel %vm5781_vm3, %v5824_v5, %v5823_v34  ;;  %v3826_v56 = vmax.f32 %v3601_v36, %v2195_v12  ;;  %v3827_v16 = vmax.f32 %v3602_v44, %v2197_v14  ;;  %v9771_v18 = vmax.f32 %v7856_v8, %v9748_v32  ;;  %9772 = vst [vmem:[#allocation22_spill] sm:$0xff] %v8292_v57  ;;  %v6237_v12 = vld [vmem:[%s8033_s19 + $0xc] sm:$0xf] }
 0x1c7   : > { %v5827_v7 = vsel %vm5784_vm4, %v5826_v41, %v5825_v63  ;;  %v4083_v58 = vmul.f32 %v7819_v54, %v3824_v27  ;;  %v4084_v24 = vmul.f32 %v7775_v38, %v3825_v53  ;;  %v6458_v37 = vrot.slane %v8185_v19, 9 }
 0x1c8   : > { %v1403_v20 = vmax.f32 %v9771_v18, %v9770_v11  ;;  %v5829_v34 = vsel %vm5787_vm5, %v5828_v15, %v5827_v7  ;;  %v4085_v14 = vmul.f32 %v7822_v55, %v3826_v56  ;;  %v4086_v22 = vmul.f32 %v7802_v48, %v3827_v16 }
 0x1c9   : > { %v6171_v4 = vpack.c.b16 %v5829_v34, %v5829_v34  ;;  %v4342_v25 = vadd.f32 %v7831_v60, %v4083_v58  ;;  %v4343_v29 = vadd.f32 %v7778_v39, %v4084_v24  ;;  %v3471_v50 = vmax.f32 %v8185_v19, %v6458_v37  ;;  %v8309_v34 = vpop.f32.mrb[33].mxu1 }
 0x1ca   : > { %v1603_v1 = vcombine.high %v1403_v20, %v1403_v20  ;;  %v4344_v8 = vadd.f32 %v7834_v61, %v4085_v14  ;;  %v4345_v32 = vadd.f32 %v7806_v49, %v4086_v22  ;;  %v1610_v0 = vrot.slane %v1403_v20, %v7760_v23  ;;  %9773 = vst [vmem:[#allocation25_spill] sm:$0xff] %v8309_v34 }
 0x1cb   : > { %v6238_v5 = vsel %vm8050_vm8, %v6171_v4, %v6237_v12  ;;  %v4567_v41 = vmax.f32 %v4342_v25, 0.0  ;;  %v4568_v36 = vmax.f32 %v4343_v29, 0.0 }
 0x1cc   : > { %v1617_v44 = vrot.slane %v1603_v1, %v7760_v23  ;;  %6239 = vst [vmem:[%s8033_s19 + $0xc] sm:$0xf] %v6238_v5  ;;  %v4569_v15 = vmax.f32 %v4344_v8, 0.0  ;;  %v4570_v27 = vmax.f32 %v4345_v32, 0.0  ;;  %v1618_v53 = vcombine.high %v1610_v0, %v1610_v0 }
 0x1cd   : > { %v6459_v63 = vrot.slane %v1610_v0, 9  ;;  %v7041_v56 = vpack.c.bf16 %v4567_v41, %v4567_v41  ;;  %v7042_v16 = vpack.c.bf16 %v4568_v36, %v4568_v36  ;;  %v3696_v1 = vmax.f32 %v3471_v50, %v1610_v0 }
 0x1ce   : > { %v1619_v7 = vcombine.high %v1617_v44, %v1617_v44  ;;  %v6461_v58 = vrot.slane %v1617_v44, 9  ;;  %v7043_v24 = vpack.c.bf16 %v4569_v15, %v4569_v15  ;;  %v7044_v18 = vpack.c.bf16 %v4570_v27, %v4570_v27 }
 0x1cf   : > { %v6460_v20 = vrot.slane %v1618_v53, 9  ;;  %v3472_v19 = vmax.f32 %v1610_v0, %v6459_v63  ;;  %v5692_v12 = vunpack.c.l.b16 %v7041_v56  ;;  %v5693_v14 = vunpack.c.l.b16 %v7042_v16 }
 0x1d0   : > { %v6462_v22 = vrot.slane %v1619_v7, 9  ;;  %v3474_v37 = vmax.f32 %v1617_v44, %v6461_v58  ;;  %v5694_v4 = vunpack.c.l.b16 %v7043_v24  ;;  %v5695_v25 = vunpack.c.l.b16 %v7044_v18 }
 0x1d1   : > { %v3473_v29 = vmax.f32 %v1618_v53, %v6460_v20  ;;  %v6030_v8 = vrot.slane %v5692_v12, 5  ;;  %v6032_v32 = vrot.slane %v5693_v14, 4  ;;  %v3697_v41 = vmax.f32 %v3472_v19, %v1618_v53  ;;  %v9774_v53 = vld [vmem:[#allocation29_spill] sm:$0xff]  ;;  %v6269_v12 = vld [vmem:[%s8033_s19 + $0x4c] sm:$0xf] }
 0x1d2   : > { %v3475_v5 = vmax.f32 %v1619_v7, %v6462_v22  ;;  %v6034_v36 = vrot.slane %v5694_v4, 3  ;;  %v6036_v57 = vrot.slane %v5695_v25, 2  ;;  %v3699_v27 = vmax.f32 %v3474_v37, %v1619_v7 }
 0x1d3   : > { %v3698_v15 = vmax.f32 %v3473_v29, %v1617_v44  ;;  %v6031_v63 = vsel %vm5778_vm2, %v6030_v8, %v6029_v13  ;;  %v3955_v16 = vmul.f32 %v7819_v54, %v3696_v1  ;;  %v3956_v58 = vmul.f32 %v7775_v38, %v3697_v41 }
 0x1d4   : > { %v3700_v56 = vmax.f32 %v3475_v5, %v8147_v43  ;;  %v6033_v24 = vsel %vm5781_vm3, %v6032_v32, %v6031_v63  ;;  %v3958_v50 = vmul.f32 %v7802_v48, %v3699_v27  ;;  %v9775_v18 = vmax.f32 %v7858_v9, %v9749_v45 }
 0x1d5   : > { %v3957_v0 = vmul.f32 %v7822_v55, %v3698_v15  ;;  %v6035_v7 = vsel %vm5784_vm4, %v6034_v36, %v6033_v24  ;;  %v4214_v43 = vadd.f32 %v7831_v60, %v3955_v16  ;;  %v4215_v20 = vadd.f32 %v7778_v39, %v3956_v58  ;;  %v8336_v16 = vpop.f32.mrb[34].mxu0 }
 0x1d6   : > { %v1435_v44 = vmax.f32 %v9775_v18, %v9774_v53  ;;  %v3959_v13 = vmul.f32 %v7845_v2, %v3700_v56  ;;  %v6037_v19 = vsel %vm5787_vm5, %v6036_v57, %v6035_v7  ;;  %v4217_v22 = vadd.f32 %v7806_v49, %v3958_v50  ;;  %9776 = vst [vmem:[#allocation26_spill] sm:$0xff] %v8336_v16 }
 0x1d7   : > { %v4216_v14 = vadd.f32 %v7834_v61, %v3957_v0  ;;  %v6187_v4 = vpack.c.b16 %v6037_v19, %v6037_v19  ;;  %v4439_v45 = vmax.f32 %v4214_v43, 0.0  ;;  %v4440_v25 = vmax.f32 %v4215_v20, 0.0 }
 0x1d8   : > { %v2147_v37 = vcombine.high %v1435_v44, %v1435_v44  ;;  %v4218_v9 = vadd.f32 %v7848_v3, %v3959_v13  ;;  %v4442_v1 = vmax.f32 %v4217_v22, 0.0  ;;  %v2154_v8 = vrot.slane %v1435_v44, %v7760_v23 }
 0x1d9   : > { %v4441_v29 = vmax.f32 %v4216_v14, 0.0  ;;  %v6270_v57 = vsel %vm8050_vm8, %v6187_v4, %v6269_v12  ;;  %v6913_v41 = vpack.c.bf16 %v4439_v45, %v4439_v45  ;;  %v6914_v36 = vpack.c.bf16 %v4440_v25, %v4440_v25 }
 0x1da   : > { %v2161_v32 = vrot.slane %v2147_v37, %v7760_v23  ;;  %v4443_v5 = vmax.f32 %v4218_v9, 0.0  ;;  %6271 = vst [vmem:[%s8033_s19 + $0x4c] sm:$0xf] %v6270_v57  ;;  %v6916_v27 = vpack.c.bf16 %v4442_v1, %v4442_v1  ;;  %v2162_v63 = vcombine.high %v2154_v8, %v2154_v8  ;;  %v8342_v1 = vpop.f32.mrb[34].mxu1 }
 0x1db   : > { %v6915_v15 = vpack.c.bf16 %v4441_v29, %v4441_v29  ;;  %v5564_v24 = vunpack.c.l.b16 %v6913_v41  ;;  %v5565_v0 = vunpack.c.l.b16 %v6914_v36  ;;  %v6578_v50 = vrot.slane %v8221_v40, 9  ;;  %9777 = vst [vmem:[#allocation27_spill] sm:$0xff] %v8342_v1 }
 0x1dc   : > { %v2163_v56 = vcombine.high %v2161_v32, %v2161_v32  ;;  %v6917_v58 = vpack.c.bf16 %v4443_v5, %v4443_v5  ;;  %v5567_v44 = vunpack.c.l.b16 %v6916_v27  ;;  %v6579_v7 = vrot.slane %v2154_v8, 9 }
 0x1dd   : > { %v5566_v18 = vunpack.c.l.b16 %v6915_v15  ;;  %v6580_v13 = vrot.slane %v2162_v63, 9  ;;  %v5808_v20 = vrot.slane %v5564_v24, 5  ;;  %v5810_v19 = vrot.slane %v5565_v0, 4 }
 0x1de   : > { %v5568_v43 = vunpack.c.l.b16 %v6917_v58  ;;  %v6581_v12 = vrot.slane %v2161_v32, 9  ;;  %v5814_v22 = vrot.slane %v5567_v44, 2  ;;  %v6582_v37 = vrot.slane %v2163_v56, 9 }
 0x1df   : > { %v5812_v14 = vrot.slane %v5566_v18, 3  ;;  %v3591_v4 = vmax.f32 %v8221_v40, %v6578_v50  ;;  %v5809_v9 = vsel %vm5778_vm2, %v5808_v20, %v8232_v17  ;;  %v3592_v25 = vmax.f32 %v2154_v8, %v6579_v7  ;;  %v9778_v7 = vld [vmem:[#allocation30_spill] sm:$0xff]  ;;  %v9780_v20 = vld [vmem:[#allocation31_spill] sm:$0xff] }
 0x1e0   : > { %v5816_v45 = vrot.slane %v5568_v43, 1  ;;  %v3593_v29 = vmax.f32 %v2162_v63, %v6580_v13  ;;  %v5811_v57 = vsel %vm5781_vm3, %v5810_v19, %v5809_v9  ;;  %v3594_v5 = vmax.f32 %v2161_v32, %v6581_v12  ;;  %v9781_v19 = vld [vmem:[#allocation24_spill] sm:$0xff] }
 0x1e1   : > { %v3595_v41 = vmax.f32 %v2163_v56, %v6582_v37  ;;  %v3816_v36 = vmax.f32 %v3591_v4, %v2154_v8  ;;  %v5813_v15 = vsel %vm5784_vm4, %v5812_v14, %v5811_v57  ;;  %v3817_v27 = vmax.f32 %v3592_v25, %v2162_v63  ;;  %v9779_v63 = vld [vmem:[#allocation23_spill] sm:$0xff]  ;;  %v9782_v14 = vld [vmem:[#allocation32_spill] sm:$0xff] }
 0x1e2   : > { %v3818_v58 = vmax.f32 %v3593_v29, %v2161_v32  ;;  %v1348_v40 = vmax.f32 %v9750_v59, %v7983_v21  ;;  %v5815_v24 = vsel %vm5787_vm5, %v5814_v22, %v5813_v15  ;;  %v3819_v17 = vmax.f32 %v3594_v5, %v2163_v56  ;;  %v9784_v5 = vld [vmem:[#allocation34_spill] sm:$0xff] }
 0x1e3   : > { %v3820_v0 = vmax.f32 %v3595_v41, %v8162_v31  ;;  %v4075_v50 = vmul.f32 %v7819_v54, %v3816_v36  ;;  %v5817_v18 = vsel %vm5790_vm9, %v5816_v45, %v5815_v24  ;;  %v4076_v44 = vmul.f32 %v7775_v38, %v3817_v27  ;;  %v9783_v45 = vld [vmem:[#allocation33_spill] sm:$0xff]  ;;  %v9785_v36 = vld [vmem:[#allocation35_spill] sm:$0xff] }
 0x1e4   : > { %v4077_v8 = vmul.f32 %v7822_v55, %v3818_v58  ;;  %v1380_v32 = vmax.f32 %v9779_v63, %v9778_v7  ;;  %v6170_v13 = vpack.c.b16 %v5817_v18, %v5817_v18  ;;  %v4078_v21 = vmul.f32 %v7802_v48, %v3819_v17  ;;  %v9786_v17 = vld [vmem:[#allocation36_spill] sm:$0xff]  ;;  %v9788_v7 = vld [vmem:[#allocation38_spill] sm:$0xff] }
 0x1e5   : > { %v4079_v59 = vmul.f32 %v7845_v2, %v3820_v0  ;;  %v4334_v56 = vadd.f32 %v7831_v60, %v4075_v50  ;;  %v4335_v31 = vadd.f32 %v7778_v39, %v4076_v44  ;;  %v1346_v12 = vmax.f32 %v9781_v19, %v9780_v20  ;;  %v9787_v44 = vld [vmem:[#allocation37_spill] sm:$0xff] }
 0x1e6   : > { %v4336_v43 = vadd.f32 %v7834_v61, %v4077_v8  ;;  %6236 = vst.msk [vmem:[%s8033_s19 + $0x8] sm:$0xf] %vm6228_vm6, %v6170_v13  ;;  %v4337_v37 = vadd.f32 %v7806_v49, %v4078_v21  ;;  %v1408_v8 = vmax.f32 %v1348_v40, %v9787_v44  ;;  %v1440_v63 = vmax.f32 %v1380_v32, %v9788_v7 }
 0x1e7   : > { %v4338_v4 = vadd.f32 %v7848_v3, %v4079_v59  ;;  %v4559_v9 = vmax.f32 %v4334_v56, 0.0  ;;  %v4560_v29 = vmax.f32 %v4335_v31, 0.0  ;;  %v9789_v56 = vld [vmem:[#allocation39_spill] sm:$0xff] }
 0x1e8   : > { %v4561_v57 = vmax.f32 %v4336_v43, 0.0  ;;  %v4562_v27 = vmax.f32 %v4337_v37, 0.0  ;;  %v1406_v31 = vmax.f32 %v1346_v12, %v9789_v56  ;;  %v1688_v19 = vcombine.high %v1408_v8, %v1408_v8 }
 0x1e9   : > { %v4563_v58 = vmax.f32 %v4338_v4, 0.0  ;;  %v7033_v24 = vpack.c.bf16 %v4559_v9, %v4559_v9  ;;  %v7034_v50 = vpack.c.bf16 %v4560_v29, %v4560_v29  ;;  %v8381_v37 = vrot.slane %v1408_v8, %v7760_v23 }
 0x1ea   : > { %v7035_v18 = vpack.c.bf16 %v4561_v57, %v4561_v57  ;;  %v7036_v13 = vpack.c.bf16 %v4562_v27, %v4562_v27  ;;  %v2232_v29 = vcombine.high %v1440_v63, %v1440_v63  ;;  %v1702_v40 = vrot.slane %v1688_v19, %v7760_v23 }
 0x1eb   : > { %v7037_v21 = vpack.c.bf16 %v4563_v58, %v4563_v58  ;;  %v5684_v59 = vunpack.c.l.b16 %v7033_v24  ;;  %v5685_v43 = vunpack.c.l.b16 %v7034_v50  ;;  %v1703_v32 = vcombine.high %v8381_v37, %v8381_v37 }
 0x1ec   : > { %v5686_v20 = vunpack.c.l.b16 %v7035_v18  ;;  %v5687_v4 = vunpack.c.l.b16 %v7036_v13  ;;  %v6478_v24 = vrot.slane %v8381_v37, 9  ;;  %v8390_v18 = vcombine.high %v1702_v40, %v1702_v40 }
 0x1ed   : > { %v5688_v9 = vunpack.c.l.b16 %v7037_v21  ;;  %v6016_v0 = vrot.slane %v5684_v59, 5  ;;  %v6018_v57 = vrot.slane %v5685_v43, 4  ;;  %v6479_v8 = vrot.slane %v1703_v32, 9  ;;  %v8392_v21 = vpop.f32.mrb[35].mxu0 }
 0x1ee   : > { %v6020_v15 = vrot.slane %v5686_v20, 3  ;;  %v6022_v27 = vrot.slane %v5687_v4, 2  ;;  %v6480_v13 = vrot.slane %v1702_v40, 9  ;;  %9790 = vst [vmem:[#allocation28_spill] sm:$0xff] %v8392_v21  ;;  %v3491_v43 = vmax.f32 %v8381_v37, %v6478_v24 }
 0x1ef   : > { %v6017_v12 = vsel %vm5778_vm2, %v6016_v0, %v8273_v42  ;;  %v6024_v58 = vrot.slane %v5688_v9, 1  ;;  %v8397_v20 = vrot.slane %v1440_v63, %v7760_v23  ;;  %v2246_v42 = vrot.slane %v2232_v29, %v7760_v23 }
 0x1f0   : > { %v6019_v50 = vsel %vm5781_vm3, %v6018_v57, %v6017_v12  ;;  %v3492_v19 = vmax.f32 %v1703_v32, %v6479_v8  ;;  %v3493_v4 = vmax.f32 %v1702_v40, %v6480_v13  ;;  %v1654_v9 = vcombine.high %v1406_v31, %v1406_v31 }
 0x1f1   : > { %v6021_v59 = vsel %vm5784_vm4, %v6020_v15, %v6019_v50  ;;  %v3716_v12 = vmax.f32 %v3491_v43, %v1703_v32  ;;  %v2247_v41 = vcombine.high %v8397_v20, %v8397_v20  ;;  %v8404_v15 = vcombine.high %v2246_v42, %v2246_v42 }
 0x1f2   : > { %v6023_v0 = vsel %vm5787_vm5, %v6022_v27, %v6021_v59  ;;  %v3717_v50 = vmax.f32 %v3492_v19, %v1702_v40  ;;  %v3718_v63 = vmax.f32 %v3493_v4, %v8390_v18  ;;  %v6598_v29 = vrot.slane %v8397_v20, 9 }
 0x1f3   : > { %v6025_v57 = vsel %vm5790_vm9, %v6024_v58, %v6023_v0  ;;  %v3975_v27 = vmul.f32 %v7763_v28, %v3716_v12  ;;  %v6599_v59 = vrot.slane %v2247_v41, 9  ;;  %v6600_v8 = vrot.slane %v2246_v42, 9  ;;  %v9791_v0 = vld [vmem:[#allocation9_spill] sm:$0xff] }
 0x1f4   : > { %v6186_v24 = vpack.c.b16 %v6025_v57, %v6025_v57  ;;  %v1661_v13 = vrot.slane %v1406_v31, %v7760_v23  ;;  %v3976_v32 = vmul.f32 %v7811_v51, %v3717_v50  ;;  %v3977_v58 = vmul.f32 %v7794_v46, %v3718_v63 }
 0x1f5   : > { %v3611_v43 = vmax.f32 %v8397_v20, %v6598_v29  ;;  %v1668_v40 = vrot.slane %v1654_v9, %v7760_v23  ;;  %v4234_v19 = vadd.f32 %v9791_v0, %v3975_v27  ;;  %v3612_v4 = vmax.f32 %v2247_v41, %v6599_v59  ;;  %v8423_v59 = vpop.f32.mrb[35].mxu1 }
 0x1f6   : > { %6268 = vst.msk [vmem:[%s8033_s19 + $0x48] sm:$0xf] %vm6228_vm6, %v6186_v24  ;;  %v3613_v57 = vmax.f32 %v2246_v42, %v6600_v8  ;;  %v1669_v25 = vcombine.high %v1661_v13, %v1661_v13  ;;  %v4235_v12 = vadd.f32 %v7814_v52, %v3976_v32  ;;  %v4236_v22 = vadd.f32 %v7798_v47, %v3977_v58 }
 0x1f7   : > { %v3836_v31 = vmax.f32 %v3611_v43, %v2247_v41  ;;  %v8419_v21 = vcombine.high %v1668_v40, %v1668_v40  ;;  %v4459_v24 = vmax.f32 %v4234_v19, 0.0  ;;  %v3837_v50 = vmax.f32 %v3612_v4, %v2246_v42  ;;  %9792 = vst [vmem:[#allocation29_spill] sm:$0xff] %v8423_v59 }
 0x1f8   : > { %v3838_v63 = vmax.f32 %v3613_v57, %v8404_v15  ;;  %v6470_v1 = vrot.slane %v1661_v13, 9  ;;  %v4460_v29 = vmax.f32 %v4235_v12, 0.0  ;;  %v4461_v16 = vmax.f32 %v4236_v22, 0.0 }
 0x1f9   : > { %v4095_v9 = vmul.f32 %v7763_v28, %v3836_v31  ;;  %v6471_v27 = vrot.slane %v1669_v25, 9  ;;  %v6933_v8 = vpack.c.bf16 %v4459_v24, %v4459_v24  ;;  %v4096_v32 = vmul.f32 %v7811_v51, %v3837_v50 }
 0x1fa   : > { %v4097_v58 = vmul.f32 %v7794_v46, %v3838_v63  ;;  %v6472_v41 = vrot.slane %v1668_v40, 9  ;;  %v6934_v43 = vpack.c.bf16 %v4460_v29, %v4460_v29  ;;  %v6935_v34 = vpack.c.bf16 %v4461_v16, %v4461_v16 }
 0x1fb   : > { %v4354_v42 = vadd.f32 %v9791_v0, %v4095_v9  ;;  %v3483_v19 = vmax.f32 %v1661_v13, %v6470_v1  ;;  %v5584_v4 = vunpack.c.l.b16 %v6933_v8  ;;  %v4355_v57 = vadd.f32 %v7814_v52, %v4096_v32 }
 0x1fc   : > { %v4356_v22 = vadd.f32 %v7798_v47, %v4097_v58  ;;  %v3484_v12 = vmax.f32 %v1669_v25, %v6471_v27  ;;  %v5585_v31 = vunpack.c.l.b16 %v6934_v43  ;;  %v5586_v30 = vunpack.c.l.b16 %v6935_v34 }
 0x1fd   : > { %v4579_v59 = vmax.f32 %v4354_v42, 0.0  ;;  %v3485_v24 = vmax.f32 %v1668_v40, %v6472_v41  ;;  %v4580_v35 = vmax.f32 %v4355_v57, 0.0  ;;  %v3708_v56 = vmax.f32 %v3483_v19, %v1669_v25  ;;  %v9793_v41 = vld [vmem:[#allocation40_spill] sm:$0xff] }
 0x1fe   : > { %v4581_v50 = vmax.f32 %v4356_v22, 0.0  ;;  %v3709_v63 = vmax.f32 %v3484_v12, %v1668_v40  ;;  %v5844_v7 = vrot.slane %v5585_v31, 7  ;;  %v8430_v29 = vrot.slane %v5586_v30, 6 }
 0x1ff   : > { %v7053_v16 = vpack.c.bf16 %v4579_v59, %v4579_v59  ;;  %v3710_v1 = vmax.f32 %v3485_v24, %v8419_v21  ;;  %v7054_v13 = vpack.c.bf16 %v4580_v35, %v4580_v35  ;;  %v3967_v8 = vmul.f32 %v7763_v28, %v3708_v56 }
 0x200   : > { %v7055_v9 = vpack.c.bf16 %v4581_v50, %v4581_v50  ;;  %v3968_v27 = vmul.f32 %v7811_v51, %v3709_v63  ;;  %v5845_v34 = vsel %vm5772_vm0, %v5844_v7, %v5584_v4  ;;  %v9794_v25 = vmax.f32 %v9755_v10, %v9782_v14  ;;  %v9795_v7 = vld [vmem:[#allocation41_spill] sm:$0xff] }
 0x201   : > { %v5704_v32 = vunpack.c.l.b16 %v7053_v16  ;;  %v3969_v58 = vmul.f32 %v7794_v46, %v3710_v1  ;;  %v5705_v40 = vunpack.c.l.b16 %v7054_v13  ;;  %v4226_v43 = vadd.f32 %v9791_v0, %v3967_v8 }
 0x202   : > { %v1438_v30 = vmax.f32 %v9794_v25, %v9793_v41  ;;  %v5706_v59 = vunpack.c.l.b16 %v7055_v9  ;;  %v4227_v35 = vadd.f32 %v7814_v52, %v3968_v27  ;;  %v9796_v4 = vmax.f32 %v9757_v6, %v9783_v45 }
 0x203   : > { %v4228_v56 = vadd.f32 %v7798_v47, %v3969_v58  ;;  %v6052_v22 = vrot.slane %v5705_v40, 7  ;;  %v4451_v10 = vmax.f32 %v4226_v43, 0.0 }
 0x204   : > { %v2198_v42 = vcombine.high %v1438_v30, %v1438_v30  ;;  %v2205_v19 = vrot.slane %v1438_v30, %v7760_v23  ;;  %v1409_v57 = vmax.f32 %v9796_v4, %v9795_v7  ;;  %v8449_v12 = vrot.slane %v5706_v59, 6 }
 0x205   : > { %v4452_v14 = vmax.f32 %v4227_v35, 0.0  ;;  %v4453_v31 = vmax.f32 %v4228_v56, 0.0  ;;  %v8453_v16 = vsel %vm5772_vm0, %v6052_v22, %v5704_v32  ;;  %v6925_v1 = vpack.c.bf16 %v4451_v10, %v4451_v10 }
 0x206   : > { %v2212_v24 = vrot.slane %v2198_v42, %v7760_v23  ;;  %v2213_v50 = vcombine.high %v2205_v19, %v2205_v19  ;;  %v6590_v63 = vrot.slane %v2205_v19, 9  ;;  %v1705_v9 = vcombine.high %v1409_v57, %v1409_v57 }
 0x207   : > { %v6926_v13 = vpack.c.bf16 %v4452_v14, %v4452_v14  ;;  %v6927_v8 = vpack.c.bf16 %v4453_v31, %v4453_v31  ;;  %v5576_v58 = vunpack.c.l.b16 %v6925_v1  ;;  %v1712_v40 = vrot.slane %v1409_v57, %v7760_v23 }
 0x208   : > { %v8455_v27 = vcombine.high %v2212_v24, %v2212_v24  ;;  %v6591_v6 = vrot.slane %v2213_v50, 9  ;;  %v6592_v45 = vrot.slane %v2212_v24, 9  ;;  %v3603_v30 = vmax.f32 %v2205_v19, %v6590_v63 }
 0x209   : > { %v5577_v25 = vunpack.c.l.b16 %v6926_v13  ;;  %v5578_v59 = vunpack.c.l.b16 %v6927_v8  ;;  %v1719_v56 = vrot.slane %v1705_v9, %v7760_v23  ;;  %v1720_v4 = vcombine.high %v1712_v40, %v1712_v40 }
 0x20a   : > { %v3604_v43 = vmax.f32 %v2213_v50, %v6591_v6  ;;  %v3605_v35 = vmax.f32 %v2212_v24, %v6592_v45  ;;  %v3828_v42 = vmax.f32 %v3603_v30, %v2213_v50  ;;  %v6481_v22 = vrot.slane %v8390_v18, 9  ;;  %v8470_v30 = vpop.f32.mrb[36].mxu0 }
 0x20b   : > { %v5830_v32 = vrot.slane %v5577_v25, 7  ;;  %v5832_v10 = vrot.slane %v5578_v59, 6  ;;  %v1721_v7 = vcombine.high %v1719_v56, %v1719_v56  ;;  %v6482_v57 = vrot.slane %v1712_v40, 9  ;;  %9797 = vst [vmem:[#allocation30_spill] sm:$0xff] %v8470_v30 }
 0x20c   : > { %v3829_v14 = vmax.f32 %v3604_v43, %v2212_v24  ;;  %v3830_v31 = vmax.f32 %v3605_v35, %v8455_v27  ;;  %v4087_v19 = vmul.f32 %v7763_v28, %v3828_v42  ;;  %v6483_v63 = vrot.slane %v1720_v4, 9 }
 0x20d   : > { %v5831_v1 = vsel %vm5772_vm0, %v5830_v32, %v5576_v58  ;;  %v6484_v8 = vrot.slane %v1719_v56, 9  ;;  %v3494_v24 = vmax.f32 %v8390_v18, %v6481_v22  ;;  %v3495_v45 = vmax.f32 %v1712_v40, %v6482_v57  ;;  %v9798_v22 = vld [vmem:[#allocation42_spill] sm:$0xff] }
 0x20e   : > { %v8464_v13 = vsel %vm5775_vm1, %v5832_v10, %v5831_v1  ;;  %v4088_v9 = vmul.f32 %v7811_v51, %v3829_v14  ;;  %v4089_v50 = vmul.f32 %v7794_v46, %v3830_v31  ;;  %v4346_v6 = vadd.f32 %v9791_v0, %v4087_v19 }
 0x20f   : > { %v3496_v25 = vmax.f32 %v1720_v4, %v6483_v63  ;;  %v3497_v43 = vmax.f32 %v1719_v56, %v6484_v8  ;;  %v8476_v35 = vsel %vm5775_vm1, %v8430_v29, %v5845_v34  ;;  %v3719_v42 = vmax.f32 %v3494_v24, %v1712_v40  ;;  %v8482_v63 = vpop.f32.mrb[36].mxu1  ;;  %v8487_v40 = vpop.f32.mrb[37].mxu0 }
 0x210   : > { %v4347_v58 = vadd.f32 %v7814_v52, %v4088_v9  ;;  %v4348_v59 = vadd.f32 %v7798_v47, %v4089_v50  ;;  %v4571_v32 = vmax.f32 %v4346_v6, 0.0  ;;  %v3720_v10 = vmax.f32 %v3495_v45, %v1720_v4  ;;  %9800 = vst [vmem:[#allocation23_spill] sm:$0xff] %v8482_v63  ;;  %9801 = vst [vmem:[#allocation31_spill] sm:$0xff] %v8487_v40 }
 0x211   : > { %v3721_v14 = vmax.f32 %v3496_v25, %v1719_v56  ;;  %v3722_v18 = vmax.f32 %v3497_v43, %v1721_v7  ;;  %v9799_v19 = vmax.f32 %v9760_v26, %v9784_v5  ;;  %v3978_v50 = vmul.f32 %v7819_v54, %v3719_v42  ;;  %v8495_v43 = vpop.f32.mrb[37].mxu1 }
 0x212   : > { %v4572_v31 = vmax.f32 %v4347_v58, 0.0  ;;  %v4573_v1 = vmax.f32 %v4348_v59, 0.0  ;;  %v7045_v9 = vpack.c.bf16 %v4571_v32, %v4571_v32  ;;  %v3979_v29 = vmul.f32 %v7775_v38, %v3720_v10  ;;  %9802 = vst [vmem:[#allocation24_spill] sm:$0xff] %v8495_v43 }
 0x213   : > { %v1441_v57 = vmax.f32 %v9799_v19, %v9798_v22  ;;  %v3980_v34 = vmul.f32 %v7822_v55, %v3721_v14  ;;  %v3981_v7 = vmul.f32 %v7802_v48, %v3722_v18  ;;  %v4237_v26 = vadd.f32 %v7831_v60, %v3978_v50 }
 0x214   : > { %v7046_v56 = vpack.c.bf16 %v4572_v31, %v4572_v31  ;;  %v7047_v4 = vpack.c.bf16 %v4573_v1, %v4573_v1  ;;  %v5696_v6 = vunpack.c.l.b16 %v7045_v9  ;;  %v4238_v5 = vadd.f32 %v7778_v39, %v3979_v29  ;;  %v8498_v31 = vpop.f32.mrb[38].mxu0  ;;  %v8500_v1 = vpop.f32.mrb[38].mxu1 }
 0x215   : > { %v2249_v8 = vcombine.high %v1441_v57, %v1441_v57  ;;  %v4239_v24 = vadd.f32 %v7834_v61, %v3980_v34  ;;  %v4240_v58 = vadd.f32 %v7806_v49, %v3981_v7  ;;  %v2256_v59 = vrot.slane %v1441_v57, %v7760_v23  ;;  %9803 = vst [vmem:[#allocation32_spill] sm:$0xff] %v8498_v31  ;;  %v8502_v57 = vpop.f32.mrb[39].mxu0  ;;  %v8504_v7 = vpop.f32.mrb[39].mxu1 }
 0x216   : > { %v5697_v45 = vunpack.c.l.b16 %v7046_v56  ;;  %v5698_v25 = vunpack.c.l.b16 %v7047_v4  ;;  %v4462_v32 = vmax.f32 %v4237_v26, 0.0  ;;  %v4463_v42 = vmax.f32 %v4238_v5, 0.0  ;;  %9804 = vst [vmem:[#allocation33_spill] sm:$0xff] %v8500_v1  ;;  %9805 = vst [vmem:[#allocation34_spill] sm:$0xff] %v8502_v57  ;;  %v8512_v30 = vpop.f32.mrb[40].mxu0 }
 0x217   : > { %v4464_v10 = vmax.f32 %v4239_v24, 0.0  ;;  %v2263_v14 = vrot.slane %v2249_v8, %v7760_v23  ;;  %v4465_v9 = vmax.f32 %v4240_v58, 0.0  ;;  %v2264_v50 = vcombine.high %v2256_v59, %v2256_v59  ;;  %9806 = vst [vmem:[#allocation35_spill] sm:$0xff] %v8504_v7  ;;  %9807 = vst [vmem:[#allocation36_spill] sm:$0xff] %v8512_v30 }
 0x218   : > { %v6038_v18 = vrot.slane %v5697_v45, 7  ;;  %v6040_v19 = vrot.slane %v5698_v25, 6  ;;  %v6936_v29 = vpack.c.bf16 %v4462_v32, %v4462_v32  ;;  %v6937_v34 = vpack.c.bf16 %v4463_v42, %v4463_v42 }
 0x219   : > { %v6938_v56 = vpack.c.bf16 %v4464_v10, %v4464_v10  ;;  %v2265_v4 = vcombine.high %v2263_v14, %v2263_v14  ;;  %v6939_v5 = vpack.c.bf16 %v4465_v9, %v4465_v9  ;;  %v6601_v8 = vrot.slane %v8404_v15, 9 }
 0x21a   : > { %v6039_v26 = vsel %vm5772_vm0, %v6038_v18, %v5696_v6  ;;  %v6602_v24 = vrot.slane %v2256_v59, 9  ;;  %v5587_v45 = vunpack.c.l.b16 %v6936_v29  ;;  %v5588_v25 = vunpack.c.l.b16 %v6937_v34 }
 0x21b   : > { %v8509_v1 = vsel %vm5775_vm1, %v6040_v19, %v6039_v26  ;;  %v5589_v58 = vunpack.c.l.b16 %v6938_v56  ;;  %v5590_v32 = vunpack.c.l.b16 %v6939_v5  ;;  %v6603_v42 = vrot.slane %v2264_v50, 9  ;;  %v8514_v19 = vpop.f32.mrb[40].mxu1  ;;  %v9809_v56 = vld [vmem:[#allocation14_spill] sm:$0xff] }
 0x21c   : > { %v6604_v10 = vrot.slane %v2263_v14, 9  ;;  %v3614_v31 = vmax.f32 %v8404_v15, %v6601_v8  ;;  %v5848_v57 = vrot.slane %v5587_v45, 5  ;;  %v5850_v43 = vrot.slane %v5588_v25, 4  ;;  %9808 = vst [vmem:[#allocation37_spill] sm:$0xff] %v8514_v19 }
 0x21d   : > { %v5852_v7 = vrot.slane %v5589_v58, 3  ;;  %v3615_v40 = vmax.f32 %v2256_v59, %v6602_v24  ;;  %v5854_v6 = vrot.slane %v5590_v32, 2  ;;  %v3616_v18 = vmax.f32 %v2264_v50, %v6603_v42 }
 0x21e   : > { %v3617_v9 = vmax.f32 %v2263_v14, %v6604_v10  ;;  %v3839_v63 = vmax.f32 %v3614_v31, %v2256_v59  ;;  %v5849_v29 = vsel %vm5778_vm2, %v5848_v57, %v8476_v35  ;;  %v6055_v15 = vsel %vm5775_vm1, %v8449_v12, %v8453_v16  ;;  %v8530_v57 = vpop.f32.mrb[41].mxu0  ;;  %v6241_v16 = vld [vmem:[%s8033_s19 + $0x14] sm:$0xf] }
 0x21f   : > { %v3840_v34 = vmax.f32 %v3615_v40, %v2264_v50  ;;  %v9810_v26 = vmax.f32 %v9770_v11, %v9785_v36  ;;  %v5851_v59 = vsel %vm5781_vm3, %v5850_v43, %v5849_v29  ;;  %v3841_v31 = vmax.f32 %v3616_v18, %v2263_v14  ;;  %9811 = vst [vmem:[#allocation9_spill] sm:$0xff] %v8530_v57 }
 0x220   : > { %v3842_v8 = vmax.f32 %v3617_v9, %v2265_v4  ;;  %v4098_v24 = vmul.f32 %v7819_v54, %v3839_v63  ;;  %v5853_v45 = vsel %vm5784_vm4, %v5852_v7, %v5851_v59  ;;  %v6473_v42 = vrot.slane %v8419_v21, 9 }
 0x221   : > { %v1407_v5 = vmax.f32 %v9810_v26, %v9809_v56  ;;  %v4099_v35 = vmul.f32 %v7775_v38, %v3840_v34  ;;  %v5855_v12 = vsel %vm5787_vm5, %v5854_v6, %v5853_v45  ;;  %v4100_v11 = vmul.f32 %v7822_v55, %v3841_v31  ;;  %v8546_v45 = vpop.f32.mrb[41].mxu1 }
 0x222   : > { %v4101_v36 = vmul.f32 %v7802_v48, %v3842_v8  ;;  %v4357_v43 = vadd.f32 %v7831_v60, %v4098_v24  ;;  %v6173_v63 = vpack.c.b16 %v5855_v12, %v5855_v12  ;;  %v3486_v24 = vmax.f32 %v8419_v21, %v6473_v42  ;;  %9812 = vst [vmem:[#allocation40_spill] sm:$0xff] %v8546_v45 }
 0x223   : > { %v1671_v40 = vcombine.high %v1407_v5, %v1407_v5  ;;  %v1678_v50 = vrot.slane %v1407_v5, %v7760_v23  ;;  %v4358_v14 = vadd.f32 %v7778_v39, %v4099_v35  ;;  %v4359_v25 = vadd.f32 %v7834_v61, %v4100_v11 }
 0x224   : > { %v4360_v58 = vadd.f32 %v7806_v49, %v4101_v36  ;;  %v4582_v32 = vmax.f32 %v4357_v43, 0.0  ;;  %v6242_v10 = vsel %vm8050_vm8, %v6173_v63, %v6241_v16 }
 0x225   : > { %v1685_v4 = vrot.slane %v1671_v40, %v7760_v23  ;;  %v1686_v7 = vcombine.high %v1678_v50, %v1678_v50  ;;  %v4583_v6 = vmax.f32 %v4358_v14, 0.0  ;;  %v6474_v9 = vrot.slane %v1678_v50, 9  ;;  %6243 = vst [vmem:[%s8033_s19 + $0x14] sm:$0xf] %v6242_v10 }
 0x226   : > { %v4584_v29 = vmax.f32 %v4359_v25, 0.0  ;;  %v4585_v34 = vmax.f32 %v4360_v58, 0.0  ;;  %v7056_v26 = vpack.c.bf16 %v4582_v32, %v4582_v32  ;;  %v3711_v32 = vmax.f32 %v3486_v24, %v1678_v50 }
 0x227   : > { %v1687_v18 = vcombine.high %v1685_v4, %v1685_v4  ;;  %v6475_v5 = vrot.slane %v1686_v7, 9  ;;  %v7057_v59 = vpack.c.bf16 %v4583_v6, %v4583_v6  ;;  %v6476_v31 = vrot.slane %v1685_v4, 9 }
 0x228   : > { %v7058_v35 = vpack.c.bf16 %v4584_v29, %v4584_v29  ;;  %v7059_v40 = vpack.c.bf16 %v4585_v34, %v4585_v34  ;;  %v5707_v12 = vunpack.c.l.b16 %v7056_v26  ;;  %v3487_v11 = vmax.f32 %v1678_v50, %v6474_v9 }
 0x229   : > { %v6477_v8 = vrot.slane %v1687_v18, 9  ;;  %v5708_v16 = vunpack.c.l.b16 %v7057_v59  ;;  %v3488_v36 = vmax.f32 %v1686_v7, %v6475_v5  ;;  %v3489_v43 = vmax.f32 %v1685_v4, %v6476_v31 }
 0x22a   : > { %v5709_v14 = vunpack.c.l.b16 %v7058_v35  ;;  %v5710_v25 = vunpack.c.l.b16 %v7059_v40  ;;  %v6056_v58 = vrot.slane %v5707_v12, 5  ;;  %v3712_v6 = vmax.f32 %v3487_v11, %v1686_v7 }
 0x22b   : > { %v3490_v63 = vmax.f32 %v1687_v18, %v6477_v8  ;;  %v6058_v10 = vrot.slane %v5708_v16, 4  ;;  %v3713_v57 = vmax.f32 %v3488_v36, %v1685_v4  ;;  %v3714_v19 = vmax.f32 %v3489_v43, %v1687_v18  ;;  %v9813_v18 = vld [vmem:[#allocation15_spill] sm:$0xff] }
 0x22c   : > { %v6057_v21 = vsel %vm5778_vm2, %v6056_v58, %v6055_v15  ;;  %v6060_v42 = vrot.slane %v5709_v14, 3  ;;  %v6062_v29 = vrot.slane %v5710_v25, 2  ;;  %v3970_v26 = vmul.f32 %v7819_v54, %v3711_v32  ;;  %v6273_v8 = vld [vmem:[%s8033_s19 + $0x54] sm:$0xf] }
 0x22d   : > { %v3715_v34 = vmax.f32 %v3490_v63, %v8381_v37  ;;  %v6059_v9 = vsel %vm5781_vm3, %v6058_v10, %v6057_v21  ;;  %v3971_v5 = vmul.f32 %v7775_v38, %v3712_v6  ;;  %v3972_v59 = vmul.f32 %v7822_v55, %v3713_v57 }
 0x22e   : > { %v6061_v50 = vsel %vm5784_vm4, %v6060_v42, %v6059_v9  ;;  %v3973_v7 = vmul.f32 %v7802_v48, %v3714_v19  ;;  %v9814_v15 = vmax.f32 %v9774_v53, %v9786_v17  ;;  %v4229_v24 = vadd.f32 %v7831_v60, %v3970_v26  ;;  %v8574_v9 = vpop.f32.mrb[42].mxu0 }
 0x22f   : > { %v3974_v4 = vmul.f32 %v7845_v2, %v3715_v34  ;;  %v6063_v37 = vsel %vm5787_vm5, %v6062_v29, %v6061_v50  ;;  %v4230_v35 = vadd.f32 %v7778_v39, %v3971_v5  ;;  %v4231_v57 = vadd.f32 %v7834_v61, %v3972_v59  ;;  %9815 = vst [vmem:[#allocation42_spill] sm:$0xff] %v8574_v9 }
 0x230   : > { %v1439_v31 = vmax.f32 %v9814_v15, %v9813_v18  ;;  %v6189_v40 = vpack.c.b16 %v6063_v37, %v6063_v37  ;;  %v4232_v19 = vadd.f32 %v7806_v49, %v3973_v7  ;;  %v4454_v16 = vmax.f32 %v4229_v24, 0.0 }
 0x231   : > { %v4233_v12 = vadd.f32 %v7848_v3, %v3974_v4  ;;  %v4455_v36 = vmax.f32 %v4230_v35, 0.0  ;;  %v4456_v53 = vmax.f32 %v4231_v57, 0.0  ;;  %v6593_v34 = vrot.slane %v8455_v27, 9 }
 0x232   : > { %v2215_v11 = vcombine.high %v1439_v31, %v1439_v31  ;;  %v2222_v17 = vrot.slane %v1439_v31, %v7760_v23  ;;  %v6274_v43 = vsel %vm8050_vm8, %v6189_v40, %v6273_v8  ;;  %v4457_v63 = vmax.f32 %v4232_v19, 0.0 }
 0x233   : > { %v4458_v14 = vmax.f32 %v4233_v12, 0.0  ;;  %6275 = vst [vmem:[%s8033_s19 + $0x54] sm:$0xf] %v6274_v43  ;;  %v6928_v58 = vpack.c.bf16 %v4454_v16, %v4454_v16  ;;  %v6929_v32 = vpack.c.bf16 %v4455_v36, %v4455_v36  ;;  %v6930_v10 = vpack.c.bf16 %v4456_v53, %v4456_v53  ;;  %v8579_v43 = vpop.f32.mrb[42].mxu1 }
 0x234   : > { %v2229_v25 = vrot.slane %v2215_v11, %v7760_v23  ;;  %v2230_v6 = vcombine.high %v2222_v17, %v2222_v17  ;;  %v6931_v21 = vpack.c.bf16 %v4457_v63, %v4457_v63  ;;  %v6594_v50 = vrot.slane %v2222_v17, 9  ;;  %9816 = vst [vmem:[#allocation14_spill] sm:$0xff] %v8579_v43 }
 0x235   : > { %v6932_v42 = vpack.c.bf16 %v4458_v14, %v4458_v14  ;;  %v5579_v26 = vunpack.c.l.b16 %v6928_v58  ;;  %v5580_v5 = vunpack.c.l.b16 %v6929_v32  ;;  %v5581_v59 = vunpack.c.l.b16 %v6930_v10  ;;  %v9817_v32 = vld [vmem:[#allocation11_spill] sm:$0xff] }
 0x236   : > { %v2231_v29 = vcombine.high %v2229_v25, %v2229_v25  ;;  %v5582_v7 = vunpack.c.l.b16 %v6931_v21  ;;  %v6595_v15 = vrot.slane %v2230_v6, 9  ;;  %v6596_v31 = vrot.slane %v2229_v25, 9 }
 0x237   : > { %v5583_v4 = vunpack.c.l.b16 %v6932_v42  ;;  %v5834_v37 = vrot.slane %v5579_v26, 5  ;;  %v5836_v8 = vrot.slane %v5580_v5, 4  ;;  %v5838_v24 = vrot.slane %v5581_v59, 3  ;;  %v9818_v59 = vld [vmem:[#allocation38_spill] sm:$0xff] }
 0x238   : > { %v6597_v35 = vrot.slane %v2231_v29, 9  ;;  %v5840_v57 = vrot.slane %v5582_v7, 2  ;;  %v3606_v19 = vmax.f32 %v8455_v27, %v6593_v34  ;;  %v3607_v12 = vmax.f32 %v2222_v17, %v6594_v50 }
 0x239   : > { %v5842_v40 = vrot.slane %v5583_v4, 1  ;;  %v5835_v11 = vsel %vm5778_vm2, %v5834_v37, %v8464_v13  ;;  %v3608_v16 = vmax.f32 %v2230_v6, %v6595_v15  ;;  %v3609_v36 = vmax.f32 %v2229_v25, %v6596_v31  ;;  %v9819_v4 = vld [vmem:[#allocation16_spill] sm:$0xff]  ;;  %v9820_v15 = vld [vmem:[#allocation39_spill] sm:$0xff] }
 0x23a   : > { %v3610_v53 = vmax.f32 %v2231_v29, %v6597_v35  ;;  %v5837_v63 = vsel %vm5781_vm3, %v5836_v8, %v5835_v11  ;;  %v3831_v14 = vmax.f32 %v3606_v19, %v2222_v17  ;;  %v3832_v58 = vmax.f32 %v3607_v12, %v2230_v6  ;;  %v9822_v19 = vld [vmem:[#allocation17_spill] sm:$0xff] }
 0x23b   : > { %v1352_v10 = vmax.f32 %v9787_v44, %v9817_v32  ;;  %v5839_v21 = vsel %vm5784_vm4, %v5838_v24, %v5837_v63  ;;  %v3833_v42 = vmax.f32 %v3608_v16, %v2229_v25  ;;  %v3834_v27 = vmax.f32 %v3609_v36, %v2231_v29  ;;  %v9821_v24 = vld [vmem:[#allocation12_spill] sm:$0xff]  ;;  %v9823_v12 = vld [vmem:[#allocation41_spill] sm:$0xff] }
 0x23c   : > { %v3835_v34 = vmax.f32 %v3610_v53, %v8397_v20  ;;  %v5841_v13 = vsel %vm5787_vm5, %v5840_v57, %v5839_v21  ;;  %v4090_v26 = vmul.f32 %v7819_v54, %v3831_v14  ;;  %v4091_v5 = vmul.f32 %v7775_v38, %v3832_v58  ;;  %v9824_v16 = vld [vmem:[#allocation13_spill] sm:$0xff]  ;;  %v9825_v58 = vld [vmem:[#allocation18_spill] sm:$0xff] }
 0x23d   : > { %v1384_v17 = vmax.f32 %v9818_v59, %v8242_v33  ;;  %v5843_v6 = vsel %vm5790_vm9, %v5842_v40, %v5841_v13  ;;  %v4092_v44 = vmul.f32 %v7822_v55, %v3833_v42  ;;  %v4093_v50 = vmul.f32 %v7802_v48, %v3834_v27  ;;  %v9826_v27 = vld [vmem:[#allocation19_spill] sm:$0xff]  ;;  %v9827_v13 = vld [vmem:[#allocation20_spill] sm:$0xff] }
 0x23e   : > { %v4094_v25 = vmul.f32 %v7845_v2, %v3835_v34  ;;  %v6172_v29 = vpack.c.b16 %v5843_v6, %v5843_v6  ;;  %v4349_v20 = vadd.f32 %v7831_v60, %v4090_v26  ;;  %v4350_v7 = vadd.f32 %v7778_v39, %v4091_v5 }
 0x23f   : > { %v1350_v31 = vmax.f32 %v9820_v15, %v9819_v4  ;;  %v4351_v37 = vadd.f32 %v7834_v61, %v4092_v44  ;;  %v4352_v33 = vadd.f32 %v7806_v49, %v4093_v50  ;;  %v1412_v26 = vmax.f32 %v1352_v10, %v9827_v13  ;;  %v9828_v44 = vld [vmem:[#allocation21_spill] sm:$0xff] }
 0x240   : > { %v4353_v8 = vadd.f32 %v7848_v3, %v4094_v25  ;;  %6240 = vst.msk [vmem:[%s8033_s19 + $0x10] sm:$0xf] %vm6228_vm6, %v6172_v29  ;;  %v4574_v57 = vmax.f32 %v4349_v20, 0.0  ;;  %v4575_v40 = vmax.f32 %v4350_v7, 0.0  ;;  %v1444_v50 = vmax.f32 %v1384_v17, %v9828_v44 }
 0x241   : > { %v4576_v53 = vmax.f32 %v4351_v37, 0.0  ;;  %v4577_v63 = vmax.f32 %v4352_v33, 0.0  ;;  %v1756_v20 = vcombine.high %v1412_v26, %v1412_v26  ;;  %v8617_v7 = vrot.slane %v1412_v26, %v7760_v23 }
 0x242   : > { %v4578_v14 = vmax.f32 %v4353_v8, 0.0  ;;  %v7048_v21 = vpack.c.bf16 %v4574_v57, %v4574_v57  ;;  %v7049_v42 = vpack.c.bf16 %v4575_v40, %v4575_v40  ;;  %v2300_v33 = vcombine.high %v1444_v50, %v1444_v50 }
 0x243   : > { %v7050_v5 = vpack.c.bf16 %v4576_v53, %v4576_v53  ;;  %v7051_v59 = vpack.c.bf16 %v4577_v63, %v4577_v63  ;;  %v1770_v40 = vrot.slane %v1756_v20, %v7760_v23  ;;  %v1771_v10 = vcombine.high %v8617_v7, %v8617_v7 }
 0x244   : > { %v7052_v6 = vpack.c.bf16 %v4578_v14, %v4578_v14  ;;  %v5699_v25 = vunpack.c.l.b16 %v7048_v21  ;;  %v5700_v29 = vunpack.c.l.b16 %v7049_v42  ;;  %v6493_v14 = vrot.slane %v8617_v7, 9 }
 0x245   : > { %v5701_v4 = vunpack.c.l.b16 %v7050_v5  ;;  %v5702_v15 = vunpack.c.l.b16 %v7051_v59  ;;  %v8625_v42 = vcombine.high %v1770_v40, %v1770_v40  ;;  %v6494_v26 = vrot.slane %v1771_v10, 9  ;;  %v8627_v59 = vpop.f32.mrb[43].mxu0 }
 0x246   : > { %v5703_v37 = vunpack.c.l.b16 %v7052_v6  ;;  %v6042_v8 = vrot.slane %v5699_v25, 5  ;;  %v6044_v57 = vrot.slane %v5700_v29, 4  ;;  %v6495_v5 = vrot.slane %v1770_v40, 9  ;;  %9829 = vst [vmem:[#allocation15_spill] sm:$0xff] %v8627_v59 }
 0x247   : > { %v6046_v53 = vrot.slane %v5701_v4, 3  ;;  %v6048_v63 = vrot.slane %v5702_v15, 2  ;;  %v3506_v25 = vmax.f32 %v8617_v7, %v6493_v14  ;;  %v8632_v29 = vrot.slane %v1444_v50, %v7760_v23 }
 0x248   : > { %v6050_v17 = vrot.slane %v5703_v37, 1  ;;  %v6043_v21 = vsel %vm5778_vm2, %v6042_v8, %v8509_v1  ;;  %v2314_v20 = vrot.slane %v2300_v33, %v7760_v23  ;;  %v3507_v15 = vmax.f32 %v1771_v10, %v6494_v26  ;;  %v9830_v1 = vld [vmem:[#allocation22_spill] sm:$0xff] }
 0x249   : > { %v6045_v6 = vsel %vm5781_vm3, %v6044_v57, %v6043_v21  ;;  %v3508_v37 = vmax.f32 %v1770_v40, %v6495_v5  ;;  %v1410_v8 = vmax.f32 %v1350_v31, %v9830_v1  ;;  %v3731_v32 = vmax.f32 %v3506_v25, %v1771_v10 }
 0x24a   : > { %v6047_v4 = vsel %vm5784_vm4, %v6046_v53, %v6045_v6  ;;  %v2315_v57 = vcombine.high %v8632_v29, %v8632_v29  ;;  %v8640_v21 = vcombine.high %v2314_v20, %v2314_v20  ;;  %v3732_v14 = vmax.f32 %v3507_v15, %v1770_v40 }
 0x24b   : > { %v6049_v34 = vsel %vm5787_vm5, %v6048_v63, %v6047_v4  ;;  %v3733_v33 = vmax.f32 %v3508_v37, %v8625_v42  ;;  %v6613_v53 = vrot.slane %v8632_v29, 9  ;;  %v3990_v5 = vmul.f32 %v7763_v28, %v3731_v32 }
 0x24c   : > { %v6051_v50 = vsel %vm5790_vm9, %v6050_v17, %v6049_v34  ;;  %v6614_v31 = vrot.slane %v2315_v57, 9  ;;  %v6615_v6 = vrot.slane %v2314_v20, 9  ;;  %v3991_v63 = vmul.f32 %v7811_v51, %v3732_v14 }
 0x24d   : > { %v6188_v26 = vpack.c.b16 %v6051_v50, %v6051_v50  ;;  %v3992_v10 = vmul.f32 %v7794_v46, %v3733_v33  ;;  %v3626_v25 = vmax.f32 %v8632_v29, %v6613_v53  ;;  %v1722_v4 = vcombine.high %v1410_v8, %v1410_v8 }
 0x24e   : > { %v4249_v34 = vadd.f32 %v9791_v0, %v3990_v5  ;;  %v3627_v40 = vmax.f32 %v2315_v57, %v6614_v31  ;;  %v3628_v17 = vmax.f32 %v2314_v20, %v6615_v6  ;;  %v1729_v15 = vrot.slane %v1410_v8, %v7760_v23 }
 0x24f   : > { %6272 = vst.msk [vmem:[%s8033_s19 + $0x50] sm:$0xf] %vm6228_vm6, %v6188_v26  ;;  %v4250_v37 = vadd.f32 %v7814_v52, %v3991_v63  ;;  %v4251_v32 = vadd.f32 %v7798_v47, %v3992_v10  ;;  %v3851_v50 = vmax.f32 %v3626_v25, %v2315_v57  ;;  %v1736_v14 = vrot.slane %v1722_v4, %v7760_v23  ;;  %v8662_v57 = vpop.f32.mrb[43].mxu1 }
 0x250   : > { %v4474_v36 = vmax.f32 %v4249_v34, 0.0  ;;  %v3852_v33 = vmax.f32 %v3627_v40, %v2314_v20  ;;  %v3853_v53 = vmax.f32 %v3628_v17, %v8640_v21  ;;  %v1737_v11 = vcombine.high %v1729_v15, %v1729_v15  ;;  %9831 = vst [vmem:[#allocation11_spill] sm:$0xff] %v8662_v57 }
 0x251   : > { %v4475_v35 = vmax.f32 %v4250_v37, 0.0  ;;  %v4476_v26 = vmax.f32 %v4251_v32, 0.0  ;;  %v4110_v5 = vmul.f32 %v7763_v28, %v3851_v50  ;;  %v8658_v31 = vcombine.high %v1736_v14, %v1736_v14 }
 0x252   : > { %v6948_v6 = vpack.c.bf16 %v4474_v36, %v4474_v36  ;;  %v4111_v8 = vmul.f32 %v7811_v51, %v3852_v33  ;;  %v4112_v63 = vmul.f32 %v7794_v46, %v3853_v53  ;;  %v6485_v10 = vrot.slane %v1729_v15, 9 }
 0x253   : > { %v6949_v25 = vpack.c.bf16 %v4475_v35, %v4475_v35  ;;  %v6950_v4 = vpack.c.bf16 %v4476_v26, %v4476_v26  ;;  %v4369_v20 = vadd.f32 %v9791_v0, %v4110_v5  ;;  %v6486_v34 = vrot.slane %v1737_v11, 9 }
 0x254   : > { %v5599_v40 = vunpack.c.l.b16 %v6948_v6  ;;  %v4370_v17 = vadd.f32 %v7814_v52, %v4111_v8  ;;  %v4371_v37 = vadd.f32 %v7798_v47, %v4112_v63  ;;  %v6487_v32 = vrot.slane %v1736_v14, 9 }
 0x255   : > { %v5600_v50 = vunpack.c.l.b16 %v6949_v25  ;;  %v5601_v36 = vunpack.c.l.b16 %v6950_v4  ;;  %v4594_v59 = vmax.f32 %v4369_v20, 0.0  ;;  %v3498_v33 = vmax.f32 %v1729_v15, %v6485_v10  ;;  %v9832_v10 = vld [vmem:[#allocation25_spill] sm:$0xff] }
 0x256   : > { %v4595_v43 = vmax.f32 %v4370_v17, 0.0  ;;  %v4596_v53 = vmax.f32 %v4371_v37, 0.0  ;;  %v3499_v9 = vmax.f32 %v1737_v11, %v6486_v34  ;;  %v3500_v45 = vmax.f32 %v1736_v14, %v6487_v32 }
 0x257   : > { %v5870_v57 = vrot.slane %v5600_v50, 7  ;;  %v8667_v35 = vrot.slane %v5601_v36, 6  ;;  %v7068_v26 = vpack.c.bf16 %v4594_v59, %v4594_v59  ;;  %v3723_v5 = vmax.f32 %v3498_v33, %v1737_v11 }
 0x258   : > { %v7069_v30 = vpack.c.bf16 %v4595_v43, %v4595_v43  ;;  %v7070_v6 = vpack.c.bf16 %v4596_v53, %v4596_v53  ;;  %v3724_v1 = vmax.f32 %v3499_v9, %v1736_v14  ;;  %v3725_v8 = vmax.f32 %v3500_v45, %v8658_v31  ;;  %v9834_v14 = vld [vmem:[#allocation26_spill] sm:$0xff] }
 0x259   : > { %v8671_v63 = vsel %vm5772_vm0, %v5870_v57, %v5599_v40  ;;  %v5719_v25 = vunpack.c.l.b16 %v7068_v26  ;;  %v3982_v15 = vmul.f32 %v7763_v28, %v3723_v5  ;;  %v9833_v4 = vmax.f32 %v9793_v41, %v9821_v24 }
 0x25a   : > { %v5720_v34 = vunpack.c.l.b16 %v7069_v30  ;;  %v5721_v17 = vunpack.c.l.b16 %v7070_v6  ;;  %v3983_v11 = vmul.f32 %v7811_v51, %v3724_v1  ;;  %v3984_v43 = vmul.f32 %v7794_v46, %v3725_v8 }
 0x25b   : > { %v1442_v20 = vmax.f32 %v9833_v4, %v9832_v10  ;;  %v4241_v9 = vadd.f32 %v9791_v0, %v3982_v15  ;;  %v9835_v57 = vmax.f32 %v9823_v12, %v9822_v19 }
 0x25c   : > { %v6078_v37 = vrot.slane %v5720_v34, 7  ;;  %v8686_v32 = vrot.slane %v5721_v17, 6  ;;  %v4242_v41 = vadd.f32 %v7814_v52, %v3983_v11  ;;  %v4243_v30 = vadd.f32 %v7798_v47, %v3984_v43 }
 0x25d   : > { %v2266_v45 = vcombine.high %v1442_v20, %v1442_v20  ;;  %v2273_v59 = vrot.slane %v1442_v20, %v7760_v23  ;;  %v1413_v40 = vmax.f32 %v9835_v57, %v9834_v14  ;;  %v4466_v24 = vmax.f32 %v4241_v9, 0.0 }
 0x25e   : > { %v8692_v33 = vsel %vm5772_vm0, %v6078_v37, %v5719_v25  ;;  %v4467_v53 = vmax.f32 %v4242_v41, 0.0  ;;  %v4468_v26 = vmax.f32 %v4243_v30, 0.0  ;;  %v6496_v14 = vrot.slane %v8625_v42, 9 }
 0x25f   : > { %v2280_v1 = vrot.slane %v2266_v45, %v7760_v23  ;;  %v2281_v50 = vcombine.high %v2273_v59, %v2273_v59  ;;  %v6605_v36 = vrot.slane %v2273_v59, 9  ;;  %v1773_v5 = vcombine.high %v1413_v40, %v1413_v40 }
 0x260   : > { %v6940_v19 = vpack.c.bf16 %v4466_v24, %v4466_v24  ;;  %v6941_v15 = vpack.c.bf16 %v4467_v53, %v4467_v53  ;;  %v6942_v4 = vpack.c.bf16 %v4468_v26, %v4468_v26  ;;  %v1780_v34 = vrot.slane %v1413_v40, %v7760_v23 }
 0x261   : > { %v8694_v12 = vcombine.high %v2280_v1, %v2280_v1  ;;  %v6606_v6 = vrot.slane %v2281_v50, 9  ;;  %v6607_v8 = vrot.slane %v2280_v1, 9  ;;  %v3618_v20 = vmax.f32 %v2273_v59, %v6605_v36 }
 0x262   : > { %v5591_v17 = vunpack.c.l.b16 %v6940_v19  ;;  %v1787_v9 = vrot.slane %v1773_v5, %v7760_v23  ;;  %v5592_v25 = vunpack.c.l.b16 %v6941_v15  ;;  %v5593_v45 = vunpack.c.l.b16 %v6942_v4  ;;  %v8706_v4 = vpop.f32.mrb[44].mxu0 }
 0x263   : > { %v3619_v11 = vmax.f32 %v2281_v50, %v6606_v6  ;;  %v3620_v43 = vmax.f32 %v2280_v1, %v6607_v8  ;;  %v3843_v57 = vmax.f32 %v3618_v20, %v2281_v50  ;;  %v1788_v37 = vcombine.high %v1780_v34, %v1780_v34 }
 0x264   : > { %v1789_v24 = vcombine.high %v1787_v9, %v1787_v9  ;;  %v5856_v53 = vrot.slane %v5592_v25, 7  ;;  %v5858_v26 = vrot.slane %v5593_v45, 6  ;;  %v6497_v40 = vrot.slane %v1780_v34, 9 }
 0x265   : > { %v3844_v41 = vmax.f32 %v3619_v11, %v2280_v1  ;;  %v3845_v30 = vmax.f32 %v3620_v43, %v8694_v12  ;;  %v4102_v59 = vmul.f32 %v7763_v28, %v3843_v57  ;;  %v6498_v5 = vrot.slane %v1788_v37, 9 }
 0x266   : > { %v6499_v6 = vrot.slane %v1787_v9, 9  ;;  %v5857_v50 = vsel %vm5772_vm0, %v5856_v53, %v5591_v17  ;;  %v3509_v8 = vmax.f32 %v8625_v42, %v6496_v14  ;;  %v3510_v15 = vmax.f32 %v1780_v34, %v6497_v40  ;;  %v8716_v14 = vpop.f32.mrb[44].mxu1 }
 0x267   : > { %v4103_v36 = vmul.f32 %v7811_v51, %v3844_v41  ;;  %v4104_v19 = vmul.f32 %v7794_v46, %v3845_v30  ;;  %v4361_v1 = vadd.f32 %v9791_v0, %v4102_v59  ;;  %v8709_v20 = vsel %vm5775_vm1, %v5858_v26, %v5857_v50  ;;  %9836 = vst [vmem:[#allocation38_spill] sm:$0xff] %v8716_v14  ;;  %v9838_v50 = vld [vmem:[#allocation27_spill] sm:$0xff] }
 0x268   : > { %v3511_v25 = vmax.f32 %v1788_v37, %v6498_v5  ;;  %v3512_v57 = vmax.f32 %v1787_v9, %v6499_v6  ;;  %v3734_v41 = vmax.f32 %v3509_v8, %v1780_v34  ;;  %v3735_v30 = vmax.f32 %v3510_v15, %v1788_v37  ;;  %v8720_v5 = vpop.f32.mrb[45].mxu0 }
 0x269   : > { %v4362_v11 = vadd.f32 %v7814_v52, %v4103_v36  ;;  %v4363_v43 = vadd.f32 %v7798_v47, %v4104_v19  ;;  %v4586_v45 = vmax.f32 %v4361_v1, 0.0  ;;  %v5873_v42 = vsel %vm5775_vm1, %v8667_v35, %v8671_v63  ;;  %9837 = vst [vmem:[#allocation16_spill] sm:$0xff] %v8720_v5 }
 0x26a   : > { %v3736_v59 = vmax.f32 %v3511_v25, %v1787_v9  ;;  %v3737_v40 = vmax.f32 %v3512_v57, %v1789_v24  ;;  %v3993_v36 = vmul.f32 %v7819_v54, %v3734_v41  ;;  %v3994_v19 = vmul.f32 %v7775_v38, %v3735_v30 }
 0x26b   : > { %v4587_v17 = vmax.f32 %v4362_v11, 0.0  ;;  %v4588_v53 = vmax.f32 %v4363_v43, 0.0  ;;  %v7060_v26 = vpack.c.bf16 %v4586_v45, %v4586_v45  ;;  %v9839_v9 = vmax.f32 %v9798_v22, %v9824_v16  ;;  %v8731_v45 = vpop.f32.mrb[45].mxu1  ;;  %v8735_v16 = vpop.f32.mrb[46].mxu0 }
 0x26c   : > { %v3995_v37 = vmul.f32 %v7822_v55, %v3736_v59  ;;  %v3996_v63 = vmul.f32 %v7802_v48, %v3737_v40  ;;  %v4252_v24 = vadd.f32 %v7831_v60, %v3993_v36  ;;  %v4253_v8 = vadd.f32 %v7778_v39, %v3994_v19  ;;  %9840 = vst [vmem:[#allocation39_spill] sm:$0xff] %v8731_v45  ;;  %v8738_v40 = vpop.f32.mrb[46].mxu1 }
 0x26d   : > { %v7061_v6 = vpack.c.bf16 %v4587_v17, %v4587_v17  ;;  %v7062_v34 = vpack.c.bf16 %v4588_v53, %v4588_v53  ;;  %v1445_v1 = vmax.f32 %v9839_v9, %v9838_v50  ;;  %v5711_v35 = vunpack.c.l.b16 %v7060_v26  ;;  %9841 = vst [vmem:[#allocation12_spill] sm:$0xff] %v8735_v16  ;;  %9842 = vst [vmem:[#allocation17_spill] sm:$0xff] %v8738_v40  ;;  %v8742_v9 = vpop.f32.mrb[47].mxu1 }
 0x26e   : > { %v4254_v43 = vadd.f32 %v7834_v61, %v3995_v37  ;;  %v4255_v57 = vadd.f32 %v7806_v49, %v3996_v63  ;;  %v4477_v41 = vmax.f32 %v4252_v24, 0.0  ;;  %v4478_v30 = vmax.f32 %v4253_v8, 0.0  ;;  %v8740_v37 = vpop.f32.mrb[47].mxu0  ;;  %9844 = vst [vmem:[#allocation13_spill] sm:$0xff] %v8742_v9 }
 0x26f   : > { %v5712_v15 = vunpack.c.l.b16 %v7061_v6  ;;  %v5713_v11 = vunpack.c.l.b16 %v7062_v34  ;;  %v2317_v25 = vcombine.high %v1445_v1, %v1445_v1  ;;  %v2324_v22 = vrot.slane %v1445_v1, %v7760_v23  ;;  %9843 = vst [vmem:[#allocation41_spill] sm:$0xff] %v8740_v37 }
 0x270   : > { %v4479_v59 = vmax.f32 %v4254_v43, 0.0  ;;  %v4480_v36 = vmax.f32 %v4255_v57, 0.0  ;;  %v6951_v19 = vpack.c.bf16 %v4477_v41, %v4477_v41  ;;  %v6952_v6 = vpack.c.bf16 %v4478_v30, %v4478_v30 }
 0x271   : > { %v6064_v17 = vrot.slane %v5712_v15, 7  ;;  %v6066_v53 = vrot.slane %v5713_v11, 6  ;;  %v2331_v26 = vrot.slane %v2317_v25, %v7760_v23  ;;  %v2332_v34 = vcombine.high %v2324_v22, %v2324_v22 }
 0x272   : > { %v6953_v1 = vpack.c.bf16 %v4479_v59, %v4479_v59  ;;  %v6616_v8 = vrot.slane %v8640_v21, 9  ;;  %v6954_v11 = vpack.c.bf16 %v4480_v36, %v4480_v36  ;;  %v5602_v43 = vunpack.c.l.b16 %v6951_v19 }
 0x273   : > { %v6065_v63 = vsel %vm5772_vm0, %v6064_v17, %v5711_v35  ;;  %v2333_v24 = vcombine.high %v2331_v26, %v2331_v26  ;;  %v5603_v25 = vunpack.c.l.b16 %v6952_v6  ;;  %v6617_v41 = vrot.slane %v2324_v22, 9  ;;  %v8754_v6 = vpop.f32.mrb[48].mxu0 }
 0x274   : > { %v8747_v15 = vsel %vm5775_vm1, %v6066_v53, %v6065_v63  ;;  %v5604_v57 = vunpack.c.l.b16 %v6953_v1  ;;  %v6618_v30 = vrot.slane %v2332_v34, 9  ;;  %v6619_v40 = vrot.slane %v2331_v26, 9  ;;  %9845 = vst [vmem:[#allocation18_spill] sm:$0xff] %v8754_v6  ;;  %v8756_v63 = vpop.f32.mrb[48].mxu1 }
 0x275   : > { %v5605_v16 = vunpack.c.l.b16 %v6954_v11  ;;  %v5874_v37 = vrot.slane %v5602_v43, 5  ;;  %v5876_v45 = vrot.slane %v5603_v25, 4  ;;  %v3629_v9 = vmax.f32 %v8640_v21, %v6616_v8  ;;  %9846 = vst [vmem:[#allocation19_spill] sm:$0xff] %v8756_v63  ;;  %v6245_v43 = vld [vmem:[%s8033_s19 + $0x1c] sm:$0xf] }
 0x276   : > { %v5878_v35 = vrot.slane %v5604_v57, 3  ;;  %v3630_v17 = vmax.f32 %v2324_v22, %v6617_v41  ;;  %v3631_v59 = vmax.f32 %v2332_v34, %v6618_v30  ;;  %v3632_v5 = vmax.f32 %v2331_v26, %v6619_v40 }
 0x277   : > { %v5875_v14 = vsel %vm5778_vm2, %v5874_v37, %v5873_v42  ;;  %v5880_v53 = vrot.slane %v5605_v16, 2  ;;  %v3854_v36 = vmax.f32 %v3629_v9, %v2324_v22  ;;  %v6081_v19 = vsel %vm5775_vm1, %v8686_v32, %v8692_v33  ;;  %v9847_v37 = vld [vmem:[#allocation28_spill] sm:$0xff]  ;;  %v8766_v33 = vpop.f32.mrb[49].mxu0 }
 0x278   : > { %v5877_v1 = vsel %vm5781_vm3, %v5876_v45, %v5875_v14  ;;  %v3855_v21 = vmax.f32 %v3630_v17, %v2332_v34  ;;  %v3856_v8 = vmax.f32 %v3631_v59, %v2331_v26  ;;  %v3857_v11 = vmax.f32 %v3632_v5, %v2333_v24  ;;  %9849 = vst [vmem:[#allocation20_spill] sm:$0xff] %v8766_v33 }
 0x279   : > { %v5879_v40 = vsel %vm5784_vm4, %v5878_v35, %v5877_v1  ;;  %v4113_v42 = vmul.f32 %v7819_v54, %v3854_v36  ;;  %v9848_v22 = vmax.f32 %v9809_v56, %v9825_v58  ;;  %v6488_v32 = vrot.slane %v8658_v31, 9 }
 0x27a   : > { %v5881_v9 = vsel %vm5787_vm5, %v5880_v53, %v5879_v40  ;;  %v4114_v14 = vmul.f32 %v7775_v38, %v3855_v21  ;;  %v4115_v5 = vmul.f32 %v7822_v55, %v3856_v8  ;;  %v4116_v45 = vmul.f32 %v7802_v48, %v3857_v11 }
 0x27b   : > { %v1411_v16 = vmax.f32 %v9848_v22, %v9847_v37  ;;  %v6175_v26 = vpack.c.b16 %v5881_v9, %v5881_v9  ;;  %v4372_v34 = vadd.f32 %v7831_v60, %v4113_v42  ;;  %v3501_v41 = vmax.f32 %v8658_v31, %v6488_v32  ;;  %v8783_v32 = vpop.f32.mrb[49].mxu1 }
 0x27c   : > { %v4373_v58 = vadd.f32 %v7778_v39, %v4114_v14  ;;  %v4374_v25 = vadd.f32 %v7834_v61, %v4115_v5  ;;  %v4375_v57 = vadd.f32 %v7806_v49, %v4116_v45  ;;  %9850 = vst [vmem:[#allocation21_spill] sm:$0xff] %v8783_v32 }
 0x27d   : > { %v1739_v24 = vcombine.high %v1411_v16, %v1411_v16  ;;  %v1746_v56 = vrot.slane %v1411_v16, %v7760_v23  ;;  %v6246_v30 = vsel %vm8050_vm8, %v6175_v26, %v6245_v43  ;;  %v4597_v35 = vmax.f32 %v4372_v34, 0.0 }
 0x27e   : > { %6247 = vst [vmem:[%s8033_s19 + $0x1c] sm:$0xf] %v6246_v30  ;;  %v4598_v53 = vmax.f32 %v4373_v58, 0.0  ;;  %v4599_v36 = vmax.f32 %v4374_v25, 0.0  ;;  %v4600_v1 = vmax.f32 %v4375_v57, 0.0 }
 0x27f   : > { %v1753_v17 = vrot.slane %v1739_v24, %v7760_v23  ;;  %v1754_v59 = vcombine.high %v1746_v56, %v1746_v56  ;;  %v6489_v21 = vrot.slane %v1746_v56, 9  ;;  %v7071_v8 = vpack.c.bf16 %v4597_v35, %v4597_v35 }
 0x280   : > { %v7072_v22 = vpack.c.bf16 %v4598_v53, %v4598_v53  ;;  %v7073_v16 = vpack.c.bf16 %v4599_v36, %v4599_v36  ;;  %v7074_v9 = vpack.c.bf16 %v4600_v1, %v4600_v1  ;;  %v3726_v58 = vmax.f32 %v3501_v41, %v1746_v56 }
 0x281   : > { %v1755_v11 = vcombine.high %v1753_v17, %v1753_v17  ;;  %v6490_v40 = vrot.slane %v1754_v59, 9  ;;  %v6491_v42 = vrot.slane %v1753_v17, 9  ;;  %v3502_v31 = vmax.f32 %v1746_v56, %v6489_v21 }
 0x282   : > { %v5722_v43 = vunpack.c.l.b16 %v7071_v8  ;;  %v5723_v26 = vunpack.c.l.b16 %v7072_v22  ;;  %v5724_v34 = vunpack.c.l.b16 %v7073_v16  ;;  %v5725_v24 = vunpack.c.l.b16 %v7074_v9 }
 0x283   : > { %v6492_v14 = vrot.slane %v1755_v11, 9  ;;  %v3503_v5 = vmax.f32 %v1754_v59, %v6490_v40  ;;  %v3504_v45 = vmax.f32 %v1753_v17, %v6491_v42  ;;  %v3727_v30 = vmax.f32 %v3502_v31, %v1754_v59 }
 0x284   : > { %v6082_v25 = vrot.slane %v5722_v43, 5  ;;  %v6084_v33 = vrot.slane %v5723_v26, 4  ;;  %v6086_v63 = vrot.slane %v5724_v34, 3  ;;  %v6088_v53 = vrot.slane %v5725_v24, 2 }
 0x285   : > { %v3505_v57 = vmax.f32 %v1755_v11, %v6492_v14  ;;  %v3728_v35 = vmax.f32 %v3503_v5, %v1753_v17  ;;  %v3729_v36 = vmax.f32 %v3504_v45, %v1755_v11  ;;  %v3985_v8 = vmul.f32 %v7819_v54, %v3726_v58  ;;  %v9851_v17 = vld [vmem:[#allocation29_spill] sm:$0xff] }
 0x286   : > { %v6083_v1 = vsel %vm5778_vm2, %v6082_v25, %v6081_v19  ;;  %v3986_v40 = vmul.f32 %v7775_v38, %v3727_v30  ;;  %v9852_v59 = vmax.f32 %v9813_v18, %v9826_v27 }
 0x287   : > { %v3730_v21 = vmax.f32 %v3505_v57, %v8617_v7  ;;  %v6085_v42 = vsel %vm5781_vm3, %v6084_v33, %v6083_v1  ;;  %v3987_v56 = vmul.f32 %v7822_v55, %v3728_v35  ;;  %v3988_v41 = vmul.f32 %v7802_v48, %v3729_v36  ;;  %v6277_v33 = vld [vmem:[%s8033_s19 + $0x5c] sm:$0xf] }
 0x288   : > { %v1443_v22 = vmax.f32 %v9852_v59, %v9851_v17  ;;  %v6087_v11 = vsel %vm5784_vm4, %v6086_v63, %v6085_v42  ;;  %v4244_v7 = vadd.f32 %v7831_v60, %v3985_v8  ;;  %v4245_v16 = vadd.f32 %v7778_v39, %v3986_v40 }
 0x289   : > { %v3989_v19 = vmul.f32 %v7845_v2, %v3730_v21  ;;  %v6089_v9 = vsel %vm5787_vm5, %v6088_v53, %v6087_v11  ;;  %v4246_v31 = vadd.f32 %v7834_v61, %v3987_v56  ;;  %v4247_v43 = vadd.f32 %v7806_v49, %v3988_v41  ;;  %v8810_v21 = vpop.f32.mrb[50].mxu0 }
 0x28a   : > { %v2283_v14 = vcombine.high %v1443_v22, %v1443_v22  ;;  %v6191_v5 = vpack.c.b16 %v6089_v9, %v6089_v9  ;;  %v4469_v27 = vmax.f32 %v4244_v7, 0.0  ;;  %v4470_v63 = vmax.f32 %v4245_v16, 0.0  ;;  %9853 = vst [vmem:[#allocation25_spill] sm:$0xff] %v8810_v21 }
 0x28b   : > { %v4248_v18 = vadd.f32 %v7848_v3, %v3989_v19  ;;  %v4471_v45 = vmax.f32 %v4246_v31, 0.0  ;;  %v4472_v26 = vmax.f32 %v4247_v43, 0.0  ;;  %v2290_v34 = vrot.slane %v1443_v22, %v7760_v23 }
 0x28c   : > { %v2297_v24 = vrot.slane %v2283_v14, %v7760_v23  ;;  %v6278_v58 = vsel %vm8050_vm8, %v6191_v5, %v6277_v33  ;;  %v6943_v57 = vpack.c.bf16 %v4469_v27, %v4469_v27  ;;  %v6944_v30 = vpack.c.bf16 %v4470_v63, %v4470_v63 }
 0x28d   : > { %v4473_v25 = vmax.f32 %v4248_v18, 0.0  ;;  %6279 = vst [vmem:[%s8033_s19 + $0x5c] sm:$0xf] %v6278_v58  ;;  %v6945_v35 = vpack.c.bf16 %v4471_v45, %v4471_v45  ;;  %v6946_v53 = vpack.c.bf16 %v4472_v26, %v4472_v26  ;;  %v2298_v36 = vcombine.high %v2290_v34, %v2290_v34  ;;  %v8816_v45 = vpop.f32.mrb[50].mxu1 }
 0x28e   : > { %v2299_v1 = vcombine.high %v2297_v24, %v2297_v24  ;;  %v5594_v40 = vunpack.c.l.b16 %v6943_v57  ;;  %v5595_v42 = vunpack.c.l.b16 %v6944_v30  ;;  %v6608_v56 = vrot.slane %v8694_v12, 9  ;;  %9854 = vst [vmem:[#allocation27_spill] sm:$0xff] %v8816_v45 }
 0x28f   : > { %v6947_v8 = vpack.c.bf16 %v4473_v25, %v4473_v25  ;;  %v5596_v41 = vunpack.c.l.b16 %v6945_v35  ;;  %v5597_v59 = vunpack.c.l.b16 %v6946_v53  ;;  %v6609_v22 = vrot.slane %v2290_v34, 9 }
 0x290   : > { %v6610_v11 = vrot.slane %v2298_v36, 9  ;;  %v5860_v7 = vrot.slane %v5594_v40, 5  ;;  %v5862_v16 = vrot.slane %v5595_v42, 4  ;;  %v6611_v9 = vrot.slane %v2297_v24, 9 }
 0x291   : > { %v5598_v19 = vunpack.c.l.b16 %v6947_v8  ;;  %v5864_v33 = vrot.slane %v5596_v41, 3  ;;  %v5866_v31 = vrot.slane %v5597_v59, 2  ;;  %v6612_v43 = vrot.slane %v2299_v1, 9  ;;  %v9855_v8 = vld [vmem:[#allocation30_spill] sm:$0xff] }
 0x292   : > { %v3621_v14 = vmax.f32 %v8694_v12, %v6608_v56  ;;  %v5861_v5 = vsel %vm5778_vm2, %v5860_v7, %v8709_v20  ;;  %v3622_v27 = vmax.f32 %v2290_v34, %v6609_v22  ;;  %v3623_v63 = vmax.f32 %v2298_v36, %v6610_v11  ;;  %v9856_v22 = vld [vmem:[#allocation23_spill] sm:$0xff] }
 0x293   : > { %v5868_v18 = vrot.slane %v5598_v19, 1  ;;  %v5863_v26 = vsel %vm5781_vm3, %v5862_v16, %v5861_v5  ;;  %v3624_v58 = vmax.f32 %v2297_v24, %v6611_v9  ;;  %v3625_v25 = vmax.f32 %v2299_v1, %v6612_v43  ;;  %v9857_v7 = vld [vmem:[#allocation31_spill] sm:$0xff]  ;;  %v9858_v16 = vld [vmem:[#allocation22_spill] sm:$0xff]  ;;  %v9860_v5 = vld [vmem:[#allocation32_spill] sm:$0xff] }
 0x294   : > { %v3846_v57 = vmax.f32 %v3621_v14, %v2290_v34  ;;  %v5865_v30 = vsel %vm5784_vm4, %v5864_v33, %v5863_v26  ;;  %v3847_v35 = vmax.f32 %v3622_v27, %v2298_v36  ;;  %v3848_v53 = vmax.f32 %v3623_v63, %v2297_v24  ;;  %v9859_v33 = vld [vmem:[#allocation24_spill] sm:$0xff] }
 0x295   : > { %v1356_v12 = vmax.f32 %v9827_v13, %v9855_v8  ;;  %v5867_v40 = vsel %vm5787_vm5, %v5866_v31, %v5865_v30  ;;  %v3849_v20 = vmax.f32 %v3624_v58, %v2299_v1  ;;  %v3850_v42 = vmax.f32 %v3625_v25, %v8632_v29  ;;  %v9862_v58 = vld [vmem:[#allocation33_spill] sm:$0xff] }
 0x296   : > { %v4105_v56 = vmul.f32 %v7819_v54, %v3846_v57  ;;  %v5869_v41 = vsel %vm5790_vm9, %v5868_v18, %v5867_v40  ;;  %v4106_v59 = vmul.f32 %v7775_v38, %v3847_v35  ;;  %v4107_v34 = vmul.f32 %v7822_v55, %v3848_v53  ;;  %v9861_v18 = vld [vmem:[#allocation26_spill] sm:$0xff]  ;;  %v9864_v40 = vld [vmem:[#allocation35_spill] sm:$0xff] }
 0x297   : > { %v1388_v24 = vmax.f32 %v9828_v44, %v9856_v22  ;;  %v6174_v36 = vpack.c.b16 %v5869_v41, %v5869_v41  ;;  %v4108_v13 = vmul.f32 %v7802_v48, %v3849_v20  ;;  %v4109_v11 = vmul.f32 %v7845_v2, %v3850_v42  ;;  %v9863_v57 = vld [vmem:[#allocation34_spill] sm:$0xff]  ;;  %v9865_v41 = vld [vmem:[#allocation36_spill] sm:$0xff] }
 0x298   : > { %v4364_v1 = vadd.f32 %v7831_v60, %v4105_v56  ;;  %v4365_v29 = vadd.f32 %v7778_v39, %v4106_v59  ;;  %v4366_v19 = vadd.f32 %v7834_v61, %v4107_v34  ;;  %v1354_v9 = vmax.f32 %v9858_v16, %v9857_v7  ;;  %v9866_v34 = vld [vmem:[#allocation37_spill] sm:$0xff] }
 0x299   : > { %6244 = vst.msk [vmem:[%s8033_s19 + $0x18] sm:$0xf] %vm6228_vm6, %v6174_v36  ;;  %v4367_v44 = vadd.f32 %v7806_v49, %v4108_v13  ;;  %v4368_v43 = vadd.f32 %v7848_v3, %v4109_v11  ;;  %v1416_v59 = vmax.f32 %v1356_v12, %v9865_v41  ;;  %v1448_v22 = vmax.f32 %v1388_v24, %v9866_v34 }
 0x29a   : > { %v4589_v14 = vmax.f32 %v4364_v1, 0.0  ;;  %v4590_v63 = vmax.f32 %v4365_v29, 0.0  ;;  %v4591_v26 = vmax.f32 %v4366_v19, 0.0  ;;  %v9867_v1 = vld [vmem:[#allocation9_spill] sm:$0xff] }
 0x29b   : > { %v4592_v35 = vmax.f32 %v4367_v44, 0.0  ;;  %v4593_v53 = vmax.f32 %v4368_v43, 0.0  ;;  %v1414_v29 = vmax.f32 %v1354_v9, %v9867_v1  ;;  %v1824_v16 = vcombine.high %v1416_v59, %v1416_v59 }
 0x29c   : > { %v7063_v8 = vpack.c.bf16 %v4589_v14, %v4589_v14  ;;  %v7064_v42 = vpack.c.bf16 %v4590_v63, %v4590_v63  ;;  %v7065_v56 = vpack.c.bf16 %v4591_v26, %v4591_v26  ;;  %v8855_v44 = vrot.slane %v1416_v59, %v7760_v23 }
 0x29d   : > { %v7066_v36 = vpack.c.bf16 %v4592_v35, %v4592_v35  ;;  %v7067_v13 = vpack.c.bf16 %v4593_v53, %v4593_v53  ;;  %v2368_v63 = vcombine.high %v1448_v22, %v1448_v22  ;;  %v1838_v12 = vrot.slane %v1824_v16, %v7760_v23 }
 0x29e   : > { %v5714_v11 = vunpack.c.l.b16 %v7063_v8  ;;  %v5715_v19 = vunpack.c.l.b16 %v7064_v42  ;;  %v5716_v7 = vunpack.c.l.b16 %v7065_v56  ;;  %v1839_v24 = vcombine.high %v8855_v44, %v8855_v44 }
 0x29f   : > { %v5717_v43 = vunpack.c.l.b16 %v7066_v36  ;;  %v5718_v14 = vunpack.c.l.b16 %v7067_v13  ;;  %v6508_v8 = vrot.slane %v8855_v44, 9  ;;  %v8864_v56 = vcombine.high %v1838_v12, %v1838_v12  ;;  %v8866_v13 = vpop.f32.mrb[51].mxu0 }
 0x2a0   : > { %v6068_v20 = vrot.slane %v5714_v11, 5  ;;  %v6070_v26 = vrot.slane %v5715_v19, 4  ;;  %v6072_v30 = vrot.slane %v5716_v7, 3  ;;  %v6509_v59 = vrot.slane %v1839_v24, 9  ;;  %9868 = vst [vmem:[#allocation28_spill] sm:$0xff] %v8866_v13 }
 0x2a1   : > { %v6074_v35 = vrot.slane %v5717_v43, 2  ;;  %v6076_v53 = vrot.slane %v5718_v14, 1  ;;  %v6510_v36 = vrot.slane %v1838_v12, 9  ;;  %v3521_v19 = vmax.f32 %v8855_v44, %v6508_v8 }
 0x2a2   : > { %v6069_v9 = vsel %vm5778_vm2, %v6068_v20, %v8747_v15  ;;  %v8871_v7 = vrot.slane %v1448_v22, %v7760_v23  ;;  %v2382_v15 = vrot.slane %v2368_v63, %v7760_v23  ;;  %v3522_v16 = vmax.f32 %v1839_v24, %v6509_v59 }
 0x2a3   : > { %v6071_v42 = vsel %vm5781_vm3, %v6070_v26, %v6069_v9  ;;  %v3523_v43 = vmax.f32 %v1838_v12, %v6510_v36  ;;  %v1790_v14 = vcombine.high %v1414_v29, %v1414_v29  ;;  %v3746_v9 = vmax.f32 %v3521_v19, %v1839_v24 }
 0x2a4   : > { %v6073_v11 = vsel %vm5784_vm4, %v6072_v30, %v6071_v42  ;;  %v2383_v25 = vcombine.high %v8871_v7, %v8871_v7  ;;  %v8878_v30 = vcombine.high %v2382_v15, %v2382_v15  ;;  %v3747_v42 = vmax.f32 %v3522_v16, %v1838_v12 }
 0x2a5   : > { %v6075_v20 = vsel %vm5787_vm5, %v6074_v35, %v6073_v11  ;;  %v3748_v22 = vmax.f32 %v3523_v43, %v8864_v56  ;;  %v6628_v63 = vrot.slane %v8871_v7, 9  ;;  %v4005_v35 = vmul.f32 %v7763_v28, %v3746_v9 }
 0x2a6   : > { %v6077_v26 = vsel %vm5790_vm9, %v6076_v53, %v6075_v20  ;;  %v6629_v11 = vrot.slane %v2383_v25, 9  ;;  %v6630_v59 = vrot.slane %v2382_v15, 9  ;;  %v1797_v36 = vrot.slane %v1414_v29, %v7760_v23 }
 0x2a7   : > { %v6190_v8 = vpack.c.b16 %v6077_v26, %v6077_v26  ;;  %v4006_v24 = vmul.f32 %v7811_v51, %v3747_v42  ;;  %v4007_v53 = vmul.f32 %v7794_v46, %v3748_v22  ;;  %v3641_v19 = vmax.f32 %v8871_v7, %v6628_v63 }
 0x2a8   : > { %v1804_v12 = vrot.slane %v1790_v14, %v7760_v23  ;;  %v4264_v20 = vadd.f32 %v9791_v0, %v4005_v35  ;;  %v3642_v16 = vmax.f32 %v2383_v25, %v6629_v11  ;;  %v3643_v43 = vmax.f32 %v2382_v15, %v6630_v59  ;;  %v8897_v11 = vpop.f32.mrb[51].mxu1 }
 0x2a9   : > { %6276 = vst.msk [vmem:[%s8033_s19 + $0x58] sm:$0xf] %vm6228_vm6, %v6190_v8  ;;  %v1805_v26 = vcombine.high %v1797_v36, %v1797_v36  ;;  %v4265_v9 = vadd.f32 %v7814_v52, %v4006_v24  ;;  %v4266_v27 = vadd.f32 %v7798_v47, %v4007_v53  ;;  %v3866_v29 = vmax.f32 %v3641_v19, %v2383_v25 }
 0x2aa   : > { %v8893_v31 = vcombine.high %v1804_v12, %v1804_v12  ;;  %v4489_v8 = vmax.f32 %v4264_v20, 0.0  ;;  %v3867_v42 = vmax.f32 %v3642_v16, %v2382_v15  ;;  %v3868_v22 = vmax.f32 %v3643_v43, %v8878_v30  ;;  %9869 = vst [vmem:[#allocation29_spill] sm:$0xff] %v8897_v11 }
 0x2ab   : > { %v6500_v13 = vrot.slane %v1797_v36, 9  ;;  %v4490_v63 = vmax.f32 %v4265_v9, 0.0  ;;  %v4491_v45 = vmax.f32 %v4266_v27, 0.0  ;;  %v4125_v14 = vmul.f32 %v7763_v28, %v3866_v29 }
 0x2ac   : > { %v6501_v35 = vrot.slane %v1805_v26, 9  ;;  %v6963_v59 = vpack.c.bf16 %v4489_v8, %v4489_v8  ;;  %v4126_v24 = vmul.f32 %v7811_v51, %v3867_v42  ;;  %v4127_v53 = vmul.f32 %v7794_v46, %v3868_v22 }
 0x2ad   : > { %v6502_v25 = vrot.slane %v1804_v12, 9  ;;  %v6964_v19 = vpack.c.bf16 %v4490_v63, %v4490_v63  ;;  %v6965_v21 = vpack.c.bf16 %v4491_v45, %v4491_v45  ;;  %v4384_v15 = vadd.f32 %v9791_v0, %v4125_v14 }
 0x2ae   : > { %v3513_v20 = vmax.f32 %v1797_v36, %v6500_v13  ;;  %v5614_v16 = vunpack.c.l.b16 %v6963_v59  ;;  %v4385_v43 = vadd.f32 %v7814_v52, %v4126_v24  ;;  %v4386_v27 = vadd.f32 %v7798_v47, %v4127_v53 }
 0x2af   : > { %v3514_v9 = vmax.f32 %v1805_v26, %v6501_v35  ;;  %v5615_v29 = vunpack.c.l.b16 %v6964_v19  ;;  %v5616_v32 = vunpack.c.l.b16 %v6965_v21  ;;  %v4609_v11 = vmax.f32 %v4384_v15, 0.0 }
 0x2b0   : > { %v3515_v8 = vmax.f32 %v1804_v12, %v6502_v25  ;;  %v4610_v6 = vmax.f32 %v4385_v43, 0.0  ;;  %v4611_v42 = vmax.f32 %v4386_v27, 0.0  ;;  %v3738_v1 = vmax.f32 %v3513_v20, %v1805_v26  ;;  %v9870_v25 = vld [vmem:[#allocation40_spill] sm:$0xff] }
 0x2b1   : > { %v3739_v22 = vmax.f32 %v3514_v9, %v1804_v12  ;;  %v5896_v34 = vrot.slane %v5615_v29, 7  ;;  %v8904_v63 = vrot.slane %v5616_v32, 6  ;;  %v7083_v45 = vpack.c.bf16 %v4609_v11, %v4609_v11 }
 0x2b2   : > { %v3740_v13 = vmax.f32 %v3515_v8, %v8893_v31  ;;  %v7084_v36 = vpack.c.bf16 %v4610_v6, %v4610_v6  ;;  %v7085_v14 = vpack.c.bf16 %v4611_v42, %v4611_v42  ;;  %v3997_v59 = vmul.f32 %v7763_v28, %v3738_v1 }
 0x2b3   : > { %v3998_v35 = vmul.f32 %v7811_v51, %v3739_v22  ;;  %v5897_v21 = vsel %vm5772_vm0, %v5896_v34, %v5614_v16  ;;  %v5734_v24 = vunpack.c.l.b16 %v7083_v45  ;;  %v9871_v12 = vmax.f32 %v9832_v10, %v9859_v33  ;;  %v9872_v34 = vld [vmem:[#allocation42_spill] sm:$0xff] }
 0x2b4   : > { %v3999_v53 = vmul.f32 %v7794_v46, %v3740_v13  ;;  %v5735_v26 = vunpack.c.l.b16 %v7084_v36  ;;  %v5736_v11 = vunpack.c.l.b16 %v7085_v14  ;;  %v4256_v19 = vadd.f32 %v9791_v0, %v3997_v59 }
 0x2b5   : > { %v1446_v32 = vmax.f32 %v9871_v12, %v9870_v25  ;;  %v4257_v6 = vadd.f32 %v7814_v52, %v3998_v35  ;;  %v9873_v16 = vmax.f32 %v9861_v18, %v9860_v5 }
 0x2b6   : > { %v4258_v1 = vadd.f32 %v7798_v47, %v3999_v53  ;;  %v6104_v27 = vrot.slane %v5735_v26, 7  ;;  %v8923_v9 = vrot.slane %v5736_v11, 6  ;;  %v4481_v10 = vmax.f32 %v4256_v19, 0.0 }
 0x2b7   : > { %v2334_v15 = vcombine.high %v1446_v32, %v1446_v32  ;;  %v2341_v20 = vrot.slane %v1446_v32, %v7760_v23  ;;  %v1417_v43 = vmax.f32 %v9873_v16, %v9872_v34  ;;  %v4482_v33 = vmax.f32 %v4257_v6, 0.0 }
 0x2b8   : > { %v4483_v29 = vmax.f32 %v4258_v1, 0.0  ;;  %v8927_v45 = vsel %vm5772_vm0, %v6104_v27, %v5734_v24  ;;  %v6955_v13 = vpack.c.bf16 %v4481_v10, %v4481_v10  ;;  %v6511_v27 = vrot.slane %v8864_v56, 9 }
 0x2b9   : > { %v2348_v8 = vrot.slane %v2334_v15, %v7760_v23  ;;  %v2349_v42 = vcombine.high %v2341_v20, %v2341_v20  ;;  %v6620_v22 = vrot.slane %v2341_v20, 9  ;;  %v6956_v36 = vpack.c.bf16 %v4482_v33, %v4482_v33 }
 0x2ba   : > { %v1841_v14 = vcombine.high %v1417_v43, %v1417_v43  ;;  %v6957_v59 = vpack.c.bf16 %v4483_v29, %v4483_v29  ;;  %v5606_v53 = vunpack.c.l.b16 %v6955_v13  ;;  %v1848_v26 = vrot.slane %v1417_v43, %v7760_v23 }
 0x2bb   : > { %v8929_v35 = vcombine.high %v2348_v8, %v2348_v8  ;;  %v6621_v5 = vrot.slane %v2349_v42, 9  ;;  %v6622_v18 = vrot.slane %v2348_v8, 9  ;;  %v5607_v12 = vunpack.c.l.b16 %v6956_v36 }
 0x2bc   : > { %v3633_v32 = vmax.f32 %v2341_v20, %v6620_v22  ;;  %v5608_v11 = vunpack.c.l.b16 %v6957_v59  ;;  %v1855_v1 = vrot.slane %v1841_v14, %v7760_v23  ;;  %v1856_v16 = vcombine.high %v1848_v26, %v1848_v26 }
 0x2bd   : > { %v3634_v19 = vmax.f32 %v2349_v42, %v6621_v5  ;;  %v3635_v6 = vmax.f32 %v2348_v8, %v6622_v18  ;;  %v5882_v24 = vrot.slane %v5607_v12, 7  ;;  %v6512_v43 = vrot.slane %v1848_v26, 9 }
 0x2be   : > { %v3858_v15 = vmax.f32 %v3633_v32, %v2349_v42  ;;  %v5884_v10 = vrot.slane %v5608_v11, 6  ;;  %v1857_v34 = vcombine.high %v1855_v1, %v1855_v1  ;;  %v6513_v22 = vrot.slane %v1856_v16, 9  ;;  %v8944_v32 = vpop.f32.mrb[52].mxu0 }
 0x2bf   : > { %v3859_v33 = vmax.f32 %v3634_v19, %v2348_v8  ;;  %v3860_v29 = vmax.f32 %v3635_v6, %v8929_v35  ;;  %v5883_v13 = vsel %vm5772_vm0, %v5882_v24, %v5606_v53  ;;  %v6514_v59 = vrot.slane %v1855_v1, 9  ;;  %9874 = vst [vmem:[#allocation30_spill] sm:$0xff] %v8944_v32 }
 0x2c0   : > { %v4117_v20 = vmul.f32 %v7763_v28, %v3858_v15  ;;  %v8938_v36 = vsel %vm5775_vm1, %v5884_v10, %v5883_v13  ;;  %v3524_v8 = vmax.f32 %v8864_v56, %v6511_v27  ;;  %v3525_v18 = vmax.f32 %v1848_v26, %v6512_v43  ;;  %v9875_v27 = vld [vmem:[#allocation14_spill] sm:$0xff] }
 0x2c1   : > { %v4118_v14 = vmul.f32 %v7811_v51, %v3859_v33  ;;  %v4119_v42 = vmul.f32 %v7794_v46, %v3860_v29  ;;  %v3526_v12 = vmax.f32 %v1856_v16, %v6513_v22  ;;  %v3527_v19 = vmax.f32 %v1855_v1, %v6514_v59  ;;  %v8956_v22 = vpop.f32.mrb[52].mxu1 }
 0x2c2   : > { %v4376_v5 = vadd.f32 %v9791_v0, %v4117_v20  ;;  %v8950_v6 = vsel %vm5775_vm1, %v8904_v63, %v5897_v21  ;;  %v3749_v15 = vmax.f32 %v3524_v8, %v1848_v26  ;;  %v3750_v10 = vmax.f32 %v3525_v18, %v1856_v16  ;;  %9877 = vst [vmem:[#allocation23_spill] sm:$0xff] %v8956_v22  ;;  %v8961_v26 = vpop.f32.mrb[53].mxu0 }
 0x2c3   : > { %v4377_v53 = vadd.f32 %v7814_v52, %v4118_v14  ;;  %v4378_v11 = vadd.f32 %v7798_v47, %v4119_v42  ;;  %v3751_v33 = vmax.f32 %v3526_v12, %v1855_v1  ;;  %v3752_v56 = vmax.f32 %v3527_v19, %v1857_v34  ;;  %9878 = vst [vmem:[#allocation31_spill] sm:$0xff] %v8961_v26  ;;  %v8969_v19 = vpop.f32.mrb[53].mxu1 }
 0x2c4   : > { %v4601_v24 = vmax.f32 %v4376_v5, 0.0  ;;  %v9876_v20 = vmax.f32 %v9838_v50, %v9862_v58  ;;  %v4008_v42 = vmul.f32 %v7819_v54, %v3749_v15  ;;  %v4009_v63 = vmul.f32 %v7775_v38, %v3750_v10  ;;  %9879 = vst [vmem:[#allocation22_spill] sm:$0xff] %v8969_v19 }
 0x2c5   : > { %v4602_v29 = vmax.f32 %v4377_v53, 0.0  ;;  %v4603_v13 = vmax.f32 %v4378_v11, 0.0  ;;  %v4010_v21 = vmul.f32 %v7822_v55, %v3751_v33  ;;  %v4011_v34 = vmul.f32 %v7802_v48, %v3752_v56 }
 0x2c6   : > { %v1449_v43 = vmax.f32 %v9876_v20, %v9875_v27  ;;  %v7075_v14 = vpack.c.bf16 %v4601_v24, %v4601_v24  ;;  %v4267_v50 = vadd.f32 %v7831_v60, %v4008_v42  ;;  %v4268_v58 = vadd.f32 %v7778_v39, %v4009_v63 }
 0x2c7   : > { %v7076_v1 = vpack.c.bf16 %v4602_v29, %v4602_v29  ;;  %v7077_v16 = vpack.c.bf16 %v4603_v13, %v4603_v13  ;;  %v4269_v8 = vadd.f32 %v7834_v61, %v4010_v21  ;;  %v4270_v53 = vadd.f32 %v7806_v49, %v4011_v34  ;;  %v8972_v29 = vpop.f32.mrb[54].mxu0  ;;  %v8974_v13 = vpop.f32.mrb[54].mxu1 }
 0x2c8   : > { %v2385_v59 = vcombine.high %v1449_v43, %v1449_v43  ;;  %v5726_v5 = vunpack.c.l.b16 %v7075_v14  ;;  %v2392_v11 = vrot.slane %v1449_v43, %v7760_v23  ;;  %v4492_v24 = vmax.f32 %v4267_v50, 0.0  ;;  %9880 = vst [vmem:[#allocation24_spill] sm:$0xff] %v8972_v29  ;;  %9881 = vst [vmem:[#allocation32_spill] sm:$0xff] %v8974_v13  ;;  %v8976_v43 = vpop.f32.mrb[55].mxu0  ;;  %v8978_v34 = vpop.f32.mrb[55].mxu1 }
 0x2c9   : > { %v5727_v18 = vunpack.c.l.b16 %v7076_v1  ;;  %v5728_v12 = vunpack.c.l.b16 %v7077_v16  ;;  %v4493_v15 = vmax.f32 %v4268_v58, 0.0  ;;  %v4494_v10 = vmax.f32 %v4269_v8, 0.0  ;;  %9882 = vst [vmem:[#allocation26_spill] sm:$0xff] %v8976_v43  ;;  %9883 = vst [vmem:[#allocation33_spill] sm:$0xff] %v8978_v34  ;;  %v8986_v32 = vpop.f32.mrb[56].mxu0 }
 0x2ca   : > { %v2399_v33 = vrot.slane %v2385_v59, %v7760_v23  ;;  %v4495_v14 = vmax.f32 %v4270_v53, 0.0  ;;  %v2400_v42 = vcombine.high %v2392_v11, %v2392_v11  ;;  %v6966_v63 = vpack.c.bf16 %v4492_v24, %v4492_v24  ;;  %9884 = vst [vmem:[#allocation34_spill] sm:$0xff] %v8986_v32 }
 0x2cb   : > { %v6090_v56 = vrot.slane %v5727_v18, 7  ;;  %v6092_v20 = vrot.slane %v5728_v12, 6  ;;  %v6967_v21 = vpack.c.bf16 %v4493_v15, %v4493_v15  ;;  %v6968_v1 = vpack.c.bf16 %v4494_v10, %v4494_v10 }
 0x2cc   : > { %v2401_v16 = vcombine.high %v2399_v33, %v2399_v33  ;;  %v6969_v58 = vpack.c.bf16 %v4495_v14, %v4495_v14  ;;  %v6631_v59 = vrot.slane %v8878_v30, 9  ;;  %v6632_v8 = vrot.slane %v2392_v11, 9 }
 0x2cd   : > { %v6091_v50 = vsel %vm5772_vm0, %v6090_v56, %v5726_v5  ;;  %v5617_v18 = vunpack.c.l.b16 %v6966_v63  ;;  %v5618_v12 = vunpack.c.l.b16 %v6967_v21  ;;  %v5619_v53 = vunpack.c.l.b16 %v6968_v1  ;;  %v9886_v1 = vld [vmem:[#allocation15_spill] sm:$0xff] }
 0x2ce   : > { %v8983_v13 = vsel %vm5775_vm1, %v6092_v20, %v6091_v50  ;;  %v5620_v24 = vunpack.c.l.b16 %v6969_v58  ;;  %v6633_v15 = vrot.slane %v2400_v42, 9  ;;  %v6634_v10 = vrot.slane %v2399_v33, 9  ;;  %v8988_v20 = vpop.f32.mrb[56].mxu1 }
 0x2cf   : > { %v3644_v29 = vmax.f32 %v8878_v30, %v6631_v59  ;;  %v5900_v43 = vrot.slane %v5617_v18, 5  ;;  %v5902_v19 = vrot.slane %v5618_v12, 4  ;;  %v5904_v34 = vrot.slane %v5619_v53, 3  ;;  %9885 = vst [vmem:[#allocation35_spill] sm:$0xff] %v8988_v20 }
 0x2d0   : > { %v3645_v26 = vmax.f32 %v2392_v11, %v6632_v8  ;;  %v5906_v5 = vrot.slane %v5620_v24, 2  ;;  %v3646_v56 = vmax.f32 %v2400_v42, %v6633_v15  ;;  %v3647_v14 = vmax.f32 %v2399_v33, %v6634_v10 }
 0x2d1   : > { %v3869_v22 = vmax.f32 %v3644_v29, %v2392_v11  ;;  %v5901_v63 = vsel %vm5778_vm2, %v5900_v43, %v8950_v6  ;;  %v6107_v30 = vsel %vm5775_vm1, %v8923_v9, %v8927_v45  ;;  %v9887_v50 = vmax.f32 %v9847_v37, %v9863_v57  ;;  %v9004_v43 = vpop.f32.mrb[57].mxu0  ;;  %v6249_v45 = vld [vmem:[%s8033_s19 + $0x24] sm:$0xf] }
 0x2d2   : > { %v3870_v21 = vmax.f32 %v3645_v26, %v2400_v42  ;;  %v5903_v11 = vsel %vm5781_vm3, %v5902_v19, %v5901_v63  ;;  %v3871_v29 = vmax.f32 %v3646_v56, %v2399_v33  ;;  %v3872_v59 = vmax.f32 %v3647_v14, %v2401_v16  ;;  %9888 = vst [vmem:[#allocation36_spill] sm:$0xff] %v9004_v43 }
 0x2d3   : > { %v1415_v58 = vmax.f32 %v9887_v50, %v9886_v1  ;;  %v4128_v8 = vmul.f32 %v7819_v54, %v3869_v22  ;;  %v5905_v18 = vsel %vm5784_vm4, %v5904_v34, %v5903_v11  ;;  %v6503_v15 = vrot.slane %v8893_v31, 9 }
 0x2d4   : > { %v4129_v6 = vmul.f32 %v7775_v38, %v3870_v21  ;;  %v5907_v9 = vsel %vm5787_vm5, %v5906_v5, %v5905_v18  ;;  %v4130_v37 = vmul.f32 %v7822_v55, %v3871_v29  ;;  %v4131_v57 = vmul.f32 %v7802_v48, %v3872_v59  ;;  %v9020_v18 = vpop.f32.mrb[57].mxu1 }
 0x2d5   : > { %v1807_v26 = vcombine.high %v1415_v58, %v1415_v58  ;;  %v1814_v42 = vrot.slane %v1415_v58, %v7760_v23  ;;  %v4387_v19 = vadd.f32 %v7831_v60, %v4128_v8  ;;  %v6177_v22 = vpack.c.b16 %v5907_v9, %v5907_v9  ;;  %9889 = vst [vmem:[#allocation40_spill] sm:$0xff] %v9020_v18 }
 0x2d6   : > { %v4388_v33 = vadd.f32 %v7778_v39, %v4129_v6  ;;  %v4389_v12 = vadd.f32 %v7834_v61, %v4130_v37  ;;  %v4390_v53 = vadd.f32 %v7806_v49, %v4131_v57  ;;  %v3516_v8 = vmax.f32 %v8893_v31, %v6503_v15 }
 0x2d7   : > { %v1821_v16 = vrot.slane %v1807_v26, %v7760_v23  ;;  %v1822_v34 = vcombine.high %v1814_v42, %v1814_v42  ;;  %v4612_v24 = vmax.f32 %v4387_v19, 0.0  ;;  %v6250_v10 = vsel %vm8050_vm8, %v6177_v22, %v6249_v45 }
 0x2d8   : > { %v4613_v5 = vmax.f32 %v4388_v33, 0.0  ;;  %v6504_v14 = vrot.slane %v1814_v42, 9  ;;  %6251 = vst [vmem:[%s8033_s19 + $0x24] sm:$0xf] %v6250_v10  ;;  %v4614_v63 = vmax.f32 %v4389_v12, 0.0  ;;  %v4615_v21 = vmax.f32 %v4390_v53, 0.0 }
 0x2d9   : > { %v1823_v56 = vcombine.high %v1821_v16, %v1821_v16  ;;  %v7086_v50 = vpack.c.bf16 %v4612_v24, %v4612_v24  ;;  %v6505_v58 = vrot.slane %v1822_v34, 9  ;;  %v6506_v29 = vrot.slane %v1821_v16, 9 }
 0x2da   : > { %v7087_v11 = vpack.c.bf16 %v4613_v5, %v4613_v5  ;;  %v7088_v6 = vpack.c.bf16 %v4614_v63, %v4614_v63  ;;  %v7089_v26 = vpack.c.bf16 %v4615_v21, %v4615_v21  ;;  %v3517_v37 = vmax.f32 %v1814_v42, %v6504_v14 }
 0x2db   : > { %v6507_v59 = vrot.slane %v1823_v56, 9  ;;  %v5737_v9 = vunpack.c.l.b16 %v7086_v50  ;;  %v3518_v57 = vmax.f32 %v1822_v34, %v6505_v58  ;;  %v3519_v19 = vmax.f32 %v1821_v16, %v6506_v29 }
 0x2dc   : > { %v5738_v45 = vunpack.c.l.b16 %v7087_v11  ;;  %v5739_v33 = vunpack.c.l.b16 %v7088_v6  ;;  %v5740_v12 = vunpack.c.l.b16 %v7089_v26  ;;  %v3741_v24 = vmax.f32 %v3516_v8, %v1814_v42 }
 0x2dd   : > { %v3520_v22 = vmax.f32 %v1823_v56, %v6507_v59  ;;  %v6108_v53 = vrot.slane %v5737_v9, 5  ;;  %v3742_v5 = vmax.f32 %v3517_v37, %v1822_v34  ;;  %v3743_v43 = vmax.f32 %v3518_v57, %v1821_v16  ;;  %v6281_v59 = vld [vmem:[%s8033_s19 + $0x64] sm:$0xf] }
 0x2de   : > { %v6110_v10 = vrot.slane %v5738_v45, 4  ;;  %v3744_v20 = vmax.f32 %v3519_v19, %v1823_v56  ;;  %v6112_v15 = vrot.slane %v5739_v33, 3  ;;  %v6114_v63 = vrot.slane %v5740_v12, 2  ;;  %v9890_v56 = vld [vmem:[#allocation11_spill] sm:$0xff] }
 0x2df   : > { %v6109_v31 = vsel %vm5778_vm2, %v6108_v53, %v6107_v30  ;;  %v3745_v21 = vmax.f32 %v3520_v22, %v8855_v44  ;;  %v4000_v50 = vmul.f32 %v7819_v54, %v3741_v24  ;;  %v4001_v58 = vmul.f32 %v7775_v38, %v3742_v5 }
 0x2e0   : > { %v6111_v14 = vsel %vm5781_vm3, %v6110_v10, %v6109_v31  ;;  %v4002_v11 = vmul.f32 %v7822_v55, %v3743_v43  ;;  %v4003_v34 = vmul.f32 %v7802_v48, %v3744_v20  ;;  %v9891_v30 = vmax.f32 %v9851_v17, %v9864_v40 }
 0x2e1   : > { %v6113_v42 = vsel %vm5784_vm4, %v6112_v15, %v6111_v14  ;;  %v4004_v16 = vmul.f32 %v7845_v2, %v3745_v21  ;;  %v4259_v8 = vadd.f32 %v7831_v60, %v4000_v50  ;;  %v4260_v6 = vadd.f32 %v7778_v39, %v4001_v58  ;;  %v9048_v14 = vpop.f32.mrb[58].mxu0 }
 0x2e2   : > { %v1447_v29 = vmax.f32 %v9891_v30, %v9890_v56  ;;  %v6115_v44 = vsel %vm5787_vm5, %v6114_v63, %v6113_v42  ;;  %v4261_v43 = vadd.f32 %v7834_v61, %v4002_v11  ;;  %v4262_v20 = vadd.f32 %v7806_v49, %v4003_v34  ;;  %9892 = vst [vmem:[#allocation14_spill] sm:$0xff] %v9048_v14 }
 0x2e3   : > { %v6193_v26 = vpack.c.b16 %v6115_v44, %v6115_v44  ;;  %v4263_v9 = vadd.f32 %v7848_v3, %v4004_v16  ;;  %v4484_v45 = vmax.f32 %v4259_v8, 0.0  ;;  %v4485_v57 = vmax.f32 %v4260_v6, 0.0 }
 0x2e4   : > { %v2351_v37 = vcombine.high %v1447_v29, %v1447_v29  ;;  %v4486_v17 = vmax.f32 %v4261_v43, 0.0  ;;  %v2358_v40 = vrot.slane %v1447_v29, %v7760_v23  ;;  %v4487_v22 = vmax.f32 %v4262_v20, 0.0 }
 0x2e5   : > { %v6282_v19 = vsel %vm8050_vm8, %v6193_v26, %v6281_v59  ;;  %v4488_v33 = vmax.f32 %v4263_v9, 0.0  ;;  %v6958_v53 = vpack.c.bf16 %v4484_v45, %v4484_v45  ;;  %v6959_v24 = vpack.c.bf16 %v4485_v57, %v4485_v57 }
 0x2e6   : > { %v2365_v12 = vrot.slane %v2351_v37, %v7760_v23  ;;  %6283 = vst [vmem:[%s8033_s19 + $0x64] sm:$0xf] %v6282_v19  ;;  %v6960_v10 = vpack.c.bf16 %v4486_v17, %v4486_v17  ;;  %v2366_v5 = vcombine.high %v2358_v40, %v2358_v40  ;;  %v6961_v31 = vpack.c.bf16 %v4487_v22, %v4487_v22  ;;  %v9053_v19 = vpop.f32.mrb[58].mxu1 }
 0x2e7   : > { %v6962_v15 = vpack.c.bf16 %v4488_v33, %v4488_v33  ;;  %v6623_v21 = vrot.slane %v8929_v35, 9  ;;  %v5609_v50 = vunpack.c.l.b16 %v6958_v53  ;;  %v5610_v58 = vunpack.c.l.b16 %v6959_v24  ;;  %9893 = vst [vmem:[#allocation15_spill] sm:$0xff] %v9053_v19 }
 0x2e8   : > { %v2367_v63 = vcombine.high %v2365_v12, %v2365_v12  ;;  %v5611_v11 = vunpack.c.l.b16 %v6960_v10  ;;  %v6624_v42 = vrot.slane %v2358_v40, 9  ;;  %v5612_v34 = vunpack.c.l.b16 %v6961_v31 }
 0x2e9   : > { %v5613_v16 = vunpack.c.l.b16 %v6962_v15  ;;  %v6625_v30 = vrot.slane %v2366_v5, 9  ;;  %v6626_v29 = vrot.slane %v2365_v12, 9  ;;  %v5886_v44 = vrot.slane %v5609_v50, 5 }
 0x2ea   : > { %v5888_v59 = vrot.slane %v5610_v58, 4  ;;  %v5890_v8 = vrot.slane %v5611_v11, 3  ;;  %v6627_v6 = vrot.slane %v2367_v63, 9  ;;  %v5892_v43 = vrot.slane %v5612_v34, 2  ;;  %v9894_v58 = vld [vmem:[#allocation38_spill] sm:$0xff]  ;;  %v9895_v11 = vld [vmem:[#allocation37_spill] sm:$0xff] }
 0x2eb   : > { %v5894_v26 = vrot.slane %v5613_v16, 1  ;;  %v3636_v20 = vmax.f32 %v8929_v35, %v6623_v21  ;;  %v3637_v9 = vmax.f32 %v2358_v40, %v6624_v42  ;;  %v5887_v37 = vsel %vm5778_vm2, %v5886_v44, %v8938_v36  ;;  %v9896_v34 = vld [vmem:[#allocation16_spill] sm:$0xff]  ;;  %v9897_v16 = vld [vmem:[#allocation9_spill] sm:$0xff] }
 0x2ec   : > { %v3638_v45 = vmax.f32 %v2366_v5, %v6625_v30  ;;  %v3639_v57 = vmax.f32 %v2365_v12, %v6626_v29  ;;  %v3640_v17 = vmax.f32 %v2367_v63, %v6627_v6  ;;  %v5889_v22 = vsel %vm5781_vm3, %v5888_v59, %v5887_v37 }
 0x2ed   : > { %v3861_v33 = vmax.f32 %v3636_v20, %v2358_v40  ;;  %v3862_v53 = vmax.f32 %v3637_v9, %v2366_v5  ;;  %v1360_v24 = vmax.f32 %v9865_v41, %v8706_v4  ;;  %v5891_v10 = vsel %vm5784_vm4, %v5890_v8, %v5889_v22  ;;  %v9898_v8 = vld [vmem:[#allocation39_spill] sm:$0xff]  ;;  %v9899_v20 = vld [vmem:[#allocation12_spill] sm:$0xff]  ;;  %v9900_v9 = vld [vmem:[#allocation42_spill] sm:$0xff] }
 0x2ee   : > { %v3863_v31 = vmax.f32 %v3638_v45, %v2365_v12  ;;  %v3864_v35 = vmax.f32 %v3639_v57, %v2367_v63  ;;  %v3865_v15 = vmax.f32 %v3640_v17, %v8871_v7  ;;  %v5893_v36 = vsel %vm5787_vm5, %v5892_v43, %v5891_v10  ;;  %v9901_v45 = vld [vmem:[#allocation17_spill] sm:$0xff] }
 0x2ef   : > { %v4120_v21 = vmul.f32 %v7819_v54, %v3861_v33  ;;  %v4121_v50 = vmul.f32 %v7775_v38, %v3862_v53  ;;  %v1392_v40 = vmax.f32 %v9895_v11, %v9894_v58  ;;  %v5895_v5 = vsel %vm5790_vm9, %v5894_v26, %v5893_v36  ;;  %v9902_v53 = vld [vmem:[#allocation41_spill] sm:$0xff] }
 0x2f0   : > { %v4122_v4 = vmul.f32 %v7822_v55, %v3863_v31  ;;  %v4123_v41 = vmul.f32 %v7802_v48, %v3864_v35  ;;  %v4124_v12 = vmul.f32 %v7845_v2, %v3865_v15  ;;  %v6176_v63 = vpack.c.b16 %v5895_v5, %v5895_v5  ;;  %v9903_v15 = vld [vmem:[#allocation13_spill] sm:$0xff] }
 0x2f1   : > { %v4379_v7 = vadd.f32 %v7831_v60, %v4120_v21  ;;  %v4380_v42 = vadd.f32 %v7778_v39, %v4121_v50  ;;  %v1358_v30 = vmax.f32 %v9897_v16, %v9896_v34  ;;  %v9904_v21 = vld [vmem:[#allocation18_spill] sm:$0xff] }
 0x2f2   : > { %v4381_v29 = vadd.f32 %v7834_v61, %v4122_v4  ;;  %v4382_v44 = vadd.f32 %v7806_v49, %v4123_v41  ;;  %v4383_v59 = vadd.f32 %v7848_v3, %v4124_v12  ;;  %6248 = vst.msk [vmem:[%s8033_s19 + $0x20] sm:$0xf] %vm6228_vm6, %v6176_v63  ;;  %v1420_v50 = vmax.f32 %v1360_v24, %v9904_v21  ;;  %v9905_v4 = vld [vmem:[#allocation19_spill] sm:$0xff] }
 0x2f3   : > { %v4604_v43 = vmax.f32 %v4379_v7, 0.0  ;;  %v4605_v26 = vmax.f32 %v4380_v42, 0.0  ;;  %v1452_v41 = vmax.f32 %v1392_v40, %v9905_v4 }
 0x2f4   : > { %v4606_v17 = vmax.f32 %v4381_v29, 0.0  ;;  %v4607_v22 = vmax.f32 %v4382_v44, 0.0  ;;  %v4608_v33 = vmax.f32 %v4383_v59, 0.0  ;;  %v1892_v7 = vcombine.high %v1420_v50, %v1420_v50 }
 0x2f5   : > { %v7078_v31 = vpack.c.bf16 %v4604_v43, %v4604_v43  ;;  %v7079_v35 = vpack.c.bf16 %v4605_v26, %v4605_v26  ;;  %v9091_v42 = vrot.slane %v1420_v50, %v7760_v23  ;;  %v2436_v44 = vcombine.high %v1452_v41, %v1452_v41 }
 0x2f6   : > { %v7080_v58 = vpack.c.bf16 %v4606_v17, %v4606_v17  ;;  %v7081_v11 = vpack.c.bf16 %v4607_v22, %v4607_v22  ;;  %v7082_v5 = vpack.c.bf16 %v4608_v33, %v4608_v33  ;;  %v1906_v26 = vrot.slane %v1892_v7, %v7760_v23 }
 0x2f7   : > { %v5729_v12 = vunpack.c.l.b16 %v7078_v31  ;;  %v5730_v63 = vunpack.c.l.b16 %v7079_v35  ;;  %v1907_v24 = vcombine.high %v9091_v42, %v9091_v42  ;;  %v6523_v33 = vrot.slane %v9091_v42, 9 }
 0x2f8   : > { %v5731_v34 = vunpack.c.l.b16 %v7080_v58  ;;  %v5732_v16 = vunpack.c.l.b16 %v7081_v11  ;;  %v5733_v29 = vunpack.c.l.b16 %v7082_v5  ;;  %v9099_v35 = vcombine.high %v1906_v26, %v1906_v26  ;;  %v9101_v11 = vpop.f32.mrb[59].mxu0 }
 0x2f9   : > { %v6094_v59 = vrot.slane %v5729_v12, 5  ;;  %v6096_v43 = vrot.slane %v5730_v63, 4  ;;  %v6524_v50 = vrot.slane %v1907_v24, 9  ;;  %v6525_v58 = vrot.slane %v1906_v26, 9  ;;  %9906 = vst [vmem:[#allocation11_spill] sm:$0xff] %v9101_v11 }
 0x2fa   : > { %v6098_v17 = vrot.slane %v5731_v34, 3  ;;  %v6100_v22 = vrot.slane %v5732_v16, 2  ;;  %v6102_v40 = vrot.slane %v5733_v29, 1  ;;  %v3536_v12 = vmax.f32 %v9091_v42, %v6523_v33 }
 0x2fb   : > { %v6095_v31 = vsel %vm5778_vm2, %v6094_v59, %v8983_v13  ;;  %v9106_v63 = vrot.slane %v1452_v41, %v7760_v23  ;;  %v2450_v7 = vrot.slane %v2436_v44, %v7760_v23  ;;  %v3537_v16 = vmax.f32 %v1907_v24, %v6524_v50  ;;  %v9907_v13 = vld [vmem:[#allocation20_spill] sm:$0xff] }
 0x2fc   : > { %v6097_v5 = vsel %vm5781_vm3, %v6096_v43, %v6095_v31  ;;  %v3538_v29 = vmax.f32 %v1906_v26, %v6525_v58  ;;  %v1418_v59 = vmax.f32 %v1358_v30, %v9907_v13  ;;  %v3761_v10 = vmax.f32 %v3536_v12, %v1907_v24 }
 0x2fd   : > { %v6099_v34 = vsel %vm5784_vm4, %v6098_v17, %v6097_v5  ;;  %v2451_v43 = vcombine.high %v9106_v63, %v9106_v63  ;;  %v9114_v31 = vcombine.high %v2450_v7, %v2450_v7  ;;  %v3762_v33 = vmax.f32 %v3537_v16, %v1906_v26 }
 0x2fe   : > { %v6101_v36 = vsel %vm5787_vm5, %v6100_v22, %v6099_v34  ;;  %v3763_v44 = vmax.f32 %v3538_v29, %v9099_v35  ;;  %v6643_v17 = vrot.slane %v9106_v63, 9  ;;  %v4020_v58 = vmul.f32 %v7763_v28, %v3761_v10 }
 0x2ff   : > { %v6103_v41 = vsel %vm5790_vm9, %v6102_v40, %v6101_v36  ;;  %v6644_v30 = vrot.slane %v2451_v43, 9  ;;  %v6645_v5 = vrot.slane %v2450_v7, 9  ;;  %v4021_v22 = vmul.f32 %v7811_v51, %v3762_v33 }
 0x300   : > { %v6192_v50 = vpack.c.b16 %v6103_v41, %v6103_v41  ;;  %v4022_v24 = vmul.f32 %v7794_v46, %v3763_v44  ;;  %v3656_v12 = vmax.f32 %v9106_v63, %v6643_v17  ;;  %v1858_v34 = vcombine.high %v1418_v59, %v1418_v59 }
 0x301   : > { %v4279_v36 = vadd.f32 %v9791_v0, %v4020_v58  ;;  %v3657_v26 = vmax.f32 %v2451_v43, %v6644_v30  ;;  %v3658_v40 = vmax.f32 %v2450_v7, %v6645_v5  ;;  %v1865_v16 = vrot.slane %v1418_v59, %v7760_v23 }
 0x302   : > { %6280 = vst.msk [vmem:[%s8033_s19 + $0x60] sm:$0xf] %vm6228_vm6, %v6192_v50  ;;  %v4280_v29 = vadd.f32 %v7814_v52, %v4021_v22  ;;  %v4281_v10 = vadd.f32 %v7798_v47, %v4022_v24  ;;  %v3881_v41 = vmax.f32 %v3656_v12, %v2451_v43  ;;  %v1872_v33 = vrot.slane %v1858_v34, %v7760_v23  ;;  %v9136_v43 = vpop.f32.mrb[59].mxu1 }
 0x303   : > { %v4504_v57 = vmax.f32 %v4279_v36, 0.0  ;;  %v3882_v44 = vmax.f32 %v3657_v26, %v2450_v7  ;;  %v3883_v17 = vmax.f32 %v3658_v40, %v9114_v31  ;;  %v1873_v37 = vcombine.high %v1865_v16, %v1865_v16  ;;  %9908 = vst [vmem:[#allocation38_spill] sm:$0xff] %v9136_v43  ;;  %v7334_v26 = vpop.f32.mrb[60].mxu1 }
 0x304   : > { %v4505_v6 = vmax.f32 %v4280_v29, 0.0  ;;  %v4506_v50 = vmax.f32 %v4281_v10, 0.0  ;;  %v4140_v58 = vmul.f32 %v7763_v28, %v3881_v41  ;;  %v9132_v30 = vcombine.high %v1872_v33, %v1872_v33 }
 0x305   : > { %v6978_v5 = vpack.c.bf16 %v4504_v57, %v4504_v57  ;;  %v4141_v59 = vmul.f32 %v7811_v51, %v3882_v44  ;;  %v4142_v22 = vmul.f32 %v7794_v46, %v3883_v17  ;;  %v6515_v24 = vrot.slane %v1865_v16, 9  ;;  %v1325_v57 = vpop.f32.mrb[61].mxu1 }
 0x306   : > { %v6979_v12 = vpack.c.bf16 %v4505_v6, %v4505_v6  ;;  %v6980_v34 = vpack.c.bf16 %v4506_v50, %v4506_v50  ;;  %v4399_v7 = vadd.f32 %v9791_v0, %v4140_v58  ;;  %v6516_v36 = vrot.slane %v1873_v37, 9  ;;  %v7335_v14 = vpop.f32.mrb[62].mxu1 }
 0x307   : > { %v5629_v40 = vunpack.c.l.b16 %v6978_v5  ;;  %v4400_v29 = vadd.f32 %v7814_v52, %v4141_v59  ;;  %v4401_v10 = vadd.f32 %v7798_v47, %v4142_v22  ;;  %v6517_v41 = vrot.slane %v1872_v33, 9  ;;  %v1327_v32 = vpop.f32.mrb[63].mxu1 }
 0x308   : > { %v5630_v11 = vunpack.c.l.b16 %v6979_v12  ;;  %v5631_v44 = vunpack.c.l.b16 %v6980_v34  ;;  %v4624_v19 = vmax.f32 %v4399_v7, 0.0  ;;  %v3528_v17 = vmax.f32 %v1865_v16, %v6515_v24  ;;  %v9909_v24 = vld [vmem:[#allocation21_spill] sm:$0xff] }
 0x309   : > { %v4625_v18 = vmax.f32 %v4400_v29, 0.0  ;;  %v4626_v43 = vmax.f32 %v4401_v10, 0.0  ;;  %v3529_v6 = vmax.f32 %v1873_v37, %v6516_v36  ;;  %v3530_v50 = vmax.f32 %v1872_v33, %v6517_v41  ;;  %v9911_v36 = vld [vmem:[#allocation25_spill] sm:$0xff] }
 0x30a   : > { %v5922_v58 = vrot.slane %v5630_v11, 7  ;;  %v9141_v13 = vrot.slane %v5631_v44, 6  ;;  %v7098_v5 = vpack.c.bf16 %v4624_v19, %v4624_v19  ;;  %v3753_v26 = vmax.f32 %v3528_v17, %v1873_v37 }
 0x30b   : > { %v7099_v59 = vpack.c.bf16 %v4625_v18, %v4625_v18  ;;  %v7100_v4 = vpack.c.bf16 %v4626_v43, %v4626_v43  ;;  %v3754_v22 = vmax.f32 %v3529_v6, %v1872_v33  ;;  %v3755_v57 = vmax.f32 %v3530_v50, %v9132_v30 }
 0x30c   : > { %v9145_v12 = vsel %vm5772_vm0, %v5922_v58, %v5629_v40  ;;  %v5749_v16 = vunpack.c.l.b16 %v7098_v5  ;;  %v4012_v14 = vmul.f32 %v7763_v28, %v3753_v26  ;;  %v9910_v32 = vmax.f32 %v9870_v25, %v9898_v8 }
 0x30d   : > { %v5750_v34 = vunpack.c.l.b16 %v7099_v59  ;;  %v5751_v7 = vunpack.c.l.b16 %v7100_v4  ;;  %v4013_v19 = vmul.f32 %v7811_v51, %v3754_v22  ;;  %v4014_v18 = vmul.f32 %v7794_v46, %v3755_v57 }
 0x30e   : > { %v1450_v11 = vmax.f32 %v9910_v32, %v9909_v24  ;;  %v4271_v37 = vadd.f32 %v9791_v0, %v4012_v14  ;;  %v9912_v40 = vmax.f32 %v9900_v9, %v9899_v20 }
 0x30f   : > { %v6130_v10 = vrot.slane %v5750_v34, 7  ;;  %v9160_v41 = vrot.slane %v5751_v7, 6  ;;  %v4272_v25 = vadd.f32 %v7814_v52, %v4013_v19  ;;  %v4273_v8 = vadd.f32 %v7798_v47, %v4014_v18 }
 0x310   : > { %v2402_v33 = vcombine.high %v1450_v11, %v1450_v11  ;;  %v2409_v43 = vrot.slane %v1450_v11, %v7760_v23  ;;  %v1421_v29 = vmax.f32 %v9912_v40, %v9911_v36  ;;  %v4496_v4 = vmax.f32 %v4271_v37, 0.0 }
 0x311   : > { %v9166_v50 = vsel %vm5772_vm0, %v6130_v10, %v5749_v16  ;;  %v4497_v58 = vmax.f32 %v4272_v25, 0.0  ;;  %v4498_v5 = vmax.f32 %v4273_v8, 0.0 }
 0x312   : > { %v2416_v44 = vrot.slane %v2402_v33, %v7760_v23  ;;  %v2417_v17 = vcombine.high %v2409_v43, %v2409_v43  ;;  %v6635_v6 = vrot.slane %v2409_v43, 9  ;;  %v1909_v26 = vcombine.high %v1421_v29, %v1421_v29 }
 0x313   : > { %v6970_v20 = vpack.c.bf16 %v4496_v4, %v4496_v4  ;;  %v6971_v57 = vpack.c.bf16 %v4497_v58, %v4497_v58  ;;  %v6972_v14 = vpack.c.bf16 %v4498_v5, %v4498_v5  ;;  %v1916_v11 = vrot.slane %v1421_v29, %v7760_v23 }
 0x314   : > { %v9168_v9 = vcombine.high %v2416_v44, %v2416_v44  ;;  %v6636_v59 = vrot.slane %v2417_v17, 9  ;;  %v6637_v22 = vrot.slane %v2416_v44, 9  ;;  %v3648_v32 = vmax.f32 %v2409_v43, %v6635_v6 }
 0x315   : > { %v5621_v34 = vunpack.c.l.b16 %v6970_v20  ;;  %v1923_v18 = vrot.slane %v1909_v26, %v7760_v23  ;;  %v5622_v16 = vunpack.c.l.b16 %v6971_v57  ;;  %v5623_v37 = vunpack.c.l.b16 %v6972_v14  ;;  %v9180_v14 = vpop.f32.mrb[60].mxu0 }
 0x316   : > { %v3649_v7 = vmax.f32 %v2417_v17, %v6636_v59  ;;  %v3650_v19 = vmax.f32 %v2416_v44, %v6637_v22  ;;  %v3873_v33 = vmax.f32 %v3648_v32, %v2417_v17  ;;  %v1924_v40 = vcombine.high %v1916_v11, %v1916_v11 }
 0x317   : > { %v1925_v8 = vcombine.high %v1923_v18, %v1923_v18  ;;  %v6526_v4 = vrot.slane %v9099_v35, 9  ;;  %v5908_v58 = vrot.slane %v5622_v16, 7  ;;  %v5910_v5 = vrot.slane %v5623_v37, 6 }
 0x318   : > { %v3874_v10 = vmax.f32 %v3649_v7, %v2416_v44  ;;  %v3875_v25 = vmax.f32 %v3650_v19, %v9168_v9  ;;  %v4132_v43 = vmul.f32 %v7763_v28, %v3873_v33  ;;  %v6527_v29 = vrot.slane %v1916_v11, 9 }
 0x319   : > { %v6528_v26 = vrot.slane %v1924_v40, 9  ;;  %v6529_v59 = vrot.slane %v1923_v18, 9  ;;  %v5909_v17 = vsel %vm5772_vm0, %v5908_v58, %v5621_v34  ;;  %v3539_v22 = vmax.f32 %v9099_v35, %v6526_v4 }
 0x31a   : > { %v4133_v6 = vmul.f32 %v7811_v51, %v3874_v10  ;;  %v4134_v20 = vmul.f32 %v7794_v46, %v3875_v25  ;;  %v4391_v44 = vadd.f32 %v9791_v0, %v4132_v43  ;;  %v3540_v57 = vmax.f32 %v1916_v11, %v6527_v29 }
 0x31b   : > { %v9183_v32 = vsel %vm5775_vm1, %v5910_v5, %v5909_v17  ;;  %v3541_v16 = vmax.f32 %v1924_v40, %v6528_v26  ;;  %v3542_v33 = vmax.f32 %v1923_v18, %v6529_v59  ;;  %v3764_v10 = vmax.f32 %v3539_v22, %v1916_v11  ;;  %v9913_v59 = vld [vmem:[#allocation27_spill] sm:$0xff] }
 0x31c   : > { %v4392_v7 = vadd.f32 %v7814_v52, %v4133_v6  ;;  %v4393_v19 = vadd.f32 %v7798_v47, %v4134_v20  ;;  %v4616_v37 = vmax.f32 %v4391_v44, 0.0  ;;  %v3765_v25 = vmax.f32 %v3540_v57, %v1924_v40 }
 0x31d   : > { %v3766_v43 = vmax.f32 %v3541_v16, %v1923_v18  ;;  %v5925_v35 = vsel %vm5775_vm1, %v9141_v13, %v9145_v12  ;;  %v3767_v29 = vmax.f32 %v3542_v33, %v1925_v8  ;;  %v4023_v5 = vmul.f32 %v7819_v54, %v3764_v10  ;;  %v9200_v8 = vpop.f32.mrb[61].mxu0 }
 0x31e   : > { %v4617_v34 = vmax.f32 %v4392_v7, 0.0  ;;  %v4618_v58 = vmax.f32 %v4393_v19, 0.0  ;;  %v7090_v4 = vpack.c.bf16 %v4616_v37, %v4616_v37  ;;  %v4024_v6 = vmul.f32 %v7775_v38, %v3765_v25 }
 0x31f   : > { %v4025_v26 = vmul.f32 %v7822_v55, %v3766_v43  ;;  %v9914_v11 = vmax.f32 %v9875_v27, %v9901_v45  ;;  %v4026_v44 = vmul.f32 %v7802_v48, %v3767_v29  ;;  %v4282_v13 = vadd.f32 %v7831_v60, %v4023_v5 }
 0x320   : > { %v7091_v17 = vpack.c.bf16 %v4617_v34, %v4617_v34  ;;  %v7092_v20 = vpack.c.bf16 %v4618_v58, %v4618_v58  ;;  %v5741_v18 = vunpack.c.l.b16 %v7090_v4  ;;  %v4283_v12 = vadd.f32 %v7778_v39, %v4024_v6 }
 0x321   : > { %v1453_v40 = vmax.f32 %v9914_v11, %v9913_v59  ;;  %v4284_v7 = vadd.f32 %v7834_v61, %v4025_v26  ;;  %v4285_v16 = vadd.f32 %v7806_v49, %v4026_v44  ;;  %v4507_v37 = vmax.f32 %v4282_v13, 0.0 }
 0x322   : > { %v5742_v22 = vunpack.c.l.b16 %v7091_v17  ;;  %v5743_v57 = vunpack.c.l.b16 %v7092_v20  ;;  %v4508_v33 = vmax.f32 %v4283_v12, 0.0  ;;  %v6646_v20 = vrot.slane %v9114_v31, 9 }
 0x323   : > { %v2453_v19 = vcombine.high %v1453_v40, %v1453_v40  ;;  %v2460_v27 = vrot.slane %v1453_v40, %v7760_v23  ;;  %v4509_v25 = vmax.f32 %v4284_v7, 0.0  ;;  %v4510_v58 = vmax.f32 %v4285_v16, 0.0 }
 0x324   : > { %v6116_v45 = vrot.slane %v5742_v22, 7  ;;  %v6118_v10 = vrot.slane %v5743_v57, 6  ;;  %v6981_v43 = vpack.c.bf16 %v4507_v37, %v4507_v37  ;;  %v6982_v4 = vpack.c.bf16 %v4508_v33, %v4508_v33 }
 0x325   : > { %v2467_v34 = vrot.slane %v2453_v19, %v7760_v23  ;;  %v2468_v29 = vcombine.high %v2460_v27, %v2460_v27  ;;  %v6983_v6 = vpack.c.bf16 %v4509_v25, %v4509_v25  ;;  %v6984_v11 = vpack.c.bf16 %v4510_v58, %v4510_v58 }
 0x326   : > { %v6117_v5 = vsel %vm5772_vm0, %v6116_v45, %v5741_v18  ;;  %v5632_v40 = vunpack.c.l.b16 %v6981_v43  ;;  %v5633_v44 = vunpack.c.l.b16 %v6982_v4  ;;  %v6647_v12 = vrot.slane %v2460_v27, 9 }
 0x327   : > { %v2469_v17 = vcombine.high %v2467_v34, %v2467_v34  ;;  %v9209_v26 = vsel %vm5775_vm1, %v6118_v10, %v6117_v5  ;;  %v5634_v13 = vunpack.c.l.b16 %v6983_v6  ;;  %v6648_v22 = vrot.slane %v2468_v29, 9 }
 0x328   : > { %v6649_v57 = vrot.slane %v2467_v34, 9  ;;  %v5635_v7 = vunpack.c.l.b16 %v6984_v11  ;;  %v5926_v19 = vrot.slane %v5632_v40, 5  ;;  %v5928_v16 = vrot.slane %v5633_v44, 4  ;;  %v9217_v44 = vpop.f32.mrb[62].mxu0 }
 0x329   : > { %v3659_v37 = vmax.f32 %v9114_v31, %v6646_v20  ;;  %v5930_v18 = vrot.slane %v5634_v13, 3  ;;  %v3660_v33 = vmax.f32 %v2460_v27, %v6647_v12  ;;  %v3661_v45 = vmax.f32 %v2468_v29, %v6648_v22  ;;  %9915 = vst [vmem:[#allocation37_spill] sm:$0xff] %v9217_v44  ;;  %v9916_v13 = vld [vmem:[#allocation28_spill] sm:$0xff] }
 0x32a   : > { %v3662_v25 = vmax.f32 %v2467_v34, %v6649_v57  ;;  %v5927_v10 = vsel %vm5778_vm2, %v5926_v19, %v5925_v35  ;;  %v5932_v5 = vrot.slane %v5635_v7, 2  ;;  %v6133_v43 = vsel %vm5775_vm1, %v9160_v41, %v9166_v50  ;;  %v6253_v50 = vld [vmem:[%s8033_s19 + $0x2c] sm:$0xf] }
 0x32b   : > { %v3884_v58 = vmax.f32 %v3659_v37, %v2460_v27  ;;  %v5929_v4 = vsel %vm5781_vm3, %v5928_v16, %v5927_v10  ;;  %v3885_v6 = vmax.f32 %v3660_v33, %v2468_v29  ;;  %v3886_v11 = vmax.f32 %v3661_v45, %v2467_v34 }
 0x32c   : > { %v3887_v40 = vmax.f32 %v3662_v25, %v2469_v17  ;;  %v5931_v31 = vsel %vm5784_vm4, %v5930_v18, %v5929_v4  ;;  %v9917_v35 = vmax.f32 %v9886_v1, %v9902_v53  ;;  %v6518_v12 = vrot.slane %v9132_v30, 9 }
 0x32d   : > { %v4143_v20 = vmul.f32 %v7819_v54, %v3884_v58  ;;  %v5933_v41 = vsel %vm5787_vm5, %v5932_v5, %v5931_v31  ;;  %v4144_v34 = vmul.f32 %v7775_v38, %v3885_v6  ;;  %v4145_v29 = vmul.f32 %v7822_v55, %v3886_v11 }
 0x32e   : > { %v1419_v27 = vmax.f32 %v9917_v35, %v9916_v13  ;;  %v4146_v17 = vmul.f32 %v7802_v48, %v3887_v40  ;;  %v6179_v22 = vpack.c.b16 %v5933_v41, %v5933_v41  ;;  %v3531_v37 = vmax.f32 %v9132_v30, %v6518_v12 }
 0x32f   : > { %v4402_v57 = vadd.f32 %v7831_v60, %v4143_v20  ;;  %v4403_v1 = vadd.f32 %v7778_v39, %v4144_v34  ;;  %v4404_v53 = vadd.f32 %v7834_v61, %v4145_v29  ;;  %v9241_v20 = vpop.f32.mrb[63].mxu0 }
 0x330   : > { %v1875_v7 = vcombine.high %v1419_v27, %v1419_v27  ;;  %v1882_v19 = vrot.slane %v1419_v27, %v7760_v23  ;;  %v4405_v16 = vadd.f32 %v7806_v49, %v4146_v17  ;;  %v6254_v18 = vsel %vm8050_vm8, %v6179_v22, %v6253_v50  ;;  %9918 = vst [vmem:[#allocation16_spill] sm:$0xff] %v9241_v20 }
 0x331   : > { %v4627_v33 = vmax.f32 %v4402_v57, 0.0  ;;  %6255 = vst [vmem:[%s8033_s19 + $0x2c] sm:$0xf] %v6254_v18  ;;  %v4628_v10 = vmax.f32 %v4403_v1, 0.0  ;;  %v4629_v5 = vmax.f32 %v4404_v53, 0.0 }
 0x332   : > { %v1889_v45 = vrot.slane %v1875_v7, %v7760_v23  ;;  %v1890_v25 = vcombine.high %v1882_v19, %v1882_v19  ;;  %v4630_v58 = vmax.f32 %v4405_v16, 0.0  ;;  %v6519_v4 = vrot.slane %v1882_v19, 9 }
 0x333   : > { %v7101_v6 = vpack.c.bf16 %v4627_v33, %v4627_v33  ;;  %v7102_v35 = vpack.c.bf16 %v4628_v10, %v4628_v10  ;;  %v7103_v30 = vpack.c.bf16 %v4629_v5, %v4629_v5  ;;  %v3756_v7 = vmax.f32 %v3531_v37, %v1882_v19 }
 0x334   : > { %v1891_v11 = vcombine.high %v1889_v45, %v1889_v45  ;;  %v6520_v40 = vrot.slane %v1890_v25, 9  ;;  %v6521_v31 = vrot.slane %v1889_v45, 9  ;;  %v7104_v27 = vpack.c.bf16 %v4630_v58, %v4630_v58 }
 0x335   : > { %v3532_v12 = vmax.f32 %v1882_v19, %v6519_v4  ;;  %v5752_v41 = vunpack.c.l.b16 %v7101_v6  ;;  %v5753_v17 = vunpack.c.l.b16 %v7102_v35  ;;  %v5754_v22 = vunpack.c.l.b16 %v7103_v30 }
 0x336   : > { %v6522_v50 = vrot.slane %v1891_v11, 9  ;;  %v3533_v34 = vmax.f32 %v1890_v25, %v6520_v40  ;;  %v3534_v29 = vmax.f32 %v1889_v45, %v6521_v31  ;;  %v5755_v57 = vunpack.c.l.b16 %v7104_v27  ;;  %v6285_v27 = vld [vmem:[%s8033_s19 + $0x6c] sm:$0xf] }
 0x337   : > { %v6134_v1 = vrot.slane %v5752_v41, 5  ;;  %v3757_v16 = vmax.f32 %v3532_v12, %v1890_v25  ;;  %v6136_v33 = vrot.slane %v5753_v17, 4  ;;  %v6138_v44 = vrot.slane %v5754_v22, 3 }
 0x338   : > { %v3535_v53 = vmax.f32 %v1891_v11, %v6522_v50  ;;  %v3758_v18 = vmax.f32 %v3533_v34, %v1889_v45  ;;  %v6140_v20 = vrot.slane %v5755_v57, 2  ;;  %v3759_v10 = vmax.f32 %v3534_v29, %v1891_v11  ;;  %v9919_v45 = vld [vmem:[#allocation29_spill] sm:$0xff] }
 0x339   : > { %v6135_v5 = vsel %vm5778_vm2, %v6134_v1, %v6133_v43  ;;  %v4015_v4 = vmul.f32 %v7819_v54, %v3756_v7  ;;  %v4016_v6 = vmul.f32 %v7775_v38, %v3757_v16  ;;  %v9920_v25 = vmax.f32 %v9890_v56, %v9903_v15 }
 0x33a   : > { %v3760_v58 = vmax.f32 %v3535_v53, %v9091_v42  ;;  %v6137_v40 = vsel %vm5781_vm3, %v6136_v33, %v6135_v5  ;;  %v4017_v19 = vmul.f32 %v7822_v55, %v3758_v18  ;;  %v4018_v37 = vmul.f32 %v7802_v48, %v3759_v10 }
 0x33b   : > { %v1451_v31 = vmax.f32 %v9920_v25, %v9919_v45  ;;  %v6139_v11 = vsel %vm5784_vm4, %v6138_v44, %v6137_v40  ;;  %v4274_v42 = vadd.f32 %v7831_v60, %v4015_v4  ;;  %v4275_v35 = vadd.f32 %v7778_v39, %v4016_v6 }
 0x33c   : > { %v4019_v43 = vmul.f32 %v7845_v2, %v3760_v58  ;;  %v6141_v30 = vsel %vm5787_vm5, %v6140_v20, %v6139_v11  ;;  %v4276_v12 = vadd.f32 %v7834_v61, %v4017_v19  ;;  %v4277_v41 = vadd.f32 %v7806_v49, %v4018_v37 }
 0x33d   : > { %v2419_v50 = vcombine.high %v1451_v31, %v1451_v31  ;;  %v6195_v34 = vpack.c.b16 %v6141_v30, %v6141_v30  ;;  %v4499_v15 = vmax.f32 %v4274_v42, 0.0  ;;  %v4500_v44 = vmax.f32 %v4275_v35, 0.0 }
 0x33e   : > { %v4278_v56 = vadd.f32 %v7848_v3, %v4019_v43  ;;  %v4501_v29 = vmax.f32 %v4276_v12, 0.0  ;;  %v4502_v17 = vmax.f32 %v4277_v41, 0.0  ;;  %v2426_v22 = vrot.slane %v1451_v31, %v7760_v23 }
 0x33f   : > { %v2433_v57 = vrot.slane %v2419_v50, %v7760_v23  ;;  %v6286_v20 = vsel %vm8050_vm8, %v6195_v34, %v6285_v27  ;;  %v6973_v1 = vpack.c.bf16 %v4499_v15, %v4499_v15  ;;  %v6974_v53 = vpack.c.bf16 %v4500_v44, %v4500_v44 }
 0x340   : > { %v4503_v7 = vmax.f32 %v4278_v56, 0.0  ;;  %6287 = vst [vmem:[%s8033_s19 + $0x6c] sm:$0xf] %v6286_v20  ;;  %v6975_v16 = vpack.c.bf16 %v4501_v29, %v4501_v29  ;;  %v6976_v18 = vpack.c.bf16 %v4502_v17, %v4502_v17  ;;  %v2434_v33 = vcombine.high %v2426_v22, %v2426_v22 }
 0x341   : > { %v2435_v10 = vcombine.high %v2433_v57, %v2433_v57  ;;  %v5624_v58 = vunpack.c.l.b16 %v6973_v1  ;;  %v5625_v4 = vunpack.c.l.b16 %v6974_v53  ;;  %v6638_v6 = vrot.slane %v9168_v9, 9  ;;  %v9921_v53 = vld [vmem:[#allocation30_spill] sm:$0xff] }
 0x342   : > { %v6977_v5 = vpack.c.bf16 %v4503_v7, %v4503_v7  ;;  %v5626_v40 = vunpack.c.l.b16 %v6975_v16  ;;  %v5627_v19 = vunpack.c.l.b16 %v6976_v18  ;;  %v6639_v37 = vrot.slane %v2426_v22, 9 }
 0x343   : > { %v6640_v25 = vrot.slane %v2434_v33, 9  ;;  %v5912_v11 = vrot.slane %v5624_v58, 5  ;;  %v5914_v43 = vrot.slane %v5625_v4, 4  ;;  %v6641_v42 = vrot.slane %v2433_v57, 9 }
 0x344   : > { %v5628_v31 = vunpack.c.l.b16 %v6977_v5  ;;  %v5916_v35 = vrot.slane %v5626_v40, 3  ;;  %v5918_v30 = vrot.slane %v5627_v19, 2  ;;  %v6642_v27 = vrot.slane %v2435_v10, 9 }
 0x345   : > { %v3651_v12 = vmax.f32 %v9168_v9, %v6638_v6  ;;  %v5913_v41 = vsel %vm5778_vm2, %v5912_v11, %v9183_v32  ;;  %v3652_v34 = vmax.f32 %v2426_v22, %v6639_v37  ;;  %v3653_v56 = vmax.f32 %v2434_v33, %v6640_v25  ;;  %v9922_v6 = vld [vmem:[#allocation23_spill] sm:$0xff] }
 0x346   : > { %v5920_v50 = vrot.slane %v5628_v31, 1  ;;  %v5915_v15 = vsel %vm5781_vm3, %v5914_v43, %v5913_v41  ;;  %v3654_v44 = vmax.f32 %v2433_v57, %v6641_v42  ;;  %v3655_v29 = vmax.f32 %v2435_v10, %v6642_v27  ;;  %v9924_v25 = vld [vmem:[#allocation31_spill] sm:$0xff]  ;;  %v9925_v31 = vld [vmem:[#allocation20_spill] sm:$0xff]  ;;  %v9926_v43 = vld [vmem:[#allocation22_spill] sm:$0xff] }
 0x347   : > { %v3876_v17 = vmax.f32 %v3651_v12, %v2426_v22  ;;  %v5917_v20 = vsel %vm5784_vm4, %v5916_v35, %v5915_v15  ;;  %v3877_v7 = vmax.f32 %v3652_v34, %v2434_v33  ;;  %v3878_v1 = vmax.f32 %v3653_v56, %v2433_v57  ;;  %v9923_v33 = vld [vmem:[#allocation19_spill] sm:$0xff]  ;;  %v9927_v12 = vld [vmem:[#allocation24_spill] sm:$0xff] }
 0x348   : > { %v1364_v16 = vmax.f32 %v9904_v21, %v9921_v53  ;;  %v5919_v9 = vsel %vm5787_vm5, %v5918_v30, %v5917_v20  ;;  %v3879_v18 = vmax.f32 %v3654_v44, %v2435_v10  ;;  %v3880_v32 = vmax.f32 %v3655_v29, %v9106_v63  ;;  %v9928_v56 = vld [vmem:[#allocation32_spill] sm:$0xff]  ;;  %v9929_v44 = vld [vmem:[#allocation26_spill] sm:$0xff] }
 0x349   : > { %v4135_v5 = vmul.f32 %v7819_v54, %v3876_v17  ;;  %v5921_v58 = vsel %vm5790_vm9, %v5920_v50, %v5919_v9  ;;  %v4136_v4 = vmul.f32 %v7775_v38, %v3877_v7  ;;  %v4137_v22 = vmul.f32 %v7822_v55, %v3878_v1  ;;  %v9930_v1 = vld [vmem:[#allocation33_spill] sm:$0xff] }
 0x34a   : > { %v1396_v57 = vmax.f32 %v9923_v33, %v9922_v6  ;;  %v6178_v40 = vpack.c.b16 %v5921_v58, %v5921_v58  ;;  %v4138_v21 = vmul.f32 %v7802_v48, %v3879_v18  ;;  %v4139_v19 = vmul.f32 %v7845_v2, %v3880_v32  ;;  %v9931_v32 = vld [vmem:[#allocation34_spill] sm:$0xff]  ;;  %v9932_v58 = vld [vmem:[#allocation35_spill] sm:$0xff] }
 0x34b   : > { %v4394_v10 = vadd.f32 %v7831_v60, %v4135_v5  ;;  %v4395_v63 = vadd.f32 %v7778_v39, %v4136_v4  ;;  %v4396_v37 = vadd.f32 %v7834_v61, %v4137_v22  ;;  %v1362_v11 = vmax.f32 %v9925_v31, %v9924_v25 }
 0x34c   : > { %6252 = vst.msk [vmem:[%s8033_s19 + $0x28] sm:$0xf] %vm6228_vm6, %v6178_v40  ;;  %v4397_v35 = vadd.f32 %v7806_v49, %v4138_v21  ;;  %v4398_v30 = vadd.f32 %v7848_v3, %v4139_v19  ;;  %v1424_v5 = vmax.f32 %v1364_v16, %v9931_v32  ;;  %v1456_v4 = vmax.f32 %v1396_v57, %v9932_v58  ;;  %v9933_v40 = vld [vmem:[#allocation36_spill] sm:$0xff] }
 0x34d   : > { %v4619_v27 = vmax.f32 %v4394_v10, 0.0  ;;  %v4620_v50 = vmax.f32 %v4395_v63, 0.0  ;;  %v4621_v34 = vmax.f32 %v4396_v37, 0.0  ;;  %v1422_v21 = vmax.f32 %v1362_v11, %v9933_v40 }
 0x34e   : > { %v4622_v17 = vmax.f32 %v4397_v35, 0.0  ;;  %v4623_v20 = vmax.f32 %v4398_v30, 0.0  ;;  %v1960_v63 = vcombine.high %v1424_v5, %v1424_v5  ;;  %v9309_v37 = vrot.slane %v1424_v5, %v7760_v23 }
 0x34f   : > { %v7093_v7 = vpack.c.bf16 %v4619_v27, %v4619_v27  ;;  %v7094_v9 = vpack.c.bf16 %v4620_v50, %v4620_v50  ;;  %v7095_v18 = vpack.c.bf16 %v4621_v34, %v4621_v34  ;;  %v2504_v30 = vcombine.high %v1456_v4, %v1456_v4 }
 0x350   : > { %v7096_v22 = vpack.c.bf16 %v4622_v17, %v4622_v17  ;;  %v7097_v6 = vpack.c.bf16 %v4623_v20, %v4623_v20  ;;  %v1974_v16 = vrot.slane %v1960_v63, %v7760_v23  ;;  %v1975_v57 = vcombine.high %v9309_v37, %v9309_v37 }
 0x351   : > { %v5744_v33 = vunpack.c.l.b16 %v7093_v7  ;;  %v5745_v19 = vunpack.c.l.b16 %v7094_v9  ;;  %v5746_v10 = vunpack.c.l.b16 %v7095_v18  ;;  %v6538_v20 = vrot.slane %v9309_v37, 9 }
 0x352   : > { %v5747_v25 = vunpack.c.l.b16 %v7096_v22  ;;  %v5748_v31 = vunpack.c.l.b16 %v7097_v6  ;;  %v9318_v9 = vcombine.high %v1974_v16, %v1974_v16  ;;  %v6539_v18 = vrot.slane %v1975_v57, 9 }
 0x353   : > { %v6120_v35 = vrot.slane %v5744_v33, 5  ;;  %v6122_v27 = vrot.slane %v5745_v19, 4  ;;  %v6124_v50 = vrot.slane %v5746_v10, 3  ;;  %v6540_v5 = vrot.slane %v1974_v16, 9 }
 0x354   : > { %v6126_v34 = vrot.slane %v5747_v25, 2  ;;  %v6128_v17 = vrot.slane %v5748_v31, 1  ;;  %v3551_v22 = vmax.f32 %v9309_v37, %v6538_v20  ;;  %v9323_v6 = vrot.slane %v1456_v4, %v7760_v23 }
 0x355   : > { %v6121_v11 = vsel %vm5778_vm2, %v6120_v35, %v9209_v26  ;;  %v2518_v33 = vrot.slane %v2504_v30, %v7760_v23  ;;  %v3552_v19 = vmax.f32 %v1975_v57, %v6539_v18  ;;  %v3553_v10 = vmax.f32 %v1974_v16, %v6540_v5 }
 0x356   : > { %v6123_v7 = vsel %vm5781_vm3, %v6122_v27, %v6121_v11  ;;  %v1926_v63 = vcombine.high %v1422_v21, %v1422_v21  ;;  %v3776_v31 = vmax.f32 %v3551_v22, %v1975_v57  ;;  %v2519_v35 = vcombine.high %v9323_v6, %v9323_v6 }
 0x357   : > { %v6125_v58 = vsel %vm5784_vm4, %v6124_v50, %v6123_v7  ;;  %v9330_v27 = vcombine.high %v2518_v33, %v2518_v33  ;;  %v3777_v11 = vmax.f32 %v3552_v19, %v1974_v16  ;;  %v3778_v4 = vmax.f32 %v3553_v10, %v9318_v9 }
 0x358   : > { %v6127_v26 = vsel %vm5787_vm5, %v6126_v34, %v6125_v58  ;;  %v6658_v30 = vrot.slane %v9323_v6, 9  ;;  %v4035_v34 = vmul.f32 %v7763_v28, %v3776_v31  ;;  %v6659_v20 = vrot.slane %v2519_v35, 9 }
 0x359   : > { %v6129_v25 = vsel %vm5790_vm9, %v6128_v17, %v6127_v26  ;;  %v6660_v7 = vrot.slane %v2518_v33, 9  ;;  %v1933_v18 = vrot.slane %v1422_v21, %v7760_v23  ;;  %v4036_v57 = vmul.f32 %v7811_v51, %v3777_v11 }
 0x35a   : > { %v6194_v50 = vpack.c.b16 %v6129_v25, %v6129_v25  ;;  %v4037_v17 = vmul.f32 %v7794_v46, %v3778_v4  ;;  %v3671_v5 = vmax.f32 %v9323_v6, %v6658_v30  ;;  %v1940_v16 = vrot.slane %v1926_v63, %v7760_v23 }
 0x35b   : > { %v4294_v58 = vadd.f32 %v9791_v0, %v4035_v34  ;;  %v3672_v22 = vmax.f32 %v2519_v35, %v6659_v20  ;;  %v3673_v26 = vmax.f32 %v2518_v33, %v6660_v7  ;;  %v1941_v19 = vcombine.high %v1933_v18, %v1933_v18 }
 0x35c   : > { %6284 = vst.msk [vmem:[%s8033_s19 + $0x68] sm:$0xf] %vm6228_vm6, %v6194_v50  ;;  %v4295_v10 = vadd.f32 %v7814_v52, %v4036_v57  ;;  %v4296_v25 = vadd.f32 %v7798_v47, %v4037_v17  ;;  %v3896_v21 = vmax.f32 %v3671_v5, %v2519_v35  ;;  %v6530_v53 = vrot.slane %v1933_v18, 9 }
 0x35d   : > { %v4519_v31 = vmax.f32 %v4294_v58, 0.0  ;;  %v3897_v50 = vmax.f32 %v3672_v22, %v2518_v33  ;;  %v3898_v11 = vmax.f32 %v3673_v26, %v9330_v27  ;;  %v6531_v63 = vrot.slane %v1941_v19, 9 }
 0x35e   : > { %v4520_v4 = vmax.f32 %v4295_v10, 0.0  ;;  %v4521_v29 = vmax.f32 %v4296_v25, 0.0  ;;  %v4155_v30 = vmul.f32 %v7763_v28, %v3896_v21  ;;  %v6532_v7 = vrot.slane %v1940_v16, 9 }
 0x35f   : > { %v6993_v15 = vpack.c.bf16 %v4519_v31, %v4519_v31  ;;  %v4156_v34 = vmul.f32 %v7811_v51, %v3897_v50  ;;  %v4157_v20 = vmul.f32 %v7794_v46, %v3898_v11  ;;  %v3543_v17 = vmax.f32 %v1933_v18, %v6530_v53 }
 0x360   : > { %v6994_v57 = vpack.c.bf16 %v4520_v4, %v4520_v4  ;;  %v6995_v41 = vpack.c.bf16 %v4521_v29, %v4521_v29  ;;  %v4414_v35 = vadd.f32 %v9791_v0, %v4155_v30  ;;  %v9352_v58 = vcombine.high %v1940_v16, %v1940_v16 }
 0x361   : > { %v4415_v33 = vadd.f32 %v7814_v52, %v4156_v34  ;;  %v4416_v5 = vadd.f32 %v7798_v47, %v4157_v20  ;;  %v3544_v22 = vmax.f32 %v1941_v19, %v6531_v63  ;;  %v3545_v21 = vmax.f32 %v1940_v16, %v6532_v7 }
 0x362   : > { %v5645_v26 = vunpack.c.l.b16 %v6994_v57  ;;  %v5646_v10 = vunpack.c.l.b16 %v6995_v41  ;;  %v4639_v25 = vmax.f32 %v4414_v35, 0.0  ;;  %v3768_v11 = vmax.f32 %v3543_v17, %v1941_v19  ;;  %v9934_v19 = vld [vmem:[#allocation40_spill] sm:$0xff] }
 0x363   : > { %v4640_v31 = vmax.f32 %v4415_v33, 0.0  ;;  %v4641_v50 = vmax.f32 %v4416_v5, 0.0  ;;  %v3769_v42 = vmax.f32 %v3544_v22, %v1940_v16  ;;  %v5644_v4 = vunpack.c.l.b16 %v6993_v15 }
 0x364   : > { %v5948_v29 = vrot.slane %v5645_v26, 7  ;;  %v7113_v40 = vpack.c.bf16 %v4639_v25, %v4639_v25  ;;  %v3770_v53 = vmax.f32 %v3545_v21, %v9352_v58  ;;  %v4027_v34 = vmul.f32 %v7763_v28, %v3768_v11  ;;  %v9936_v26 = vld [vmem:[#allocation14_spill] sm:$0xff] }
 0x365   : > { %v7114_v18 = vpack.c.bf16 %v4640_v31, %v4640_v31  ;;  %v7115_v30 = vpack.c.bf16 %v4641_v50, %v4641_v50  ;;  %v4028_v20 = vmul.f32 %v7811_v51, %v3769_v42  ;;  %v9360_v41 = vrot.slane %v5646_v10, 6 }
 0x366   : > { %v9358_v63 = vsel %vm5772_vm0, %v5948_v29, %v5644_v4  ;;  %v4029_v7 = vmul.f32 %v7794_v46, %v3770_v53  ;;  %v9935_v15 = vmax.f32 %v9909_v24, %v9926_v43  ;;  %v4286_v17 = vadd.f32 %v9791_v0, %v4027_v34 }
 0x367   : > { %v5765_v57 = vunpack.c.l.b16 %v7114_v18  ;;  %v5766_v35 = vunpack.c.l.b16 %v7115_v30  ;;  %v4287_v33 = vadd.f32 %v7814_v52, %v4028_v20  ;;  %v9937_v10 = vmax.f32 %v9911_v36, %v9927_v12 }
 0x368   : > { %v1454_v16 = vmax.f32 %v9935_v15, %v9934_v19  ;;  %v4288_v42 = vadd.f32 %v7798_v47, %v4029_v7  ;;  %v5764_v21 = vunpack.c.l.b16 %v7113_v40  ;;  %v4511_v24 = vmax.f32 %v4286_v17, 0.0 }
 0x369   : > { %v1425_v25 = vmax.f32 %v9937_v10, %v9936_v26  ;;  %v6156_v31 = vrot.slane %v5765_v57, 7  ;;  %v4512_v43 = vmax.f32 %v4287_v33, 0.0  ;;  %v9376_v53 = vrot.slane %v5766_v35, 6 }
 0x36a   : > { %v2470_v5 = vcombine.high %v1454_v16, %v1454_v16  ;;  %v2477_v22 = vrot.slane %v1454_v16, %v7760_v23  ;;  %v4513_v50 = vmax.f32 %v4288_v42, 0.0  ;;  %v6985_v18 = vpack.c.bf16 %v4511_v24, %v4511_v24 }
 0x36b   : > { %v6986_v30 = vpack.c.bf16 %v4512_v43, %v4512_v43  ;;  %v1977_v34 = vcombine.high %v1425_v25, %v1425_v25  ;;  %v1984_v16 = vrot.slane %v1425_v25, %v7760_v23  ;;  %v6541_v24 = vrot.slane %v9318_v9, 9 }
 0x36c   : > { %v2484_v11 = vrot.slane %v2470_v5, %v7760_v23  ;;  %v2485_v4 = vcombine.high %v2477_v22, %v2477_v22  ;;  %v6650_v29 = vrot.slane %v2477_v22, 9  ;;  %v6987_v20 = vpack.c.bf16 %v4513_v50, %v4513_v50 }
 0x36d   : > { %v5636_v12 = vunpack.c.l.b16 %v6985_v18  ;;  %v5637_v40 = vunpack.c.l.b16 %v6986_v30  ;;  %v1991_v42 = vrot.slane %v1977_v34, %v7760_v23  ;;  %v1992_v10 = vcombine.high %v1984_v16, %v1984_v16 }
 0x36e   : > { %v9378_v7 = vcombine.high %v2484_v11, %v2484_v11  ;;  %v6651_v19 = vrot.slane %v2485_v4, 9  ;;  %v6652_v36 = vrot.slane %v2484_v11, 9  ;;  %v3663_v15 = vmax.f32 %v2477_v22, %v6650_v29 }
 0x36f   : > { %v5638_v57 = vunpack.c.l.b16 %v6987_v20  ;;  %v5934_v35 = vrot.slane %v5637_v40, 7  ;;  %v9384_v43 = vsel %vm5772_vm0, %v6156_v31, %v5764_v21  ;;  %v6542_v29 = vrot.slane %v1984_v16, 9 }
 0x370   : > { %v3664_v17 = vmax.f32 %v2485_v4, %v6651_v19  ;;  %v3665_v33 = vmax.f32 %v2484_v11, %v6652_v36  ;;  %v3888_v5 = vmax.f32 %v3663_v15, %v2485_v4  ;;  %v6543_v30 = vrot.slane %v1992_v10, 9 }
 0x371   : > { %v5936_v50 = vrot.slane %v5638_v57, 6  ;;  %v5935_v22 = vsel %vm5772_vm0, %v5934_v35, %v5636_v12  ;;  %v1993_v20 = vcombine.high %v1991_v42, %v1991_v42  ;;  %v6544_v19 = vrot.slane %v1991_v42, 9 }
 0x372   : > { %v3889_v26 = vmax.f32 %v3664_v17, %v2484_v11  ;;  %v3890_v18 = vmax.f32 %v3665_v33, %v9378_v7  ;;  %v4147_v25 = vmul.f32 %v7763_v28, %v3888_v5  ;;  %v3554_v21 = vmax.f32 %v9318_v9, %v6541_v24 }
 0x373   : > { %v3555_v31 = vmax.f32 %v1984_v16, %v6542_v29  ;;  %v3556_v11 = vmax.f32 %v1992_v10, %v6543_v30  ;;  %v9394_v40 = vsel %vm5775_vm1, %v5936_v50, %v5935_v22  ;;  %v3557_v57 = vmax.f32 %v1991_v42, %v6544_v19 }
 0x374   : > { %v4148_v34 = vmul.f32 %v7811_v51, %v3889_v26  ;;  %v4149_v4 = vmul.f32 %v7794_v46, %v3890_v18  ;;  %v4406_v36 = vadd.f32 %v9791_v0, %v4147_v25  ;;  %v3779_v26 = vmax.f32 %v3554_v21, %v1984_v16  ;;  %v9938_v25 = vld [vmem:[#allocation15_spill] sm:$0xff] }
 0x375   : > { %v3780_v33 = vmax.f32 %v3555_v31, %v1992_v10  ;;  %v3781_v35 = vmax.f32 %v3556_v11, %v1991_v42  ;;  %v3782_v46 = vmax.f32 %v3557_v57, %v1993_v20  ;;  %v9939_v9 = vmax.f32 %v9913_v59, %v9928_v56 }
 0x376   : > { %v4407_v12 = vadd.f32 %v7814_v52, %v4148_v34  ;;  %v4408_v15 = vadd.f32 %v7798_v47, %v4149_v4  ;;  %v4631_v17 = vmax.f32 %v4406_v36, 0.0  ;;  %v4038_v50 = vmul.f32 %v7819_v54, %v3779_v26 }
 0x377   : > { %v1457_v24 = vmax.f32 %v9939_v9, %v9938_v25  ;;  %v4039_v22 = vmul.f32 %v7775_v38, %v3780_v33  ;;  %v4040_v30 = vmul.f32 %v7822_v55, %v3781_v35  ;;  %v4041_v16 = vmul.f32 %v7802_v48, %v3782_v46 }
 0x378   : > { %v4632_v5 = vmax.f32 %v4407_v12, 0.0  ;;  %v4633_v18 = vmax.f32 %v4408_v15, 0.0  ;;  %v7105_v29 = vpack.c.bf16 %v4631_v17, %v4631_v17  ;;  %v4297_v10 = vadd.f32 %v7831_v60, %v4038_v50 }
 0x379   : > { %v2521_v42 = vcombine.high %v1457_v24, %v1457_v24  ;;  %v4298_v20 = vadd.f32 %v7778_v39, %v4039_v22  ;;  %v4299_v19 = vadd.f32 %v7834_v61, %v4040_v30  ;;  %v5951_v59 = vsel %vm5775_vm1, %v9360_v41, %v9358_v63 }
 0x37a   : > { %v7106_v34 = vpack.c.bf16 %v4632_v5, %v4632_v5  ;;  %v7107_v4 = vpack.c.bf16 %v4633_v18, %v4633_v18  ;;  %v4300_v21 = vadd.f32 %v7806_v49, %v4041_v16  ;;  %v2528_v31 = vrot.slane %v1457_v24, %v7760_v23 }
 0x37b   : > { %v4522_v11 = vmax.f32 %v4297_v10, 0.0  ;;  %v4523_v12 = vmax.f32 %v4298_v20, 0.0  ;;  %v4524_v46 = vmax.f32 %v4299_v19, 0.0  ;;  %v2535_v15 = vrot.slane %v2521_v42, %v7760_v23 }
 0x37c   : > { %v5757_v56 = vunpack.c.l.b16 %v7106_v34  ;;  %v5758_v36 = vunpack.c.l.b16 %v7107_v4  ;;  %v5756_v57 = vunpack.c.l.b16 %v7105_v29  ;;  %v4525_v26 = vmax.f32 %v4300_v21, 0.0 }
 0x37d   : > { %v2536_v33 = vcombine.high %v2528_v31, %v2528_v31  ;;  %v6996_v5 = vpack.c.bf16 %v4522_v11, %v4522_v11  ;;  %v6997_v18 = vpack.c.bf16 %v4523_v12, %v4523_v12  ;;  %v6998_v63 = vpack.c.bf16 %v4524_v46, %v4524_v46 }
 0x37e   : > { %v6142_v17 = vrot.slane %v5757_v56, 7  ;;  %v9415_v35 = vrot.slane %v5758_v36, 6  ;;  %v6999_v41 = vpack.c.bf16 %v4525_v26, %v4525_v26  ;;  %v2537_v25 = vcombine.high %v2535_v15, %v2535_v15  ;;  %v9940_v26 = vld [vmem:[#allocation11_spill] sm:$0xff] }
 0x37f   : > { %v6661_v9 = vrot.slane %v9330_v27, 9  ;;  %v6662_v50 = vrot.slane %v2528_v31, 9  ;;  %v5647_v22 = vunpack.c.l.b16 %v6996_v5  ;;  %v5648_v30 = vunpack.c.l.b16 %v6997_v18 }
 0x380   : > { %v9419_v24 = vsel %vm5772_vm0, %v6142_v17, %v5756_v57  ;;  %v5649_v34 = vunpack.c.l.b16 %v6998_v63  ;;  %v5650_v29 = vunpack.c.l.b16 %v6999_v41  ;;  %v6663_v4 = vrot.slane %v2536_v33, 9 }
 0x381   : > { %v6664_v16 = vrot.slane %v2535_v15, 9  ;;  %v3674_v42 = vmax.f32 %v9330_v27, %v6661_v9  ;;  %v5952_v10 = vrot.slane %v5647_v22, 5  ;;  %v5954_v20 = vrot.slane %v5648_v30, 4 }
 0x382   : > { %v5956_v19 = vrot.slane %v5649_v34, 3  ;;  %v3675_v56 = vmax.f32 %v2528_v31, %v6662_v50  ;;  %v5958_v36 = vrot.slane %v5650_v29, 2  ;;  %v3676_v21 = vmax.f32 %v2536_v33, %v6663_v4 }
 0x383   : > { %v3677_v11 = vmax.f32 %v2535_v15, %v6664_v16  ;;  %v3899_v12 = vmax.f32 %v3674_v42, %v2528_v31  ;;  %v5953_v46 = vsel %vm5778_vm2, %v5952_v10, %v5951_v59  ;;  %v6159_v17 = vsel %vm5775_vm1, %v9376_v53, %v9384_v43  ;;  %v6257_v43 = vld [vmem:[%s8033_s19 + $0x34] sm:$0xf] }
 0x384   : > { %v3900_v57 = vmax.f32 %v3675_v56, %v2536_v33  ;;  %v9941_v27 = vmax.f32 %v9916_v13, %v9929_v44  ;;  %v5955_v18 = vsel %vm5781_vm3, %v5954_v20, %v5953_v46  ;;  %v3901_v63 = vmax.f32 %v3676_v21, %v2535_v15 }
 0x385   : > { %v3902_v41 = vmax.f32 %v3677_v11, %v2537_v25  ;;  %v4158_v9 = vmul.f32 %v7819_v54, %v3899_v12  ;;  %v5957_v31 = vsel %vm5784_vm4, %v5956_v19, %v5955_v18  ;;  %v6533_v42 = vrot.slane %v9352_v58, 9 }
 0x386   : > { %v1423_v5 = vmax.f32 %v9941_v27, %v9940_v26  ;;  %v4159_v59 = vmul.f32 %v7775_v38, %v3900_v57  ;;  %v5959_v53 = vsel %vm5787_vm5, %v5958_v36, %v5957_v31  ;;  %v4160_v13 = vmul.f32 %v7822_v55, %v3901_v63 }
 0x387   : > { %v4161_v44 = vmul.f32 %v7802_v48, %v3902_v41  ;;  %v4417_v15 = vadd.f32 %v7831_v60, %v4158_v9  ;;  %v6181_v25 = vpack.c.b16 %v5959_v53, %v5959_v53 }
 0x388   : > { %v1943_v33 = vcombine.high %v1423_v5, %v1423_v5  ;;  %v1950_v50 = vrot.slane %v1423_v5, %v7760_v23  ;;  %v4418_v22 = vadd.f32 %v7778_v39, %v4159_v59  ;;  %v4419_v29 = vadd.f32 %v7834_v61, %v4160_v13 }
 0x389   : > { %v4420_v4 = vadd.f32 %v7806_v49, %v4161_v44  ;;  %v4642_v16 = vmax.f32 %v4417_v15, 0.0  ;;  %v6258_v10 = vsel %vm8050_vm8, %v6181_v25, %v6257_v43  ;;  %v3546_v5 = vmax.f32 %v9352_v58, %v6533_v42 }
 0x38a   : > { %v1957_v30 = vrot.slane %v1943_v33, %v7760_v23  ;;  %v1958_v34 = vcombine.high %v1950_v50, %v1950_v50  ;;  %v4643_v20 = vmax.f32 %v4418_v22, 0.0  ;;  %v6534_v56 = vrot.slane %v1950_v50, 9  ;;  %6259 = vst [vmem:[%s8033_s19 + $0x34] sm:$0xf] %v6258_v10 }
 0x38b   : > { %v4644_v36 = vmax.f32 %v4419_v29, 0.0  ;;  %v4645_v21 = vmax.f32 %v4420_v4, 0.0  ;;  %v7116_v11 = vpack.c.bf16 %v4642_v16, %v4642_v16  ;;  %v3771_v15 = vmax.f32 %v3546_v5, %v1950_v50 }
 0x38c   : > { %v1959_v19 = vcombine.high %v1957_v30, %v1957_v30  ;;  %v6535_v12 = vrot.slane %v1958_v34, 9  ;;  %v7117_v46 = vpack.c.bf16 %v4643_v20, %v4643_v20  ;;  %v6536_v57 = vrot.slane %v1957_v30, 9 }
 0x38d   : > { %v7118_v18 = vpack.c.bf16 %v4644_v36, %v4644_v36  ;;  %v7119_v63 = vpack.c.bf16 %v4645_v21, %v4645_v21  ;;  %v5767_v41 = vunpack.c.l.b16 %v7116_v11  ;;  %v3547_v9 = vmax.f32 %v1950_v50, %v6534_v56 }
 0x38e   : > { %v6537_v27 = vrot.slane %v1959_v19, 9  ;;  %v5768_v31 = vunpack.c.l.b16 %v7117_v46  ;;  %v3548_v59 = vmax.f32 %v1958_v34, %v6535_v12  ;;  %v3549_v33 = vmax.f32 %v1957_v30, %v6536_v57  ;;  %v6289_v12 = vld [vmem:[%s8033_s19 + $0x74] sm:$0xf] }
 0x38f   : > { %v5769_v43 = vunpack.c.l.b16 %v7118_v18  ;;  %v5770_v13 = vunpack.c.l.b16 %v7119_v63  ;;  %v6160_v44 = vrot.slane %v5767_v41, 5  ;;  %v3772_v22 = vmax.f32 %v3547_v9, %v1958_v34 }
 0x390   : > { %v3550_v53 = vmax.f32 %v1959_v19, %v6537_v27  ;;  %v6162_v25 = vrot.slane %v5768_v31, 4  ;;  %v3773_v29 = vmax.f32 %v3548_v59, %v1957_v30  ;;  %v3774_v4 = vmax.f32 %v3549_v33, %v1959_v19  ;;  %v9942_v19 = vld [vmem:[#allocation38_spill] sm:$0xff] }
 0x391   : > { %v6161_v16 = vsel %vm5778_vm2, %v6160_v44, %v6159_v17  ;;  %v6164_v58 = vrot.slane %v5769_v43, 3  ;;  %v6166_v42 = vrot.slane %v5770_v13, 2  ;;  %v4030_v56 = vmul.f32 %v7819_v54, %v3771_v15 }
 0x392   : > { %v3775_v10 = vmax.f32 %v3550_v53, %v9309_v37  ;;  %v6163_v20 = vsel %vm5781_vm3, %v6162_v25, %v6161_v16  ;;  %v4031_v36 = vmul.f32 %v7775_v38, %v3772_v22  ;;  %v4032_v21 = vmul.f32 %v7822_v55, %v3773_v29 }
 0x393   : > { %v6165_v50 = vsel %vm5784_vm4, %v6164_v58, %v6163_v20  ;;  %v4033_v34 = vmul.f32 %v7802_v48, %v3774_v4  ;;  %v9943_v17 = vmax.f32 %v9919_v45, %v9930_v1  ;;  %v4289_v46 = vadd.f32 %v7831_v60, %v4030_v56 }
 0x394   : > { %v4034_v30 = vmul.f32 %v7845_v2, %v3775_v10  ;;  %v6167_v37 = vsel %vm5787_vm5, %v6166_v42, %v6165_v50  ;;  %v4290_v57 = vadd.f32 %v7778_v39, %v4031_v36  ;;  %v4291_v27 = vadd.f32 %v7834_v61, %v4032_v21 }
 0x395   : > { %v1455_v11 = vmax.f32 %v9943_v17, %v9942_v19  ;;  %v6197_v5 = vpack.c.b16 %v6167_v37, %v6167_v37  ;;  %v4292_v18 = vadd.f32 %v7806_v49, %v4033_v34  ;;  %v4514_v9 = vmax.f32 %v4289_v46, 0.0 }
 0x396   : > { %v4293_v63 = vadd.f32 %v7848_v3, %v4034_v30  ;;  %v4515_v31 = vmax.f32 %v4290_v57, 0.0  ;;  %v4516_v45 = vmax.f32 %v4291_v27, 0.0  ;;  %v6653_v16 = vrot.slane %v9378_v7, 9 }
 0x397   : > { %v2487_v41 = vcombine.high %v1455_v11, %v1455_v11  ;;  %v2494_v1 = vrot.slane %v1455_v11, %v7760_v23  ;;  %v6290_v59 = vsel %vm8050_vm8, %v6197_v5, %v6289_v12  ;;  %v4517_v33 = vmax.f32 %v4292_v18, 0.0 }
 0x398   : > { %v4518_v53 = vmax.f32 %v4293_v63, 0.0  ;;  %6291 = vst [vmem:[%s8033_s19 + $0x74] sm:$0xf] %v6290_v59  ;;  %v6988_v13 = vpack.c.bf16 %v4514_v9, %v4514_v9  ;;  %v6989_v44 = vpack.c.bf16 %v4515_v31, %v4515_v31  ;;  %v6990_v15 = vpack.c.bf16 %v4516_v45, %v4516_v45 }
 0x399   : > { %v2501_v43 = vrot.slane %v2487_v41, %v7760_v23  ;;  %v2502_v25 = vcombine.high %v2494_v1, %v2494_v1  ;;  %v6991_v22 = vpack.c.bf16 %v4517_v33, %v4517_v33  ;;  %v6654_v20 = vrot.slane %v2494_v1, 9 }
 0x39a   : > { %v6992_v29 = vpack.c.bf16 %v4518_v53, %v4518_v53  ;;  %v5639_v58 = vunpack.c.l.b16 %v6988_v13  ;;  %v5640_v42 = vunpack.c.l.b16 %v6989_v44  ;;  %v5641_v10 = vunpack.c.l.b16 %v6990_v15  ;;  %v9944_v44 = vld [vmem:[#allocation5_spill] sm:$0xff] }
 0x39b   : > { %v2503_v4 = vcombine.high %v2501_v43, %v2501_v43  ;;  %v5642_v56 = vunpack.c.l.b16 %v6991_v22  ;;  %v6655_v21 = vrot.slane %v2502_v25, 9  ;;  %v6656_v50 = vrot.slane %v2501_v43, 9 }
 0x39c   : > { %v5643_v36 = vunpack.c.l.b16 %v6992_v29  ;;  %v5938_v34 = vrot.slane %v5639_v58, 5  ;;  %v5940_v30 = vrot.slane %v5640_v42, 4  ;;  %v5942_v19 = vrot.slane %v5641_v10, 3 }
 0x39d   : > { %v6657_v17 = vrot.slane %v2503_v4, 9  ;;  %v5944_v11 = vrot.slane %v5642_v56, 2  ;;  %v3666_v12 = vmax.f32 %v9378_v7, %v6653_v16  ;;  %v3667_v46 = vmax.f32 %v2494_v1, %v6654_v20 }
 0x39e   : > { %v5946_v37 = vrot.slane %v5643_v36, 1  ;;  %v5939_v57 = vsel %vm5778_vm2, %v5938_v34, %v9394_v40  ;;  %v3668_v27 = vmax.f32 %v2502_v25, %v6655_v21  ;;  %v3669_v5 = vmax.f32 %v2501_v43, %v6656_v50  ;;  %v9945_v36 = vld [vmem:[#allocation36_spill] sm:$0xff] }
 0x39f   : > { %v3670_v18 = vmax.f32 %v2503_v4, %v6657_v17  ;;  %v5941_v63 = vsel %vm5781_vm3, %v5940_v30, %v5939_v57  ;;  %v3891_v41 = vmax.f32 %v3666_v12, %v2494_v1  ;;  %v3892_v9 = vmax.f32 %v3667_v46, %v2502_v25 }
 0x3a0   : > { %v1368_v31 = vmax.f32 %v9931_v32, %v9180_v14  ;;  %v5943_v45 = vsel %vm5784_vm4, %v5942_v19, %v5941_v63  ;;  %v3893_v59 = vmax.f32 %v3668_v27, %v2501_v43  ;;  %v3894_v33 = vmax.f32 %v3669_v5, %v2503_v4 }
 0x3a1   : > { %v3895_v7 = vmax.f32 %v3670_v18, %v9323_v6  ;;  %v5945_v53 = vsel %vm5787_vm5, %v5944_v11, %v5943_v45  ;;  %v4150_v40 = vmul.f32 %v7819_v54, %v3891_v41  ;;  %v4151_v13 = vmul.f32 %v7775_v38, %v3892_v9 }
 0x3a2   : > { %v1428_v15 = vmax.f32 %v1368_v31, %v9944_v44  ;;  %v5947_v1 = vsel %vm5790_vm9, %v5946_v37, %v5945_v53  ;;  %v4152_v25 = vmul.f32 %v7822_v55, %v3893_v59  ;;  %v4153_v14 = vmul.f32 %v7802_v48, %v3894_v33 }
 0x3a3   : > { %v4154_v32 = vmul.f32 %v7845_v2, %v3895_v7  ;;  %v6180_v43 = vpack.c.b16 %v5947_v1, %v5947_v1  ;;  %v4409_v6 = vadd.f32 %v7831_v60, %v4150_v40  ;;  %v4410_v22 = vadd.f32 %v7778_v39, %v4151_v13 }
 0x3a4   : > { %v2028_v29 = vcombine.high %v1428_v15, %v1428_v15  ;;  %v4411_v4 = vadd.f32 %v7834_v61, %v4152_v25  ;;  %v4412_v16 = vadd.f32 %v7806_v49, %v4153_v14  ;;  %v9497_v42 = vrot.slane %v1428_v15, %v7760_v23  ;;  %v9946_v14 = vld [vmem:[#allocation6_spill] sm:$0xff] }
 0x3a5   : > { %v4413_v58 = vadd.f32 %v7848_v3, %v4154_v32  ;;  %6256 = vst.msk [vmem:[%s8033_s19 + $0x30] sm:$0xf] %vm6228_vm6, %v6180_v43  ;;  %v4634_v10 = vmax.f32 %v4409_v6, 0.0  ;;  %v4635_v20 = vmax.f32 %v4410_v22, 0.0  ;;  %v1366_v21 = vmax.f32 %v9945_v36, %v9200_v8 }
 0x3a6   : > { %v2042_v56 = vrot.slane %v2028_v29, %v7760_v23  ;;  %v4636_v50 = vmax.f32 %v4411_v4, 0.0  ;;  %v4637_v34 = vmax.f32 %v4412_v16, 0.0  ;;  %v2043_v19 = vcombine.high %v9497_v42, %v9497_v42  ;;  %v9947_v29 = vld [vmem:[#allocation37_spill] sm:$0xff]  ;;  %v9948_v4 = vld [vmem:[#allocation14_spill] sm:$0xff] }
 0x3a7   : > { %v4638_v30 = vmax.f32 %v4413_v58, 0.0  ;;  %v6145_v17 = vsel %vm5775_vm1, %v9415_v35, %v9419_v24  ;;  %v7108_v11 = vpack.c.bf16 %v4634_v10, %v4634_v10  ;;  %v7109_v37 = vpack.c.bf16 %v4635_v20, %v4635_v20  ;;  %v9949_v10 = vld [vmem:[#allocation10_spill] sm:$0xff] }
 0x3a8   : > { %v6553_v12 = vrot.slane %v9497_v42, 9  ;;  %v7110_v46 = vpack.c.bf16 %v4636_v50, %v4636_v50  ;;  %v7111_v57 = vpack.c.bf16 %v4637_v34, %v4637_v34  ;;  %v6554_v5 = vrot.slane %v2043_v19, 9 }
 0x3a9   : > { %v7112_v27 = vpack.c.bf16 %v4638_v30, %v4638_v30  ;;  %v5759_v18 = vunpack.c.l.b16 %v7108_v11  ;;  %v5760_v8 = vunpack.c.l.b16 %v7109_v37  ;;  %v6555_v63 = vrot.slane %v2042_v56, 9  ;;  %v9950_v30 = vld [vmem:[#allocation7_spill] sm:$0xff] }
 0x3aa   : > { %v3566_v41 = vmax.f32 %v9497_v42, %v6553_v12  ;;  %v5761_v9 = vunpack.c.l.b16 %v7110_v46  ;;  %v5762_v31 = vunpack.c.l.b16 %v7111_v57  ;;  %v3567_v59 = vmax.f32 %v2043_v19, %v6554_v5 }
 0x3ab   : > { %v5763_v45 = vunpack.c.l.b16 %v7112_v27  ;;  %v6146_v33 = vrot.slane %v5759_v18, 5  ;;  %v2044_v7 = vcombine.high %v2042_v56, %v2042_v56  ;;  %v3568_v35 = vmax.f32 %v2042_v56, %v6555_v63 }
 0x3ac   : > { %v3791_v24 = vmax.f32 %v3566_v41, %v2043_v19  ;;  %v6148_v53 = vrot.slane %v5760_v8, 4  ;;  %v6150_v40 = vrot.slane %v5761_v9, 3  ;;  %v6152_v13 = vrot.slane %v5762_v31, 2 }
 0x3ad   : > { %v3792_v44 = vmax.f32 %v3567_v59, %v2042_v56  ;;  %v6147_v15 = vsel %vm5778_vm2, %v6146_v33, %v6145_v17  ;;  %v3793_v1 = vmax.f32 %v3568_v35, %v2044_v7  ;;  %v1426_v32 = vmax.f32 %v1366_v21, %v9946_v14 }
 0x3ae   : > { %v4050_v25 = vmul.f32 %v7763_v28, %v3791_v24  ;;  %v6149_v43 = vsel %vm5781_vm3, %v6148_v53, %v6147_v15  ;;  %v6154_v6 = vrot.slane %v5763_v45, 1  ;;  %v1369_v16 = vmax.f32 %v9948_v4, %v9947_v29 }
 0x3af   : > { %v4051_v22 = vmul.f32 %v7811_v51, %v3792_v44  ;;  %v6151_v58 = vsel %vm5784_vm4, %v6150_v40, %v6149_v43  ;;  %v4052_v20 = vmul.f32 %v9949_v10, %v3793_v1  ;;  %v1994_v36 = vcombine.high %v1426_v32, %v1426_v32 }
 0x3b0   : > { %v4309_v56 = vadd.f32 %v9791_v0, %v4050_v25  ;;  %v6153_v50 = vsel %vm5787_vm5, %v6152_v13, %v6151_v58  ;;  %v2001_v34 = vrot.slane %v1426_v32, %v7760_v23  ;;  %v1429_v19 = vmax.f32 %v1369_v16, %v9950_v30 }
 0x3b1   : > { %v4310_v21 = vadd.f32 %v7814_v52, %v4051_v22  ;;  %v6155_v17 = vsel %vm5790_vm9, %v6154_v6, %v6153_v50  ;;  %v4311_v11 = vadd.f32 %v7798_v47, %v4052_v20  ;;  %v2008_v37 = vrot.slane %v1994_v36, %v7760_v23 }
 0x3b2   : > { %v6196_v12 = vpack.c.b16 %v6155_v17, %v6155_v17  ;;  %v2009_v57 = vcombine.high %v2001_v34, %v2001_v34  ;;  %v6545_v27 = vrot.slane %v2001_v34, 9  ;;  %v4534_v5 = vmax.f32 %v4309_v56, 0.0 }
 0x3b3   : > { %v4535_v46 = vmax.f32 %v4310_v21, 0.0  ;;  %v4536_v18 = vmax.f32 %v4311_v11, 0.0  ;;  %v6547_v8 = vrot.slane %v2008_v37, 9  ;;  %v6556_v63 = vrot.slane %v2044_v7, 9 }
 0x3b4   : > { %6288 = vst.msk [vmem:[%s8033_s19 + $0x70] sm:$0xf] %vm6228_vm6, %v6196_v12  ;;  %v6546_v9 = vrot.slane %v2009_v57, 9  ;;  %v3558_v31 = vmax.f32 %v2001_v34, %v6545_v27  ;;  %v2045_v45 = vcombine.high %v1429_v19, %v1429_v19  ;;  %v9530_v33 = vcombine.high %v2008_v37, %v2008_v37 }
 0x3b5   : > { %v7009_v41 = vpack.c.bf16 %v4535_v46, %v4535_v46  ;;  %v7010_v59 = vpack.c.bf16 %v4536_v18, %v4536_v18  ;;  %v3560_v35 = vmax.f32 %v2008_v37, %v6547_v8  ;;  %v2052_v24 = vrot.slane %v1429_v19, %v7760_v23  ;;  %v9952_v8 = vld [vmem:[#allocation8_spill] sm:$0xff] }
 0x3b6   : > { %v3559_v40 = vmax.f32 %v2009_v57, %v6546_v9  ;;  %v3783_v13 = vmax.f32 %v3558_v31, %v2009_v57  ;;  %v2059_v44 = vrot.slane %v2045_v45, %v7760_v23  ;;  %v7008_v14 = vpack.c.bf16 %v4534_v5, %v4534_v5 }
 0x3b7   : > { %v5660_v53 = vunpack.c.l.b16 %v7009_v41  ;;  %v3785_v15 = vmax.f32 %v3560_v35, %v9530_v33  ;;  %v2060_v1 = vcombine.high %v2052_v24, %v2052_v24  ;;  %v6557_v25 = vrot.slane %v2052_v24, 9 }
 0x3b8   : > { %v3784_v32 = vmax.f32 %v3559_v40, %v2008_v37  ;;  %v5661_v43 = vunpack.c.l.b16 %v7010_v59  ;;  %v4042_v6 = vmul.f32 %v7763_v28, %v3783_v13  ;;  %v6559_v29 = vrot.slane %v2059_v44, 9 }
 0x3b9   : > { %v6558_v22 = vrot.slane %v2060_v1, 9  ;;  %v5974_v4 = vrot.slane %v5660_v53, 7  ;;  %v2061_v58 = vcombine.high %v2059_v44, %v2059_v44  ;;  %v3569_v20 = vmax.f32 %v2044_v7, %v6556_v63  ;;  %v9951_v7 = vld [vmem:[#allocation16_spill] sm:$0xff] }
 0x3ba   : > { %v4043_v16 = vmul.f32 %v7811_v51, %v3784_v32  ;;  %v4044_v56 = vmul.f32 %v9949_v10, %v3785_v15  ;;  %v3570_v36 = vmax.f32 %v2052_v24, %v6557_v25  ;;  %v3572_v21 = vmax.f32 %v2059_v44, %v6559_v29 }
 0x3bb   : > { %v3571_v50 = vmax.f32 %v2060_v1, %v6558_v22  ;;  %v5659_v34 = vunpack.c.l.b16 %v7008_v14  ;;  %v3794_v19 = vmax.f32 %v3569_v20, %v2052_v24  ;;  %v4301_v17 = vadd.f32 %v9791_v0, %v4042_v6 }
 0x3bc   : > { %v4302_v30 = vadd.f32 %v7814_v52, %v4043_v16  ;;  %v3795_v11 = vmax.f32 %v3570_v36, %v2060_v1  ;;  %v3797_v37 = vmax.f32 %v3572_v21, %v2061_v58  ;;  %v5976_v46 = vrot.slane %v5661_v43, 6 }
 0x3bd   : > { %v3796_v28 = vmax.f32 %v3571_v50, %v2059_v44  ;;  %v5975_v12 = vsel %vm5772_vm0, %v5974_v4, %v5659_v34  ;;  %v4053_v51 = vmul.f32 %v7819_v54, %v3794_v19  ;;  %v1367_v10 = vmax.f32 %v9940_v26, %v9951_v7 }
 0x3be   : > { %v4303_v57 = vadd.f32 %v7798_v47, %v4044_v56  ;;  %v4054_v27 = vmul.f32 %v7775_v38, %v3795_v11  ;;  %v4056_v5 = vmul.f32 %v7802_v48, %v3797_v37  ;;  %v4527_v0 = vmax.f32 %v4302_v30, 0.0 }
 0x3bf   : > { %v4055_v52 = vmul.f32 %v7822_v55, %v3796_v28  ;;  %v4312_v18 = vadd.f32 %v7831_v60, %v4053_v51  ;;  %v1427_v63 = vmax.f32 %v1367_v10, %v9952_v8  ;;  %v4526_v41 = vmax.f32 %v4301_v17, 0.0 }
 0x3c0   : > { %v4313_v9 = vadd.f32 %v7778_v39, %v4054_v27  ;;  %v4315_v26 = vadd.f32 %v7806_v49, %v4056_v5  ;;  %v5977_v47 = vsel %vm5775_vm1, %v5976_v46, %v5975_v12  ;;  %v4528_v24 = vmax.f32 %v4303_v57, 0.0 }
 0x3c1   : > { %v4314_v31 = vadd.f32 %v7834_v61, %v4055_v52  ;;  %v4537_v45 = vmax.f32 %v4312_v18, 0.0  ;;  %v2011_v59 = vcombine.high %v1427_v63, %v1427_v63  ;;  %v2018_v35 = vrot.slane %v1427_v63, %v7760_v23 }
 0x3c2   : > { %v4538_v53 = vmax.f32 %v4313_v9, 0.0  ;;  %v4540_v13 = vmax.f32 %v4315_v26, 0.0  ;;  %v7001_v44 = vpack.c.bf16 %v4527_v0, %v4527_v0  ;;  %v6548_v6 = vrot.slane %v9530_v33, 9 }
 0x3c3   : > { %v4539_v40 = vmax.f32 %v4314_v31, 0.0  ;;  %v7011_v15 = vpack.c.bf16 %v4537_v45, %v4537_v45  ;;  %v2025_v1 = vrot.slane %v2011_v59, %v7760_v23  ;;  %v2026_v25 = vcombine.high %v2018_v35, %v2018_v35 }
 0x3c4   : > { %v7012_v14 = vpack.c.bf16 %v4538_v53, %v4538_v53  ;;  %v7014_v43 = vpack.c.bf16 %v4540_v13, %v4540_v13  ;;  %v7000_v22 = vpack.c.bf16 %v4526_v41, %v4526_v41  ;;  %v6549_v16 = vrot.slane %v2018_v35, 9 }
 0x3c5   : > { %v7013_v32 = vpack.c.bf16 %v4539_v40, %v4539_v40  ;;  %v5662_v29 = vunpack.c.l.b16 %v7011_v15  ;;  %v2027_v4 = vcombine.high %v2025_v1, %v2025_v1  ;;  %v7002_v58 = vpack.c.bf16 %v4528_v24, %v4528_v24 }
 0x3c6   : > { %v5663_v20 = vunpack.c.l.b16 %v7012_v14  ;;  %v5665_v36 = vunpack.c.l.b16 %v7014_v43  ;;  %v6550_v21 = vrot.slane %v2026_v25, 9  ;;  %v6551_v34 = vrot.slane %v2025_v1, 9 }
 0x3c7   : > { %v5664_v56 = vunpack.c.l.b16 %v7013_v32  ;;  %v5978_v50 = vrot.slane %v5662_v29, 5  ;;  %v6552_v30 = vrot.slane %v2027_v4, 9  ;;  %v5652_v19 = vunpack.c.l.b16 %v7001_v44 }
 0x3c8   : > { %v5980_v23 = vrot.slane %v5663_v20, 4  ;;  %v3561_v11 = vmax.f32 %v9530_v33, %v6548_v6  ;;  %v3562_v37 = vmax.f32 %v2018_v35, %v6549_v16  ;;  %v3563_v12 = vmax.f32 %v2026_v25, %v6550_v21  ;;  %v6261_v33 = vld [vmem:[%s8033_s19 + $0x3c] sm:$0xf] }
 0x3c9   : > { %v5982_v17 = vrot.slane %v5664_v56, 3  ;;  %v5979_v28 = vsel %vm5778_vm2, %v5978_v50, %v5977_v47  ;;  %v3564_v46 = vmax.f32 %v2025_v1, %v6551_v34  ;;  %v5984_v7 = vrot.slane %v5665_v36, 2 }
 0x3ca   : > { %v5981_v51 = vsel %vm5781_vm3, %v5980_v23, %v5979_v28  ;;  %v3565_v10 = vmax.f32 %v2027_v4, %v6552_v30  ;;  %v3786_v57 = vmax.f32 %v3561_v11, %v2018_v35  ;;  %v3787_v52 = vmax.f32 %v3562_v37, %v2026_v25 }
 0x3cb   : > { %v5983_v27 = vsel %vm5784_vm4, %v5982_v17, %v5981_v51  ;;  %v3788_v5 = vmax.f32 %v3563_v12, %v2025_v1  ;;  %v3789_v0 = vmax.f32 %v3564_v46, %v2027_v4  ;;  %v5653_v18 = vunpack.c.l.b16 %v7002_v58 }
 0x3cc   : > { %v5985_v8 = vsel %vm5787_vm5, %v5984_v7, %v5983_v27  ;;  %v3790_v63 = vmax.f32 %v3565_v10, %v9497_v42  ;;  %v4045_v41 = vmul.f32 %v7819_v54, %v3786_v57  ;;  %v4046_v31 = vmul.f32 %v7775_v38, %v3787_v52 }
 0x3cd   : > { %v6183_v9 = vpack.c.b16 %v5985_v8, %v5985_v8  ;;  %v4047_v26 = vmul.f32 %v7822_v55, %v3788_v5  ;;  %v4048_v45 = vmul.f32 %v7802_v48, %v3789_v0  ;;  %v5960_v47 = vrot.slane %v5652_v19, 7 }
 0x3ce   : > { %v4049_v59 = vmul.f32 %v7845_v2, %v3790_v63  ;;  %v4304_v35 = vadd.f32 %v7831_v60, %v4045_v41  ;;  %v4305_v53 = vadd.f32 %v7778_v39, %v4046_v31  ;;  %v5651_v40 = vunpack.c.l.b16 %v7000_v22 }
 0x3cf   : > { %v6262_v24 = vsel %vm8050_vm8, %v6183_v9, %v6261_v33  ;;  %v4306_v42 = vadd.f32 %v7834_v61, %v4047_v26  ;;  %v4307_v54 = vadd.f32 %v7806_v49, %v4048_v45  ;;  %v5962_v48 = vrot.slane %v5653_v18, 6 }
 0x3d0   : > { %6263 = vst [vmem:[%s8033_s19 + $0x3c] sm:$0xf] %v6262_v24  ;;  %v4308_v38 = vadd.f32 %v7848_v3, %v4049_v59  ;;  %v4529_v55 = vmax.f32 %v4304_v35, 0.0  ;;  %v4530_v13 = vmax.f32 %v4305_v53, 0.0  ;;  %v5961_v60 = vsel %vm5772_vm0, %v5960_v47, %v5651_v40 }
 0x3d1   : > { %v4531_v44 = vmax.f32 %v4306_v42, 0.0  ;;  %v4532_v2 = vmax.f32 %v4307_v54, 0.0  ;;  %v5963_v49 = vsel %vm5775_vm1, %v5962_v48, %v5961_v60 }
 0x3d2   : > { %v4533_v15 = vmax.f32 %v4308_v38, 0.0  ;;  %v7003_v62 = vpack.c.bf16 %v4529_v55, %v4529_v55  ;;  %v7004_v1 = vpack.c.bf16 %v4530_v13, %v4530_v13 }
 0x3d3   : > { %v7005_v25 = vpack.c.bf16 %v4531_v44, %v4531_v44  ;;  %v7006_v39 = vpack.c.bf16 %v4532_v2, %v4532_v2 }
 0x3d4   : > { %v7007_v14 = vpack.c.bf16 %v4533_v15, %v4533_v15  ;;  %v5654_v61 = vunpack.c.l.b16 %v7003_v62  ;;  %v5655_v32 = vunpack.c.l.b16 %v7004_v1 }
 0x3d5   : > { %v5656_v43 = vunpack.c.l.b16 %v7005_v25  ;;  %v5657_v3 = vunpack.c.l.b16 %v7006_v39 }
 0x3d6   : > { %v5658_v6 = vunpack.c.l.b16 %v7007_v14  ;;  %v5964_v22 = vrot.slane %v5654_v61, 5  ;;  %v5966_v29 = vrot.slane %v5655_v32, 4 }
 0x3d7   : > { %v5968_v16 = vrot.slane %v5656_v43, 3  ;;  %v5970_v20 = vrot.slane %v5657_v3, 2 }
 0x3d8   : > { %v5965_v4 = vsel %vm5778_vm2, %v5964_v22, %v5963_v49  ;;  %v5972_v36 = vrot.slane %v5658_v6, 1 }
 0x3d9   : > { %v5967_v58 = vsel %vm5781_vm3, %v5966_v29, %v5965_v4 }
 0x3da   : > { %v5969_v56 = vsel %vm5784_vm4, %v5968_v16, %v5967_v58 }
 0x3db   : > { %v5971_v50 = vsel %vm5787_vm5, %v5970_v20, %v5969_v56 }
 0x3dc   : > { %v5973_v21 = vsel %vm5790_vm9, %v5972_v36, %v5971_v50 }
 0x3dd   : > { %v6182_v34 = vpack.c.b16 %v5973_v21, %v5973_v21 }
 0x3df   : > { %6260 = vst.msk [vmem:[%s8033_s19 + $0x38] sm:$0xf] %vm6228_vm6, %v6182_v34 }
 0x3e0 PF: > { %p14_p8 = scmp.ge.s32.totalorder %s7584_s20, 4   ;;  %s9953_s15 = smov %s7523_s16 }
 0x3e1   : > { %s9954_s16 = smov %s7527_s17  ;;  %s9955_s17 = smov %s7594_s23 }
 0x3e2   : > { %s9956_s18 = smov %s7584_s20  ;;  %16 = sbr.rel (!%p14_p8) target bundleno = 3 (0x3), region = 76 }
 0x3e9   :  { %6313 = vsyncpa [#allocation3], 1 }
 0x3ea   :  { %6315 = vsyncpa [#allocation3 + $0x1], 1 }

</bundles_post_ra>
